<compile_context>
chip_gen: v5e
topology: v5e:2x2
jax: 0.10.0
libtpu: 0.0.40
codegen_flags: <defaults>
</compile_context>

<pallas_src>
import functools

import jax
import jax.numpy as jnp
from jax.experimental import pallas as pl
from jax.experimental.pallas import tpu as pltpu


def _round_up(x, m):
    return ((x + m - 1) // m) * m


def _voxelize_kernel(flat_ref, feat_ref, out_ref, acc_ref, aug_ref, *,
                     C, V_tile, compute_dtype):
    """One (batch, V-chunk, N-tile) grid step of the scatter-average.

    flat_ref: (1, n_tile, 1) int32   flat voxel id per point (-1 = padding)
    feat_ref: (1, C, n_tile) f32     point features
    out_ref:  (1, C, V_tile) f32     averaged voxel features for this V chunk
    acc_ref:  (C+1, V_tile) f32      running sums (rows 0..C-1) + counts (row C)
    aug_ref:  (C+1, n_tile) f32      staged features + appended ones row
    """
    v_chunk = pl.program_id(1)
    n_step = pl.program_id(2)

    @pl.when(n_step == 0)
    def _init():
        acc_ref[...] = jnp.zeros_like(acc_ref)

    # Stage features and a ones row: counts ride the same matmul, eliminating
    # any cross-sublane reduction and avoiding an HBM-side feature concat.
    feats = feat_ref[0]                                   # (C, n_tile) f32
    n_tile = feats.shape[1]
    aug_ref[0:C, :] = feats
    aug_ref[C:C + 1, :] = jnp.ones((1, n_tile), aug_ref.dtype)

    # One-hot scatter matrix for the current V chunk only.  Compare in 32-bit,
    # pack once to compute_dtype (bf16 by default: exact for 0/1, halves the
    # materialized slab and the MXU operand push).  Padded points (flat == -1)
    # and points outside this chunk match no column -> contribute nothing.
    flat = flat_ref[0]                                    # (n_tile, 1) int32
    local = flat - v_chunk * V_tile                       # id within this chunk
    col = jax.lax.broadcasted_iota(jnp.int32, (n_tile, V_tile), 1)
    onehot = (local == col).astype(compute_dtype)         # (n_tile, V_tile)

    # MXU: per-voxel feature sums AND per-voxel counts in a single matmul,
    # accumulated in f32.
    acc_ref[...] += jnp.dot(aug_ref[...].astype(compute_dtype), onehot,
                            preferred_element_type=jnp.float32)

    @pl.when(n_step == pl.num_programs(2) - 1)
    def _finalize():
        counts = acc_ref[C:C + 1, :]                                  # (1, V_tile)
        inv = pl.reciprocal(jnp.maximum(counts, 1.0), approx=False)   # exact
        out_ref[0] = (acc_ref[:C, :] * inv).astype(out_ref.dtype)


def _vmem_limit_bytes(n_tile, v_tile, C, compute_itemsize):
    """Right-size the scoped-VMEM request from the actual footprint."""
    onehot = n_tile * v_tile * compute_itemsize            # materialized one-hot
    cmp_tmp = 2 * n_tile * v_tile * 4                      # i32 iota + broadcast ids
    acc = (C + 1) * v_tile * 4
    aug = (C + 1) * n_tile * 4
    io = (2 * n_tile * 128 * 4            # flat id blocks (lane-padded), 2 bufs
          + 2 * max(C, 8) * n_tile * 4    # feature blocks, 2 bufs
          + 2 * max(C, 8) * v_tile * 4)   # output blocks, 2 bufs
    total = onehot + cmp_tmp + acc + aug + io
    # 2x headroom for compiler temporaries / spills; floor keeps small configs
    # comfortable, cap stays well below every generation's physical VMEM.
    return int(min(max(2 * total, 32 * 1024 * 1024), 96 * 1024 * 1024))


def voxelization_forward(features, coords, search_area, divide=(20, 20, 20),
                         mode=True, n_tile=512, v_tile=2048, use_bf16=True):
    """features: (B, C, N), coords: (B, N, 3), search_area: (B, 3) -> (B, C, X, Y, Z)."""
    del mode  # both modes have identical forward semantics (average voxelize)
    X, Y, Z = int(divide[0]), int(divide[1]), int(divide[2])
    V = X * Y * Z
    B, C, N = features.shape
    assert coords.shape == (B, N, 3)
    assert search_area.shape == (B, 3)

    features = features.astype(jnp.float32)
    coords = coords.astype(jnp.float32)
    search_area = search_area.astype(jnp.float32)

    # ---- voxel-id computation (cheap elementwise; plain XLA, not in-kernel) ----
    # Faithful to the PyTorch forward, which hard-codes the /20 divisor and the
    # [0, 19] clamp regardless of `divide` (min_voxel_coord IS derived from it).
    voxel_size = search_area / 20.0                                  # (B, 3)
    disc = jnp.floor(coords / voxel_size[:, None, :])                # (B, N, 3)
    min_coord = -jnp.floor(jnp.asarray([X, Y, Z], jnp.float32) / 2.0)
    vi = jnp.clip(disc - min_coord, 0.0, 19.0).astype(jnp.int32)     # (B, N, 3)
    flat = vi[..., 0] * (Y * Z) + vi[..., 1] * Z + vi[..., 2]        # (B, N) int32

    # ---- pad to TPU-friendly shapes -------------------------------------------
    V_tile = min(int(v_tile), _round_up(V, 128))    # lane-dense V chunk
    V_pad = _round_up(V, V_tile)                    # 8000 -> 8192 for 20^3
    v_chunks = V_pad // V_tile
    N_pad = _round_up(max(N, n_tile), n_tile)
    n_tiles = N_pad // n_tile
    pad_n = N_pad - N

    flat_p = jnp.pad(flat, ((0, 0), (0, pad_n)), constant_values=-1)
    flat_p = flat_p.reshape(B, N_pad, 1)            # per-point id on sublane axis
    # Only pad features along N (no augmented HBM copy; ones row is in-kernel).
    feats_p = (jnp.pad(features, ((0, 0), (0, 0), (0, pad_n)))
               if pad_n else features)

    compute_dtype = jnp.bfloat16 if use_bf16 else jnp.float32
    kernel = functools.partial(_voxelize_kernel, C=C, V_tile=V_tile,
                               compute_dtype=compute_dtype)
    vmem_limit = _vmem_limit_bytes(n_tile, V_tile, C,
                                   jnp.dtype(compute_dtype).itemsize)

    out_flat = pl.pallas_call(
        kernel,
        out_shape=jax.ShapeDtypeStruct((B, C, V_pad), jnp.float32),
        grid_spec=pltpu.PrefetchScalarGridSpec(
            num_scalar_prefetch=0,
            grid=(B, v_chunks, n_tiles),
            in_specs=[
                pl.BlockSpec((1, n_tile, 1), lambda b, v, n: (b, n, 0)),
                pl.BlockSpec((1, C, n_tile), lambda b, v, n: (b, 0, n)),
            ],
            out_specs=pl.BlockSpec((1, C, V_tile), lambda b, v, n: (b, 0, v)),
            scratch_shapes=[
                pltpu.VMEM((C + 1, V_tile), jnp.float32),   # sums + counts
                pltpu.VMEM((C + 1, n_tile), jnp.float32),   # staged feats + ones
            ],
        ),
        compiler_params=pltpu.CompilerParams(
            dimension_semantics=("parallel", "parallel", "arbitrary"),
            vmem_limit_bytes=vmem_limit,
        ),
    )(flat_p, feats_p)

    return out_flat[:, :, :V].reshape(B, C, X, Y, Z)


def voxelization_ref(features, coords, search_area, divide=(20, 20, 20)):
    """Pure-JAX reference reproducing the PyTorch semantics (f32 scatter-add)."""
    X, Y, Z = int(divide[0]), int(divide[1]), int(divide[2])
    V = X * Y * Z
    B, C, N = features.shape
    voxel_size = search_area.astype(jnp.float32) / 20.0               # (B, 3)
    disc = jnp.floor(coords / voxel_size[:, None, :])                 # (B, N, 3)
    min_coord = -jnp.floor(jnp.asarray([X, Y, Z], jnp.float32) / 2.0)
    vi = jnp.clip(disc - min_coord, 0.0, 19.0).astype(jnp.int32)
    flat = vi[..., 0] * (Y * Z) + vi[..., 1] * Z + vi[..., 2]         # (B, N)

    out = jnp.zeros((B, C, V), jnp.float32)
    cnt = jnp.zeros((B, V), jnp.float32)
    for b in range(B):
        out = out.at[b, :, flat[b]].add(features[b].T)
        cnt = cnt.at[b, flat[b]].add(1.0)
    out = out / jnp.maximum(cnt, 1.0)[:, None, :]
    return out.reshape(B, C, X, Y, Z)


if __name__ == "__main__":
    key = jax.random.PRNGKey(0)
    k1, k2, k3 = jax.random.split(key, 3)

    B, C, N = 2, 4, 8
    divide = (20, 20, 20)

    search_area = jax.random.uniform(k1, (B, 3), minval=4.0, maxval=8.0)
    # points roughly inside the search area
    coords = (jax.random.uniform(k2, (B, N, 3), minval=-0.5, maxval=0.5)
              * search_area[:, None, :])
    features = jax.random.normal(k3, (B, C, N), dtype=jnp.float32)

    ref = voxelization_ref(features, coords, search_area, divide=divide)

    # Default path: bf16 one-hot / operands, f32 accumulation.
    out = voxelization_forward(features, coords, search_area, divide=divide, mode=True)
    out = jax.block_until_ready(out)
    assert out.shape == (B, C, *divide), out.shape
    assert jnp.allclose(out, ref, atol=2e-2, rtol=2e-2), "bf16 path mismatch vs reference"

    # Full-f32 operand path (exactness knob).
    out_f32 = voxelization_forward(features, coords, search_area, divide=divide,
                                   mode=True, use_bf16=False)
    out_f32 = jax.block_until_ready(out_f32)
    assert jnp.allclose(out_f32, ref, atol=1e-4, rtol=1e-4), "f32 path mismatch vs reference"

    print("KERNEL_OK")
</pallas_src>

<mosaic_0001>
module attributes {stable_mosaic.version = 11 : i64} {
  func.func @_voxelize_kernel(%arg0: i32, %arg1: i32, %arg2: i32, %arg3: memref<1x512x1xi32, #tpu.memory_space<vmem>>, %arg4: memref<1x4x512xf32, #tpu.memory_space<vmem>>, %arg5: memref<1x4x2048xf32, #tpu.memory_space<vmem>>, %arg6: memref<5x2048xf32, #tpu.memory_space<vmem>>, %arg7: memref<5x512xf32, #tpu.memory_space<vmem>>) attributes {dimension_semantics = [#tpu.dimension_semantics<parallel>, #tpu.dimension_semantics<parallel>, #tpu.dimension_semantics<arbitrary>], iteration_bounds = array<i64: 2, 4, 1>, scalar_prefetch = 0 : i64, scratch_operands = 2 : i64, tpu.core_type = #tpu.core_type<tc>, window_params = [{transform_indices = @transform_0, window_bounds = array<i64: 1, 512, 1>}, {transform_indices = @transform_1, window_bounds = array<i64: 1, 4, 512>}, {transform_indices = @transform_2, window_bounds = array<i64: 1, 4, 2048>}]} {
    %c0_i32 = arith.constant 0 : i32
    %0 = arith.cmpi eq, %arg2, %c0_i32 : i32
    %1 = arith.extui %0 : i1 to i32
    %c0_i32_0 = arith.constant 0 : i32
    %2 = arith.cmpi ne, %1, %c0_i32_0 : i32
    scf.if %2 {
      %cst_18 = arith.constant 0.000000e+00 : f32
      %28 = vector.broadcast %cst_18 : f32 to vector<5x2048xf32>
      %c0_19 = arith.constant 0 : index
      %c0_20 = arith.constant 0 : index
      %29 = vector.load %arg6[%c0_19, %c0_20] : memref<5x2048xf32, #tpu.memory_space<vmem>>, vector<5x2048xf32>
      tpu.vector_store %arg6[%c0_19, %c0_20], %28 {strides = array<i32>} : memref<5x2048xf32, #tpu.memory_space<vmem>>, vector<5x2048xf32>,
    } else {
    }
    %c0 = arith.constant 0 : index
    %c0_1 = arith.constant 0 : index
    %c0_2 = arith.constant 0 : index
    %3 = vector.load %arg4[%c0, %c0_1, %c0_2] : memref<1x4x512xf32, #tpu.memory_space<vmem>>, vector<1x4x512xf32>
    %4 = vector.shape_cast %3 : vector<1x4x512xf32> to vector<4x512xf32>
    %c0_3 = arith.constant 0 : index
    %c0_4 = arith.constant 0 : index
    %5 = vector.load %arg7[%c0_3, %c0_4] : memref<5x512xf32, #tpu.memory_space<vmem>>, vector<4x512xf32>
    tpu.vector_store %arg7[%c0_3, %c0_4], %4 {strides = array<i32>} : memref<5x512xf32, #tpu.memory_space<vmem>>, vector<4x512xf32>,
    %cst = arith.constant 1.000000e+00 : f32
    %6 = vector.broadcast %cst : f32 to vector<1x512xf32>
    %c4 = arith.constant 4 : index
    %c0_5 = arith.constant 0 : index
    %7 = vector.load %arg7[%c4, %c0_5] : memref<5x512xf32, #tpu.memory_space<vmem>>, vector<1x512xf32>
    tpu.vector_store %arg7[%c4, %c0_5], %6 {strides = array<i32>} : memref<5x512xf32, #tpu.memory_space<vmem>>, vector<1x512xf32>,
    %c0_6 = arith.constant 0 : index
    %c0_7 = arith.constant 0 : index
    %c0_8 = arith.constant 0 : index
    %8 = vector.load %arg3[%c0_6, %c0_7, %c0_8] : memref<1x512x1xi32, #tpu.memory_space<vmem>>, vector<1x512x1xi32>
    %9 = vector.shape_cast %8 : vector<1x512x1xi32> to vector<512x1xi32>
    %c2048_i32 = arith.constant 2048 : i32
    %10 = arith.muli %arg1, %c2048_i32 : i32
    %11 = vector.broadcast %10 : i32 to vector<512x1xi32>
    %12 = arith.subi %9, %11 : vector<512x1xi32>
    %13 = tpu.iota {dimensions = array<i32: 1>} : vector<512x2048xi32>
    %14 = vector.broadcast %12 : vector<512x1xi32> to vector<512x2048xi32>
    %15 = arith.cmpi eq, %14, %13 : vector<512x2048xi32>
    %16 = arith.extui %15 : vector<512x2048xi1> to vector<512x2048xi32>
    %17 = arith.sitofp %16 : vector<512x2048xi32> to vector<512x2048xf32>
    %18 = arith.truncf %17 : vector<512x2048xf32> to vector<512x2048xbf16>
    %c0_9 = arith.constant 0 : index
    %c0_10 = arith.constant 0 : index
    %19 = vector.load %arg6[%c0_9, %c0_10] : memref<5x2048xf32, #tpu.memory_space<vmem>>, vector<5x2048xf32>
    %c0_11 = arith.constant 0 : index
    %c0_12 = arith.constant 0 : index
    %20 = vector.load %arg7[%c0_11, %c0_12] : memref<5x512xf32, #tpu.memory_space<vmem>>, vector<5x512xf32>
    %21 = arith.truncf %20 : vector<5x512xf32> to vector<5x512xbf16>
    %cst_13 = arith.constant dense<0.000000e+00> : vector<5x2048xf32>
    %22 = tpu.matmul %21, %18, %cst_13 {dimension_numbers = #tpu.dot_dimension_numbers<[1], [0], [0], [1], [0, 0, 1, 1], [], []>} : vector<5x512xbf16>, vector<512x2048xbf16>, vector<5x2048xf32> -> vector<5x2048xf32>
    %23 = arith.addf %19, %22 : vector<5x2048xf32>
    %c0_14 = arith.constant 0 : index
    %c0_15 = arith.constant 0 : index
    %24 = vector.load %arg6[%c0_14, %c0_15] : memref<5x2048xf32, #tpu.memory_space<vmem>>, vector<5x2048xf32>
    tpu.vector_store %arg6[%c0_14, %c0_15], %23 {strides = array<i32>} : memref<5x2048xf32, #tpu.memory_space<vmem>>, vector<5x2048xf32>,
    %c0_i32_16 = arith.constant 0 : i32
    %25 = arith.cmpi eq, %arg2, %c0_i32_16 : i32
    %26 = arith.extui %25 : i1 to i32
    %c0_i32_17 = arith.constant 0 : i32
    %27 = arith.cmpi ne, %26, %c0_i32_17 : i32
    scf.if %27 {
      %c4_18 = arith.constant 4 : index
      %c0_19 = arith.constant 0 : index
      %28 = vector.load %arg6[%c4_18, %c0_19] : memref<5x2048xf32, #tpu.memory_space<vmem>>, vector<1x2048xf32>
      %cst_20 = arith.constant 1.000000e+00 : f32
      %29 = vector.broadcast %cst_20 : f32 to vector<1x2048xf32>
      %30 = arith.maximumf %28, %29 : vector<1x2048xf32>
      %31 = tpu.reciprocal %30 : vector<1x2048xf32> -> vector<1x2048xf32>
      %c0_21 = arith.constant 0 : index
      %c0_22 = arith.constant 0 : index
      %32 = vector.load %arg6[%c0_21, %c0_22] : memref<5x2048xf32, #tpu.memory_space<vmem>>, vector<4x2048xf32>
      %33 = vector.broadcast %31 : vector<1x2048xf32> to vector<4x2048xf32>
      %34 = arith.mulf %32, %33 : vector<4x2048xf32>
      %c0_23 = arith.constant 0 : index
      %c0_24 = arith.constant 0 : index
      %c0_25 = arith.constant 0 : index
      %35 = vector.load %arg5[%c0_23, %c0_24, %c0_25] : memref<1x4x2048xf32, #tpu.memory_space<vmem>>, vector<1x4x2048xf32>
      %36 = vector.shape_cast %35 : vector<1x4x2048xf32> to vector<4x2048xf32>
      %37 = vector.shape_cast %34 : vector<4x2048xf32> to vector<1x4x2048xf32>
      tpu.vector_store %arg5[%c0_23, %c0_24, %c0_25], %37 {strides = array<i32>} : memref<1x4x2048xf32, #tpu.memory_space<vmem>>, vector<1x4x2048xf32>,
    } else {
    }
    return
  }
  func.func @transform_0(%arg0: i32, %arg1: i32, %arg2: i32) -> (i32, i32, i32) {
    %c0_i32 = arith.constant 0 : i32
    %c0_i32_0 = arith.constant 0 : i32
    return %arg0, %arg2, %c0_i32 : i32, i32, i32
  }
  func.func @transform_1(%arg0: i32, %arg1: i32, %arg2: i32) -> (i32, i32, i32) {
    %c0_i32 = arith.constant 0 : i32
    %c0_i32_0 = arith.constant 0 : i32
    return %arg0, %c0_i32, %arg2 : i32, i32, i32
  }
  func.func @transform_2(%arg0: i32, %arg1: i32, %arg2: i32) -> (i32, i32, i32) {
    %c0_i32 = arith.constant 0 : i32
    %c0_i32_0 = arith.constant 0 : i32
    return %arg0, %c0_i32, %arg1 : i32, i32, i32
  }
}

</mosaic_0001>

<bundles_post_ra>
// kernel: tpu_custom_call.1
= control target key start
LH: loop header
LB: loop body
LE: loop exit
PB: predicated region body
PF: predicated region fallthrough
CT: control target
= control target key end

     0   :  { %7 = vsyncpa [#allocation5], 0  ;;  %s12232_s0 = inlined_call_operand.vmem [shape: s32[2,512,1], index: 0, kind: input, shape index: {}]   ;;  %s12233_s1 = inlined_call_operand.vmem [shape: f32[2,4,512], index: 1, kind: input, shape index: {}]   ;;  %s12234_s2 = inlined_call_operand.hbm [shape: f32[2,4,8192], index: 2, kind: output, shape index: {}]  }
   0x1   :  { %9 = vsyncpa [#allocation5 + $0x1], 0  ;;  %s7612_s9 = smov 0   ;;  %s7614_s10 = smov 0  }
   0x2   :  { %s7616_s11 = smov 0   ;;  %s7618_s12 = smov 0  }
   0x3   :  { %s7620_s13 = smov 0   ;;  %s7622_s14 = smov 0  }
   0x4   :  { %s7624_s15 = smov 0   ;;  %s7626_s16 = smov 0  }
   0x5 LB: > { %s5348_s17 = sadd.s32 4294967295, %s7591_s16   ;;  %s5349_s18 = sadd.s32 4294967294, %s7591_s16   ;;  %s7591_s16 = sphi %s7626_s16, %s15_s16   ;;  %s7587_s15 = sphi %s7624_s15, %s12927_s15   ;;  %s7583_s14 = sphi %s7622_s14, %s12926_s14   ;;  %s7579_s13 = sphi %s7620_s13, %s12925_s13   ;;  %s7575_s12 = sphi %s7618_s12, %s12924_s12   ;;  %s7571_s11 = sphi %s7616_s11, %s12923_s11   ;;  %s7567_s10 = sphi %s7614_s10, %s12922_s10   ;;  %s7563_s9 = sphi %s7612_s9, %s12921_s9  }
   0x6   : > { %s30_s19 = sadd.s32 1, %s7583_s14  ;;  %s34_s20 = sadd.s32 1, %s7587_s15 }
   0x7   : > { %p32_p0 = scmp.ge.s32.totalorder %s30_s19, 4  ;;  %p109_p1 = scmp.ne.s32.totalorder %s7571_s11, %s7567_s10 }
   0x8   : > { %p110_p2 = scmp.eq.s32.totalorder %s5348_s17, 7  ;;  %p115_p5 = scmp.ne.s32.totalorder %s7567_s10, %s7563_s9 }
   0x9   : > { %s12929_s19 = smov (%p32_p0, %s30_s19), 0  ;;  %s12931_s20 = smov (!%p32_p0, %s34_s20), %s7587_s15 }
   0xa   : > { %s95_s21 = ssub.s32 %s7583_s14, %s12929_s19  ;;  %p7663_p3 = por %p110_p2, %p109_p1 }
   0xb   : > { %p36_p4 = scmp.ge.s32.totalorder %s12931_s20, 2  ;;  %p116_p6 = scmp.eq.s32.totalorder %s5349_s18, 7 }
   0xc   : > { %p5352_p7 = scmp.ge.s32.totalorder %s7591_s16, 1  ;;  %p160_p9 = scmp.lt.s32.totalorder %s7591_s16, 9 }
   0xd   : > { %s12933_s20 = smov (%p36_p4, %s12931_s20), 0  ;;  %p7672_p8 = por %p116_p6, %p115_p5 }
   0xe   : > { %s94_s24 = ssub.s32 %s7587_s15, %s12933_s20  ;;  %s99_s25 = sadd.s32 1, %s7571_s11 }
   0xf   : > { %s96_s26 = sor.u32 %s95_s21, %s94_s24  ;;  %p161_p10 = pnand %p5352_p7, %p160_p9 }
  0x10   : > { %p97_p11 = scmp.eq.s32.totalorder %s96_s26, 0 }
  0x11   : > { %164 = sbr.rel (%p161_p10) target bundleno = 992 (0x3e0), region = 28 }
  0x12   : > { %s7681_s27 = scalar_select %p97_p11, %s7571_s11, %s99_s25  }
  0x16   : > { %p196_p12 = scmp.lt.s32.totalorder %s7579_s13, 1  ;;  %v7593_v0 = vmov 0   ;;  %s5358_s28 = sshll.u32 %s7575_s12, 11 }
  0x17   : > { %7492 = vset.pattern.permute.xlu2 %v7593_v0  ;;  %7491 = vset.pattern.permute.xlu1 %v7593_v0  ;;  %v7689_v1 = vstv %s5358_s28  ;;  %s192_s18 = sand.u32 1, %s7567_s10   ;;  %s7408_s25 = sshll.u32 %s7575_s12, 4 }
  0x18   : > { %7490 = vset.pattern.permute.xlu0 %v7593_v0  ;;  %s7686_s29 = scalar_select %p196_p12, %s7579_s13, 1 }
  0x19   : > { %s12165_s21 = sshll.u32 %s192_s18, 6  ;;  %s7409_s26 = sshll.u32 %s7579_s13, 6 }
  0x1a   : > { %s7413_s30 = sshll.u32 %s7686_s29, 9  ;;  %s7414_s6 = sshll.u32 %s7686_s29, 4 }
  0x1b   : > { %s7694_s5 = scalar_lea.vmem %s12232_s0, %s7413_s30  ;;  %s213_s17 = scalar_lea.vmem %s12233_s1, %s7414_s6 }
  0x1c   : > { %v324_v2 = vld [vmem:[%s7694_s5 + $0x1f0] sm:$0xff]  ;;  %v325_v8 = vld [vmem:[%s7694_s5 + $0x1f8] sm:$0xff]  ;;  %v306_v16 = vld [vmem:[%s7694_s5 + $0x160] sm:$0xff]  ;;  %s12172_s24 = scalar_lea.vmem [#allocation4], %s12165_s21  ;;  %s5241_s28 = sadd.s32 %s7409_s26, %s7408_s25 }
  0x1d   : > { %v308_v3 = vld [vmem:[%s7694_s5 + $0x170] sm:$0xff]  ;;  %v390_v5 = vsub.s32 %v324_v2, %v7689_v1  ;;  %v309_v9 = vld [vmem:[%s7694_s5 + $0x178] sm:$0xff]  ;;  %v391_v11 = vsub.s32 %v325_v8, %v7689_v1  ;;  %v372_v19 = vsub.s32 %v306_v16, %v7689_v1  ;;  %v322_v20 = vld [vmem:[%s7694_s5 + $0x1e0] sm:$0xff]  ;;  %s7410_s29 = sshll.u32 %s5241_s28, 2  ;;  %s5245_s3 = sshll.u32 %s12172_s24, 4  ;;  %s5246_s3 = int_to_ptr.vmem [resolvable:$true] %s5245_s3 }
  0x1e   : > { %v276_v4 = vld [vmem:[%s7694_s5 + $0x70] sm:$0xff]  ;;  %v374_v6 = vsub.s32 %v308_v3, %v7689_v1  ;;  %v277_v10 = vld [vmem:[%s7694_s5 + $0x78] sm:$0xff]  ;;  %v375_v12 = vsub.s32 %v309_v9, %v7689_v1  ;;  %v307_v21 = vld [vmem:[%s7694_s5 + $0x168] sm:$0xff]  ;;  %v388_v23 = vsub.s32 %v322_v20, %v7689_v1  ;;  %s5243_s30 = scalar_lea.hbm %s12234_s2, %s7410_s29  ;;  %s7517_s21 = scalar_lea.hbm %s12234_s2, 512 }
  0x1f   : > { %v342_v7 = vsub.s32 %v276_v4, %v7689_v1  ;;  %596 = vperm.xlu1 %7491, %v390_v5   ;;  %v343_v13 = vsub.s32 %v277_v10, %v7689_v1  ;;  %v293_v14 = vld [vmem:[%s7694_s5 + $0xf8] sm:$0xff]  ;;  %v292_v15 = vld [vmem:[%s7694_s5 + $0xf0] sm:$0xff]  ;;  %v323_v22 = vld [vmem:[%s7694_s5 + $0x1e8] sm:$0xff]  ;;  %v373_v24 = vsub.s32 %v307_v21, %v7689_v1  ;;  %s5247_s4 = sshll.u32 %s5243_s30, 4  ;;  %s5248_s4 = int_to_ptr.hbm [resolvable:$true] %s5247_s4 }
  0x20   : > { %548 = vperm.xlu0 %7490, %v374_v6   ;;  %v359_v17 = vsub.s32 %v293_v14, %v7689_v1  ;;  %v358_v18 = vsub.s32 %v292_v15, %v7689_v1  ;;  %v389_v25 = vsub.s32 %v323_v22, %v7689_v1  ;;  %v275_v26 = vld [vmem:[%s7694_s5 + $0x68] sm:$0xff]  ;;  %v274_v27 = vld [vmem:[%s7694_s5 + $0x60] sm:$0xff]  ;;  %v304_v32 = vld [vmem:[%s7694_s5 + $0x150] sm:$0xff]  ;;  %s7511_s6 = sshra.s32 %s5248_s4, 4  ;;  %s7512_s6 = int_to_ptr.hbm [resolvable:$true] %s7511_s6 }
  0x21   : > { %452 = vperm.xlu2 %7492, %v342_v7   ;;  %v290_v28 = vld [vmem:[%s7694_s5 + $0xe0] sm:$0xff]  ;;  %v341_v29 = vsub.s32 %v275_v26, %v7689_v1  ;;  %v340_v30 = vsub.s32 %v274_v27, %v7689_v1  ;;  %v291_v33 = vld [vmem:[%s7694_s5 + $0xe8] sm:$0xff]  ;;  %v305_v34 = vld [vmem:[%s7694_s5 + $0x158] sm:$0xff]  ;;  %v370_v35 = vsub.s32 %v304_v32, %v7689_v1  ;;  %v12249_v27 = vmov 1.0|1.0   ;;  %s7513_s7 = scalar_lea.hbm %s7512_s6, 64  ;;  %p7518_p2 = scmp.lt.s32.totalorder %s7512_s6, %s12234_s2 }
  0x22   : > { %v356_v31 = vsub.s32 %v290_v28, %v7689_v1  ;;  %v357_v36 = vsub.s32 %v291_v33, %v7689_v1  ;;  %v371_v37 = vsub.s32 %v305_v34, %v7689_v1  ;;  %v321_v38 = vld [vmem:[%s7694_s5 + $0x1d8] sm:$0xff]  ;;  %v320_v39 = vld [vmem:[%s7694_s5 + $0x1d0] sm:$0xff]  ;;  %v303_v50 = vld [vmem:[%s7694_s5 + $0x148] sm:$0xff]  ;;  %p7514_p13 = scmp.ne.s32.totalorder %s7512_s6, %s7513_s7  ;;  %p7519_p4 = scmp.lt.s32.totalorder %s7517_s21, %s7513_s7 }
  0x23   : > { %v272_v40 = vld [vmem:[%s7694_s5 + $0x50] sm:$0xff]  ;;  %v387_v41 = vsub.s32 %v321_v38, %v7689_v1  ;;  %v386_v42 = vsub.s32 %v320_v39, %v7689_v1  ;;  %v273_v45 = vld [vmem:[%s7694_s5 + $0x58] sm:$0xff]  ;;  %v302_v51 = vld [vmem:[%s7694_s5 + $0x140] sm:$0xff]  ;;  %v369_v53 = vsub.s32 %v303_v50, %v7689_v1 }
  0x24   : > { %v338_v43 = vsub.s32 %v272_v40, %v7689_v1  ;;  %v288_v44 = vld [vmem:[%s7694_s5 + $0xd0] sm:$0xff]  ;;  %v289_v46 = vld [vmem:[%s7694_s5 + $0xd8] sm:$0xff]  ;;  %v339_v48 = vsub.s32 %v273_v45, %v7689_v1  ;;  %v318_v52 = vld [vmem:[%s7694_s5 + $0x1c0] sm:$0xff]  ;;  %v368_v54 = vsub.s32 %v302_v51, %v7689_v1  ;;  %p7515_p0 = pnand %p7514_p13, %p7663_p3  ;;  %p7520_p5 = por %p7519_p4, %p7518_p2 }
  0x25   : > { %v354_v47 = vsub.s32 %v288_v44, %v7689_v1  ;;  %v355_v49 = vsub.s32 %v289_v46, %v7689_v1  ;;  %v384_v55 = vsub.s32 %v318_v52, %v7689_v1  ;;  %v319_v56 = vld [vmem:[%s7694_s5 + $0x1c8] sm:$0xff]  ;;  %v270_v57 = vld [vmem:[%s7694_s5 + $0x40] sm:$0xff]  ;;  %v300_v0 = vld [vmem:[%s7694_s5 + $0x130] sm:$0xff] }
  0x26   : > { %v271_v58 = vld [vmem:[%s7694_s5 + $0x48] sm:$0xff]  ;;  %v385_v59 = vsub.s32 %v319_v56, %v7689_v1  ;;  %v336_v60 = vsub.s32 %v270_v57, %v7689_v1  ;;  %v286_v62 = vld [vmem:[%s7694_s5 + $0xc0] sm:$0xff]  ;;  %v366_v4 = vsub.s32 %v300_v0, %v7689_v1  ;;  %v301_v5 = vld [vmem:[%s7694_s5 + $0x138] sm:$0xff]  ;;  %p7516_p1 = pneg %p7515_p0 }
  0x27   : > { %599 = vperm.xlu1 %7491, %v391_v11   ;;  %v337_v61 = vsub.s32 %v271_v58, %v7689_v1  ;;  %v287_v63 = vld [vmem:[%s7694_s5 + $0xc8] sm:$0xff]  ;;  %v352_v2 = vsub.s32 %v286_v62, %v7689_v1  ;;  %v316_v6 = vld [vmem:[%s7694_s5 + $0x1b0] sm:$0xff]  ;;  %v317_v7 = vld [vmem:[%s7694_s5 + $0x1b8] sm:$0xff]  ;;  %v367_v8 = vsub.s32 %v301_v5, %v7689_v1 }
  0x28   : > { %551 = vperm.xlu0 %7490, %v375_v12   ;;  %v353_v3 = vsub.s32 %v287_v63, %v7689_v1  ;;  %v382_v9 = vsub.s32 %v316_v6, %v7689_v1  ;;  %v383_v10 = vsub.s32 %v317_v7, %v7689_v1  ;;  %v269_v11 = vld [vmem:[%s7694_s5 + $0x38] sm:$0xff]  ;;  %v268_v12 = vld [vmem:[%s7694_s5 + $0x30] sm:$0xff]  ;;  %v298_v20 = vld [vmem:[%s7694_s5 + $0x120] sm:$0xff]  ;;  %p7521_p6 = pnand %p7520_p5, %p7516_p1 }
  0x29   : > { %455 = vperm.xlu2 %7492, %v343_v13   ;;  %v284_v13 = vld [vmem:[%s7694_s5 + $0xb0] sm:$0xff]  ;;  %v335_v15 = vsub.s32 %v269_v11, %v7689_v1  ;;  %v334_v16 = vsub.s32 %v268_v12, %v7689_v1  ;;  %v285_v21 = vld [vmem:[%s7694_s5 + $0xb8] sm:$0xff]  ;;  %v299_v22 = vld [vmem:[%s7694_s5 + $0x128] sm:$0xff] }
  0x2a   : > { %v365_v26 = vsub.s32 %v299_v22, %v7689_v1  ;;  %v315_v28 = vld [vmem:[%s7694_s5 + $0x1a8] sm:$0xff]  ;;  %v297_v44 = vld [vmem:[%s7694_s5 + $0x118] sm:$0xff]  ;;  %v296_v45 = vld [vmem:[%s7694_s5 + $0x110] sm:$0xff] }
  0x2b   : > { %v381_v32 = vsub.s32 %v315_v28, %v7689_v1  ;;  %v283_v39 = vld [vmem:[%s7694_s5 + $0xa8] sm:$0xff]  ;;  %v363_v50 = vsub.s32 %v297_v44, %v7689_v1  ;;  %v362_v51 = vsub.s32 %v296_v45, %v7689_v1  ;;  %v265_v57 = vld [vmem:[%s7694_s5 + $0x18] sm:$0xff]  ;;  %v280_v62 = vld [vmem:[%s7694_s5 + $0x90] sm:$0xff] }
  0x2c   : > { %v281_v63 = vld [vmem:[%s7694_s5 + $0x98] sm:$0xff]  ;;  %v346_v5 = vsub.s32 %v280_v62, %v7689_v1  ;;  %v311_v12 = vld [vmem:[%s7694_s5 + $0x188] sm:$0xff] }
  0x2d   : > { %v347_v6 = vsub.s32 %v281_v63, %v7689_v1 }
  0x2f   : > { %503 = vperm.xlu1 %7491, %v359_v17   ;;  %v255_v17 = vlaneseq }
  0x30   : > { %500 = vperm.xlu0 %7490, %v358_v18   ;;  %v350_v18 = vsub.s32 %v284_v13, %v7689_v1 }
  0x31   : > { %542 = vperm.xlu2 %7492, %v372_v19   ;;  %v7777_v19 = vand.u32 127, %v255_v17 }
  0x37   : > { %590 = vperm.xlu1 %7491, %v388_v23  }
  0x38   : > { %545 = vperm.xlu0 %7490, %v373_v24   ;;  %v364_v24 = vsub.s32 %v298_v20, %v7689_v1  ;;  %v263_v20 = vld [vmem:[%s7694_s5 + $0x8] sm:$0xff] }
  0x39   : > { %593 = vperm.xlu2 %7492, %v389_v25   ;;  %v351_v25 = vsub.s32 %v285_v21, %v7689_v1  ;;  %v262_v21 = vld [vmem:[%s7694_s5] sm:$0xff]  ;;  %v329_v28 = vsub.s32 %v263_v20, %v7689_v1 }
  0x3f   : > { %449 = vperm.xlu1 %7491, %v341_v29   ;;  %v314_v29 = vld [vmem:[%s7694_s5 + $0x1a0] sm:$0xff] }
  0x40   : > { %446 = vperm.xlu0 %7490, %v340_v30   ;;  %v266_v30 = vld [vmem:[%s7694_s5 + $0x20] sm:$0xff]  ;;  %v380_v33 = vsub.s32 %v314_v29, %v7689_v1  ;;  %v328_v29 = vsub.s32 %v262_v21, %v7689_v1  ;;  %v237_v21 = vld [vmem:[%s213_s17 + $0x8] sm:$0xff] }
  0x41   : > { %494 = vperm.xlu2 %7492, %v356_v31   ;;  %v332_v34 = vsub.s32 %v266_v30, %v7689_v1  ;;  %242 = vst [vmem:[#allocation1 + $0x10] ss:$2 sm:$0xff] %v237_v21  ;;  %v7595_v21 = vmov 1.0  }
  0x47   : > { %536 = vperm.xlu1 %7491, %v370_v35   ;;  %v282_v35 = vld [vmem:[%s7694_s5 + $0xa0] sm:$0xff] }
  0x48   : > { %497 = vperm.xlu0 %7490, %v357_v36   ;;  %v267_v36 = vld [vmem:[%s7694_s5 + $0x28] sm:$0xff] }
  0x49   : > { %539 = vperm.xlu2 %7492, %v371_v37  }
  0x4f   : > { %587 = vperm.xlu1 %7491, %v387_v41   ;;  %v348_v41 = vsub.s32 %v282_v35, %v7689_v1 }
  0x50   : > { %584 = vperm.xlu0 %7490, %v386_v42   ;;  %v333_v42 = vsub.s32 %v267_v36, %v7689_v1 }
  0x51   : > { %440 = vperm.xlu2 %7492, %v338_v43   ;;  %v349_v43 = vsub.s32 %v283_v39, %v7689_v1 }
  0x57   : > { %488 = vperm.xlu1 %7491, %v354_v47  }
  0x58   : > { %443 = vperm.xlu0 %7490, %v339_v48   ;;  %v312_v48 = vld [vmem:[%s7694_s5 + $0x190] sm:$0xff] }
  0x59   : > { %491 = vperm.xlu2 %7492, %v355_v49   ;;  %v378_v52 = vsub.s32 %v312_v48, %v7689_v1 }
  0x5f   : > { %533 = vperm.xlu1 %7491, %v369_v53   ;;  %v313_v53 = vld [vmem:[%s7694_s5 + $0x198] sm:$0xff] }
  0x60   : > { %530 = vperm.xlu0 %7490, %v368_v54   ;;  %v264_v54 = vld [vmem:[%s7694_s5 + $0x10] sm:$0xff] }
  0x61   : > { %578 = vperm.xlu2 %7492, %v384_v55  }
  0x67   : > { %434 = vperm.xlu1 %7491, %v336_v60   ;;  %v330_v60 = vsub.s32 %v264_v54, %v7689_v1 }
  0x68   : > { %581 = vperm.xlu0 %7490, %v385_v59   ;;  %v379_v59 = vsub.s32 %v313_v53, %v7689_v1 }
  0x69   : > { %437 = vperm.xlu2 %7492, %v337_v61   ;;  %v331_v61 = vsub.s32 %v265_v57, %v7689_v1 }
  0x6f   : > { %485 = vperm.xlu1 %7491, %v353_v3   ;;  %v294_v3 = vld [vmem:[%s7694_s5 + $0x100] sm:$0xff] }
  0x70   : > { %482 = vperm.xlu0 %7490, %v352_v2   ;;  %v360_v7 = vsub.s32 %v294_v3, %v7689_v1 }
  0x71   : > { %524 = vperm.xlu2 %7492, %v366_v4  }
  0x77   : > { %572 = vperm.xlu1 %7491, %v382_v9   ;;  %v310_v9 = vld [vmem:[%s7694_s5 + $0x180] sm:$0xff] }
  0x78   : > { %527 = vperm.xlu0 %7490, %v367_v8   ;;  %v295_v8 = vld [vmem:[%s7694_s5 + $0x108] sm:$0xff] }
  0x79   : > { %575 = vperm.xlu2 %7492, %v383_v10  }
  0x7b   : > { %v7771_v14 = vpop.permute.xlu2 %452 }
  0x7c   : > { %12393 = vst [vmem:[#allocation7_spill] sm:$0xff] %v7771_v14  ;;  %vm825_vm0 = vcmp.eq.s32.totalorder %v7771_v14, %v7777_v19 }
  0x7f   : > { %431 = vperm.xlu1 %7491, %v335_v15   ;;  %v361_v15 = vsub.s32 %v295_v8, %v7689_v1 }
  0x80   : > { %428 = vperm.xlu0 %7490, %v334_v16   ;;  %v376_v16 = vsub.s32 %v310_v9, %v7689_v1 }
  0x81   : > { %476 = vperm.xlu2 %7492, %v350_v18   ;;  %v377_v18 = vsub.s32 %v311_v12, %v7689_v1 }
  0x83   : > { %v7784_v23 = vpop.permute.xlu2 %455 }
  0x84   : > { %12394 = vst [vmem:[#allocation8_spill] sm:$0xff] %v7784_v23  ;;  %vm841_vm1 = vcmp.eq.s32.totalorder %v7784_v23, %v7777_v19 }
  0x85   : > { %vm6383_vm2 = vmpackc.low %vm841_vm1, %vm825_vm0 }
  0x86   : > { %6384 = vmatpush.bf16.msk.msra.mxu0 %vm6383_vm2, %v12249_v27 }
  0x87   : > { %518 = vperm.xlu1 %7491, %v364_v24  }
  0x88   : > { %479 = vperm.xlu0 %7490, %v351_v25   ;;  %v278_v25 = vld [vmem:[%s7694_s5 + $0x80] sm:$0xff] }
  0x89   : > { %521 = vperm.xlu2 %7492, %v365_v26   ;;  %v344_v30 = vsub.s32 %v278_v25, %v7689_v1 }
  0x8b   : > { %v7795_v31 = vpop.permute.xlu2 %542 }
  0x8c   : > { %12395 = vst [vmem:[#allocation9_spill] sm:$0xff] %v7795_v31  ;;  %vm1305_vm12 = vcmp.eq.s32.totalorder %v7795_v31, %v7777_v19 }
  0x8f   : > { %569 = vperm.xlu1 %7491, %v381_v32   ;;  %v279_v32 = vld [vmem:[%s7694_s5 + $0x88] sm:$0xff]  ;;  %s5230_s5 = scalar_lea.sflag [#allocation5], %s192_s18 }
  0x90   : > { %566 = vperm.xlu0 %7490, %v380_v33   ;;  %v345_v35 = vsub.s32 %v279_v32, %v7689_v1  ;;  %v246_v32 = vld.sshfl [vmem:[#allocation1 + $0x18] sm:$0xff pattern:$0x75316420] }
  0x91   : > { %422 = vperm.xlu2 %7492, %v332_v34   ;;  %v7802_v37 = vpop.permute.xlu1 %596  ;;  %254 = vst [vmem:[#allocation3 + $0x18] sm:$0xf] %v246_v32 }
  0x92   : > { %12396 = vst [vmem:[#allocation10_spill] sm:$0xff] %v7802_v37  ;;  %v7804_v38 = vpop.permute.xlu0 %548  ;;  %vm1593_vm3 = vcmp.eq.s32.totalorder %v7802_v37, %v7777_v19 }
  0x93   : > { %12397 = vst [vmem:[#allocation11_spill] sm:$0xff] %v7804_v38  ;;  %v7807_v40 = vpop.permute.xlu2 %593  ;;  %vm1337_vm4 = vcmp.eq.s32.totalorder %v7804_v38, %v7777_v19 }
  0x94   : > { %12398 = vst [vmem:[#allocation12_spill] sm:$0xff] %v7807_v40  ;;  %vm1577_vm0 = vcmp.eq.s32.totalorder %v7807_v40, %v7777_v19 }
  0x97   : > { %470 = vperm.xlu1 %7491, %v348_v41  }
  0x98   : > { %425 = vperm.xlu0 %7490, %v333_v42  }
  0x99   : > { %473 = vperm.xlu2 %7492, %v349_v43   ;;  %v7814_v46 = vpop.permute.xlu1 %599 }
  0x9a   : > { %12399 = vst [vmem:[#allocation13_spill] sm:$0xff] %v7814_v46  ;;  %v7816_v47 = vpop.permute.xlu0 %551  ;;  %vm1609_vm6 = vcmp.eq.s32.totalorder %v7814_v46, %v7777_v19 }
  0x9b   : > { %12400 = vst [vmem:[#allocation14_spill] sm:$0xff] %v7816_v47  ;;  %v7821_v49 = vpop.permute.xlu2 %494  ;;  %vm1353_vm5 = vcmp.eq.s32.totalorder %v7816_v47, %v7777_v19  ;;  %vm6431_vm8 = vmpackc.low %vm1609_vm6, %vm1593_vm3 }
  0x9c   : > { %vm6415_vm7 = vmpackc.low %vm1353_vm5, %vm1337_vm4  ;;  %6432 = vmatpush.bf16.msk.msra.mxu3 %vm6431_vm8, %v12249_v27  ;;  %vm1049_vm5 = vcmp.eq.s32.totalorder %v7821_v49, %v7777_v19 }
  0x9d   : > { %6416 = vmatpush.bf16.msk.msra.mxu2 %vm6415_vm7, %v12249_v27 }
  0x9f   : > { %515 = vperm.xlu1 %7491, %v363_v50  }
  0xa0   : > { %512 = vperm.xlu0 %7490, %v362_v51  }
  0xa1   : > { %560 = vperm.xlu2 %7492, %v378_v52   ;;  %v7836_v55 = vpop.permute.xlu1 %503 }
  0xa2   : > { %v7838_v56 = vpop.permute.xlu0 %500  ;;  %vm1097_vm10 = vcmp.eq.s32.totalorder %v7836_v55, %v7777_v19 }
  0xa3   : > { %v7841_v58 = vpop.permute.xlu2 %539  ;;  %vm1081_vm9 = vcmp.eq.s32.totalorder %v7838_v56, %v7777_v19 }
  0xa4   : > { %12401 = vst [vmem:[#allocation15_spill] sm:$0xff] %v7841_v58  ;;  %vm6399_vm11 = vmpackc.low %vm1097_vm10, %vm1081_vm9  ;;  %vm1289_vm9 = vcmp.eq.s32.totalorder %v7841_v58, %v7777_v19 }
  0xa5   : > { %6400 = vmatpush.bf16.msk.msra.mxu1 %vm6399_vm11, %v12249_v27 }
  0xa7   : > { %416 = vperm.xlu1 %7491, %v330_v60  }
  0xa8   : > { %563 = vperm.xlu0 %7490, %v379_v59  }
  0xa9   : > { %419 = vperm.xlu2 %7492, %v331_v61   ;;  %v7853_v0 = vpop.permute.xlu1 %590 }
  0xaa   : > { %12402 = vst [vmem:[#allocation16_spill] sm:$0xff] %v7853_v0  ;;  %v7855_v2 = vpop.permute.xlu0 %545  ;;  %vm1561_vm14 = vcmp.eq.s32.totalorder %v7853_v0, %v7777_v19 }
  0xab   : > { %12403 = vst [vmem:[#allocation17_spill] sm:$0xff] %v7855_v2  ;;  %v7858_v4 = vpop.permute.xlu2 %440  ;;  %vm1321_vm13 = vcmp.eq.s32.totalorder %v7855_v2, %v7777_v19  ;;  %vm6433_vm1 = vmpackc.low %vm1577_vm0, %vm1561_vm14 }
  0xac   : > { %vm6417_vm15 = vmpackc.low %vm1321_vm13, %vm1305_vm12  ;;  %6434 = vmatpush.bf16.msk.msra.mxu3 %vm6433_vm1, %v12249_v27  ;;  %vm761_vm14 = vcmp.eq.s32.totalorder %v7858_v4, %v7777_v19 }
  0xad   : > { %6418 = vmatpush.bf16.msk.msra.mxu2 %vm6417_vm15, %v12249_v27 }
  0xaf   : > { %467 = vperm.xlu1 %7491, %v347_v6  }
  0xb0   : > { %464 = vperm.xlu0 %7490, %v346_v5  }
  0xb1   : > { %506 = vperm.xlu2 %7492, %v360_v7   ;;  %v7875_v10 = vpop.permute.xlu1 %449 }
  0xb2   : > { %12404 = vst [vmem:[#allocation18_spill] sm:$0xff] %v7875_v10  ;;  %v7877_v11 = vpop.permute.xlu0 %446  ;;  %vm809_vm3 = vcmp.eq.s32.totalorder %v7875_v10, %v7777_v19 }
  0xb3   : > { %12405 = vst [vmem:[#allocation19_spill] sm:$0xff] %v7877_v11  ;;  %v7880_v13 = vpop.permute.xlu2 %491  ;;  %vm793_vm2 = vcmp.eq.s32.totalorder %v7877_v11, %v7777_v19 }
  0xb4   : > { %12406 = vst [vmem:[#allocation20_spill] sm:$0xff] %v7880_v13  ;;  %vm6385_vm4 = vmpackc.low %vm809_vm3, %vm793_vm2  ;;  %vm1033_vm2 = vcmp.eq.s32.totalorder %v7880_v13, %v7777_v19 }
  0xb5   : > { %6386 = vmatpush.bf16.msk.msra.mxu0 %vm6385_vm4, %v12249_v27 }
  0xb7   : > { %554 = vperm.xlu1 %7491, %v376_v16  }
  0xb8   : > { %509 = vperm.xlu0 %7490, %v361_v15  }
  0xb9   : > { %557 = vperm.xlu2 %7492, %v377_v18   ;;  %v7892_v22 = vpop.permute.xlu1 %536 }
  0xba   : > { %12407 = vst [vmem:[#allocation21_spill] sm:$0xff] %v7892_v22  ;;  %v7894_v24 = vpop.permute.xlu0 %497  ;;  %vm1273_vm7 = vcmp.eq.s32.totalorder %v7892_v22, %v7777_v19 }
  0xbb   : > { %v7897_v26 = vpop.permute.xlu2 %578  ;;  %vm1065_vm6 = vcmp.eq.s32.totalorder %v7894_v24, %v7777_v19  ;;  %vm6419_vm10 = vmpackc.low %vm1289_vm9, %vm1273_vm7 }
  0xbc   : > { %vm6401_vm8 = vmpackc.low %vm1065_vm6, %vm1049_vm5  ;;  %6420 = vmatpush.bf16.msk.msra.mxu2 %vm6419_vm10, %v12249_v27 }
  0xbd   : > { %6402 = vmatpush.bf16.msk.msra.mxu1 %vm6401_vm8, %v12249_v27 }
  0xbf   : > { %413 = vperm.xlu1 %7491, %v329_v28  }
  0xc0   : > { %410 = vperm.xlu0 %7490, %v328_v29  }
  0xc1   : > { %458 = vperm.xlu2 %7492, %v344_v30   ;;  %v7913_v33 = vpop.permute.xlu1 %587  ;;  %v245_v30 = vld.sshfl [vmem:[#allocation1 + $0x10] sm:$0xff pattern:$0x75316420] }
  0xc2   : > { %12408 = vst [vmem:[#allocation22_spill] sm:$0xff] %v7913_v33  ;;  %v7915_v34 = vpop.permute.xlu0 %584  ;;  %vm1545_vm12 = vcmp.eq.s32.totalorder %v7913_v33, %v7777_v19 }
  0xc3   : > { %12409 = vst [vmem:[#allocation23_spill] sm:$0xff] %v7915_v34  ;;  %vm1529_vm11 = vcmp.eq.s32.totalorder %v7915_v34, %v7777_v19  ;;  %v7922_v36 = vpop.permute.xlu2 %437 }
  0xc4   : > { %vm6435_vm13 = vmpackc.low %vm1545_vm12, %vm1529_vm11  ;;  %12410 = vst [vmem:[#allocation24_spill] sm:$0xff] %v7922_v36  ;;  %vm745_vm8 = vcmp.eq.s32.totalorder %v7922_v36, %v7777_v19  ;;  %vm1497_vm11 = vcmp.eq.s32.totalorder %v7897_v26, %v7777_v19 }
  0xc5   : > { %6436 = vmatpush.bf16.msk.msra.mxu3 %vm6435_vm13, %v12249_v27  ;;  %253 = vst [vmem:[#allocation3 + $0x10] sm:$0xf] %v245_v30 }
  0xc8   : > { %461 = vperm.xlu0 %7490, %v345_v35   ;;  %v8087_v35 = vadd.s32 128, %v7777_v19 }
  0xc9   : > { %v7925_v39 = vpop.permute.xlu1 %488 }
  0xca   : > { %12411 = vst [vmem:[#allocation25_spill] sm:$0xff] %v7925_v39  ;;  %v7927_v41 = vpop.permute.xlu0 %443  ;;  %vm1017_vm0 = vcmp.eq.s32.totalorder %v7925_v39, %v7777_v19 }
  0xcb   : > { %vm777_vm15 = vcmp.eq.s32.totalorder %v7927_v41, %v7777_v19  ;;  %vm6403_vm3 = vmpackc.low %vm1033_vm2, %vm1017_vm0  ;;  %v7939_v1 = vpop.permute.xlu2 %524 }
  0xcc   : > { %vm6387_vm1 = vmpackc.low %vm777_vm15, %vm761_vm14  ;;  %6404 = vmatpush.bf16.msk.msra.mxu1 %vm6403_vm3, %v12249_v27  ;;  %vm1209_vm0 = vcmp.eq.s32.totalorder %v7939_v1, %v7777_v19 }
  0xcd   : > { %6388 = vmatpush.bf16.msk.msra.mxu0 %vm6387_vm1, %v12249_v27 }
  0xd1   : > { %v7941_v42 = vpop.permute.xlu1 %533 }
  0xd2   : > { %12412 = vst [vmem:[#allocation26_spill] sm:$0xff] %v7941_v42  ;;  %v7943_v43 = vpop.permute.xlu0 %530  ;;  %vm1257_vm5 = vcmp.eq.s32.totalorder %v7941_v42, %v7777_v19 }
  0xd3   : > { %12413 = vst [vmem:[#allocation27_spill] sm:$0xff] %v7943_v43  ;;  %vm1241_vm4 = vcmp.eq.s32.totalorder %v7943_v43, %v7777_v19  ;;  %v7950_v44 = vpop.permute.xlu2 %575 }
  0xd4   : > { %vm6421_vm6 = vmpackc.low %vm1257_vm5, %vm1241_vm4  ;;  %vm1481_vm4 = vcmp.eq.s32.totalorder %v7950_v44, %v7777_v19 }
  0xd5   : > { %6422 = vmatpush.bf16.msk.msra.mxu2 %vm6421_vm6, %v12249_v27 }
  0xd9   : > { %v7954_v48 = vpop.permute.xlu1 %434 }
  0xda   : > { %v7952_v45 = vpop.permute.xlu0 %581  ;;  %vm729_vm7 = vcmp.eq.s32.totalorder %v7954_v48, %v7777_v19 }
  0xdb   : > { %12414 = vst [vmem:[#allocation28_spill] sm:$0xff] %v7952_v45  ;;  %vm1513_vm9 = vcmp.eq.s32.totalorder %v7952_v45, %v7777_v19  ;;  %vm6389_vm10 = vmpackc.low %vm745_vm8, %vm729_vm7  ;;  %v7970_v52 = vpop.permute.xlu2 %476 }
  0xdc   : > { %6390 = vmatpush.bf16.msk.msra.mxu0 %vm6389_vm10, %v12249_v27  ;;  %vm6437_vm12 = vmpackc.low %vm1513_vm9, %vm1497_vm11  ;;  %12417 = vst [vmem:[#allocation31_spill] sm:$0xff] %v7970_v52  ;;  %vm953_vm9 = vcmp.eq.s32.totalorder %v7970_v52, %v7777_v19 }
  0xdd   : > { %6438 = vmatpush.bf16.msk.msra.mxu3 %vm6437_vm12, %v12249_v27 }
  0xe1   : > { %v7968_v51 = vpop.permute.xlu1 %485 }
  0xe2   : > { %v7966_v50 = vpop.permute.xlu0 %482  ;;  %12416 = vst [vmem:[#allocation30_spill] sm:$0xff] %v7968_v51  ;;  %vm1001_vm14 = vcmp.eq.s32.totalorder %v7968_v51, %v7777_v19 }
  0xe3   : > { %12415 = vst [vmem:[#allocation29_spill] sm:$0xff] %v7966_v50  ;;  %vm985_vm13 = vcmp.eq.s32.totalorder %v7966_v50, %v7777_v19  ;;  %v7989_v57 = vpop.permute.xlu2 %521 }
  0xe4   : > { %vm6405_vm15 = vmpackc.low %vm1001_vm14, %vm985_vm13  ;;  %12419 = vst [vmem:[#allocation33_spill] sm:$0xff] %v7989_v57  ;;  %vm1193_vm13 = vcmp.eq.s32.totalorder %v7989_v57, %v7777_v19 }
  0xe5   : > { %6406 = vmatpush.bf16.msk.msra.mxu1 %vm6405_vm15, %v12249_v27 }
  0xe9   : > { %v7979_v54 = vpop.permute.xlu1 %572 }
  0xea   : > { %v7977_v53 = vpop.permute.xlu0 %527  ;;  %12418 = vst [vmem:[#allocation32_spill] sm:$0xff] %v7979_v54  ;;  %vm1465_vm2 = vcmp.eq.s32.totalorder %v7979_v54, %v7777_v19 }
  0xeb   : > { %vm1225_vm1 = vcmp.eq.s32.totalorder %v7977_v53, %v7777_v19  ;;  %vm6439_vm5 = vmpackc.low %vm1481_vm4, %vm1465_vm2  ;;  %v8002_v61 = vpop.permute.xlu2 %422 }
  0xec   : > { %vm6423_vm3 = vmpackc.low %vm1225_vm1, %vm1209_vm0  ;;  %6440 = vmatpush.bf16.msk.msra.mxu3 %vm6439_vm5, %v12249_v27  ;;  %12422 = vst [vmem:[#allocation36_spill] sm:$0xff] %v8002_v61  ;;  %vm665_vm2 = vcmp.eq.s32.totalorder %v8002_v61, %v7777_v19 }
  0xed   : > { %6424 = vmatpush.bf16.msk.msra.mxu2 %vm6423_vm3, %v12249_v27 }
  0xf1   : > { %v7993_v59 = vpop.permute.xlu1 %431 }
  0xf2   : > { %12420 = vst [vmem:[#allocation34_spill] sm:$0xff] %v7993_v59  ;;  %v7995_v60 = vpop.permute.xlu0 %428  ;;  %vm713_vm7 = vcmp.eq.s32.totalorder %v7993_v59, %v7777_v19 }
  0xf3   : > { %12421 = vst [vmem:[#allocation35_spill] sm:$0xff] %v7995_v60  ;;  %vm697_vm6 = vcmp.eq.s32.totalorder %v7995_v60, %v7777_v19  ;;  %v8018_v3 = vpop.permute.xlu2 %473 }
  0xf4   : > { %vm6391_vm8 = vmpackc.low %vm713_vm7, %vm697_vm6  ;;  %12424 = vst [vmem:[#allocation38_spill] sm:$0xff] %v8018_v3  ;;  %vm937_vm6 = vcmp.eq.s32.totalorder %v8018_v3, %v7777_v19  ;;  %v236_v3 = vld [vmem:[%s213_s17] sm:$0xff] }
  0xf5   : > { %6392 = vmatpush.bf16.msk.msra.mxu0 %vm6391_vm8, %v12249_v27  ;;  %240 = vst [vmem:[#allocation1] ss:$2 sm:$0xff] %v236_v3 }
  0xf9   : > { %v8004_v62 = vpop.permute.xlu1 %518 }
  0xfa   : > { %v8006_v63 = vpop.permute.xlu0 %479  ;;  %vm1177_vm11 = vcmp.eq.s32.totalorder %v8004_v62, %v7777_v19 }
  0xfb   : > { %12423 = vst [vmem:[#allocation37_spill] sm:$0xff] %v8006_v63  ;;  %vm969_vm10 = vcmp.eq.s32.totalorder %v8006_v63, %v7777_v19  ;;  %vm6425_vm14 = vmpackc.low %vm1193_vm13, %vm1177_vm11  ;;  %v8033_v9 = vpop.permute.xlu2 %560 }
  0xfc   : > { %vm6407_vm12 = vmpackc.low %vm969_vm10, %vm953_vm9  ;;  %6426 = vmatpush.bf16.msk.msra.mxu2 %vm6425_vm14, %v12249_v27  ;;  %12428 = vst [vmem:[#allocation42_spill] sm:$0xff] %v8033_v9 }
  0xfd   : > { %6408 = vmatpush.bf16.msk.msra.mxu1 %vm6407_vm12, %v12249_v27 }
 0x101   : > { %v8020_v5 = vpop.permute.xlu1 %569 }
 0x102   : > { %12425 = vst [vmem:[#allocation39_spill] sm:$0xff] %v8020_v5  ;;  %v8022_v6 = vpop.permute.xlu0 %566  ;;  %vm1449_vm0 = vcmp.eq.s32.totalorder %v8020_v5, %v7777_v19 }
 0x103   : > { %vm1433_vm15 = vcmp.eq.s32.totalorder %v8022_v6, %v7777_v19  ;;  %v8053_v16 = vpop.permute.xlu2 %419 }
 0x104   : > { %vm6441_vm1 = vmpackc.low %vm1449_vm0, %vm1433_vm15  ;;  %12431 = vst [vmem:[#allocation45_spill] sm:$0xff] %v8053_v16  ;;  %vm649_vm12 = vcmp.eq.s32.totalorder %v8053_v16, %v7777_v19  ;;  %vm1401_vm15 = vcmp.eq.s32.totalorder %v8033_v9, %v7777_v19  ;;  %v244_v16 = vld.sshfl [vmem:[#allocation1 + $0x8] sm:$0xff pattern:$0x75316420] }
 0x105   : > { %6442 = vmatpush.bf16.msk.msra.mxu3 %vm6441_vm1, %v12249_v27  ;;  %252 = vst [vmem:[#allocation3 + $0x8] sm:$0xf] %v244_v16 }
 0x109   : > { %v8029_v7 = vpop.permute.xlu1 %470 }
 0x10a   : > { %12426 = vst [vmem:[#allocation40_spill] sm:$0xff] %v8029_v7  ;;  %v8031_v8 = vpop.permute.xlu0 %425  ;;  %vm921_vm4 = vcmp.eq.s32.totalorder %v8029_v7, %v7777_v19  ;;  %v243_v7 = vld.sshfl [vmem:[#allocation1] sm:$0xff pattern:$0x75316420] }
 0x10b   : > { %12427 = vst [vmem:[#allocation41_spill] sm:$0xff] %v8031_v8  ;;  %vm681_vm3 = vcmp.eq.s32.totalorder %v8031_v8, %v7777_v19  ;;  %vm6409_vm7 = vmpackc.low %vm937_vm6, %vm921_vm4  ;;  %v8074_v25 = vpop.permute.xlu2 %506  ;;  %vm257_vm4 = vcmp.lt.s32.totalorder %v255_v17, 512  ;;  %vm1338_vm6 = vcmp.eq.s32.totalorder %v7804_v38, %v8087_v35 }
 0x10c   : > { %vm6393_vm5 = vmpackc.low %vm681_vm3, %vm665_vm2  ;;  %6410 = vmatpush.bf16.msk.msra.mxu1 %vm6409_vm7, %v12249_v27  ;;  %12434 = vst [vmem:[#allocation48_spill] sm:$0xff] %v8074_v25  ;;  %vm1594_vm7 = vcmp.eq.s32.totalorder %v7802_v37, %v8087_v35 }
 0x10d   : > { %6394 = vmatpush.bf16.msk.msra.mxu0 %vm6393_vm5, %v12249_v27  ;;  %260 = vst.msk [vmem:[#allocation3 + $0x4] ss:$8 sm:$0xf] %vm257_vm4, %v7595_v21  ;;  %vm1354_vm5 = vcmp.eq.s32.totalorder %v7816_v47, %v8087_v35  ;;  %vm826_vm4 = vcmp.eq.s32.totalorder %v7771_v14, %v8087_v35 }
 0x10e   : > { %251 = vst [vmem:[#allocation3] sm:$0xf] %v243_v7  ;;  %v12462_v7 = vld [vmem:[#allocation32_spill] sm:$0xff] }
 0x111   : > { %v8045_v12 = vpop.permute.xlu1 %515 }
 0x112   : > { %12429 = vst [vmem:[#allocation43_spill] sm:$0xff] %v8045_v12  ;;  %v8047_v15 = vpop.permute.xlu0 %512  ;;  %vm1161_vm9 = vcmp.eq.s32.totalorder %v8045_v12, %v7777_v19 }
 0x113   : > { %12430 = vst [vmem:[#allocation44_spill] sm:$0xff] %v8047_v15  ;;  %vm1145_vm8 = vcmp.eq.s32.totalorder %v8047_v15, %v7777_v19 }
 0x114   : > { %vm6427_vm10 = vmpackc.low %vm1161_vm9, %vm1145_vm8  ;;  %vm1113_vm8 = vcmp.eq.s32.totalorder %v8074_v25, %v7777_v19  ;;  %v4203_v3 = vld [vmem:[#allocation3 + $0x10] sm:$0x1f]  ;;  %v4204_v32 = vld [vmem:[#allocation3 + $0x18] sm:$0x1f] }
 0x115   : > { %6428 = vmatpush.bf16.msk.msra.mxu2 %vm6427_vm10, %v12249_v27  ;;  %v8116_v30 = vpack.c.bf16 %v4203_v3, %v4203_v3  ;;  %v8121_v21 = vpack.c.bf16 %v4204_v32, %v4204_v32  ;;  %v4201_v16 = vld [vmem:[#allocation3] sm:$0x1f] }
 0x117   : > { %12440 = vst [vmem:[#allocation54_spill] sm:$0xff] %v8116_v30 }
 0x118   : > { %12441 = vst [vmem:[#allocation55_spill] sm:$0xff] %v8121_v21 }
 0x119   : > { %v8062_v20 = vpop.permute.xlu1 %416 }
 0x11a   : > { %v8060_v18 = vpop.permute.xlu0 %563  ;;  %12433 = vst [vmem:[#allocation47_spill] sm:$0xff] %v8062_v20  ;;  %vm633_vm11 = vcmp.eq.s32.totalorder %v8062_v20, %v7777_v19 }
 0x11b   : > { %12432 = vst [vmem:[#allocation46_spill] sm:$0xff] %v8060_v18  ;;  %vm1417_vm13 = vcmp.eq.s32.totalorder %v8060_v18, %v7777_v19  ;;  %vm6395_vm14 = vmpackc.low %vm649_vm12, %vm633_vm11  ;;  %vm1610_vm12 = vcmp.eq.s32.totalorder %v7814_v46, %v8087_v35 }
 0x11c   : > { %6396 = vmatpush.bf16.msk.msra.mxu0 %vm6395_vm14, %v12249_v27  ;;  %vm6443_vm0 = vmpackc.low %vm1417_vm13, %vm1401_vm15 }
 0x11d   : > { %6444 = vmatpush.bf16.msk.msra.mxu3 %vm6443_vm0, %v12249_v27  ;;  %vm6479_vm11 = vmpackc.low %vm1354_vm5, %vm1338_vm6  ;;  %vm842_vm5 = vcmp.eq.s32.totalorder %v7784_v23, %v8087_v35 }
 0x11e   : > { %vm6495_vm0 = vmpackc.low %vm1610_vm12, %vm1594_vm7  ;;  %vm1578_vm7 = vcmp.eq.s32.totalorder %v7807_v40, %v8087_v35 }
 0x11f   : > { %vm6447_vm12 = vmpackc.low %vm842_vm5, %vm826_vm4  ;;  %vm794_vm4 = vcmp.eq.s32.totalorder %v7877_v11, %v8087_v35  ;;  %vm810_vm5 = vcmp.eq.s32.totalorder %v7875_v10, %v8087_v35 }
 0x121   : > { %v8078_v29 = vpop.permute.xlu1 %467 }
 0x122   : > { %v8076_v28 = vpop.permute.xlu0 %464  ;;  %12436 = vst [vmem:[#allocation50_spill] sm:$0xff] %v8078_v29  ;;  %vm905_vm2 = vcmp.eq.s32.totalorder %v8078_v29, %v7777_v19  ;;  %v8091_v29 = vpop.permute.xlu2 %557 }
 0x123   : > { %12435 = vst [vmem:[#allocation49_spill] sm:$0xff] %v8076_v28  ;;  %vm889_vm1 = vcmp.eq.s32.totalorder %v8076_v28, %v7777_v19  ;;  %vm1385_vm14 = vcmp.eq.s32.totalorder %v8091_v29, %v7777_v19 }
 0x124   : > { %vm6411_vm3 = vmpackc.low %vm905_vm2, %vm889_vm1  ;;  %12437 = vst [vmem:[#allocation51_spill] sm:$0xff] %v8091_v29  ;;  %vm1322_vm1 = vcmp.eq.s32.totalorder %v7855_v2, %v8087_v35  ;;  %vm1562_vm2 = vcmp.eq.s32.totalorder %v7853_v0, %v8087_v35 }
 0x125   : > { %6412 = vmatpush.bf16.msk.msra.mxu1 %vm6411_vm3, %v12249_v27  ;;  %vm1306_vm3 = vcmp.eq.s32.totalorder %v7795_v31, %v8087_v35 }
 0x126   : > { %vm6481_vm6 = vmpackc.low %vm1322_vm1, %vm1306_vm3  ;;  %vm1082_vm1 = vcmp.eq.s32.totalorder %v7838_v56, %v8087_v35 }
 0x129   : > { %v8095_v17 = vpop.permute.xlu1 %554 }
 0x12a   : > { %v8093_v28 = vpop.permute.xlu0 %509  ;;  %12439 = vst [vmem:[#allocation53_spill] sm:$0xff] %v8095_v17  ;;  %vm1369_vm10 = vcmp.eq.s32.totalorder %v8095_v17, %v7777_v19  ;;  %v8179_v10 = vpop.permute.xlu2 %458 }
 0x12b   : > { %12438 = vst [vmem:[#allocation52_spill] sm:$0xff] %v8093_v28  ;;  %vm1129_vm9 = vcmp.eq.s32.totalorder %v8093_v28, %v7777_v19  ;;  %vm6445_vm15 = vmpackc.low %vm1385_vm14, %vm1369_vm10  ;;  %vm1546_vm14 = vcmp.eq.s32.totalorder %v7913_v33, %v8087_v35 }
 0x12c   : > { %vm6429_vm13 = vmpackc.low %vm1129_vm9, %vm1113_vm8  ;;  %6446 = vmatpush.bf16.msk.msra.mxu3 %vm6445_vm15, %v12249_v27  ;;  %vm1274_vm9 = vcmp.eq.s32.totalorder %v7892_v22, %v8087_v35 }
 0x12d   : > { %6430 = vmatpush.bf16.msk.msra.mxu2 %vm6429_vm13, %v12249_v27  ;;  %vm6497_vm8 = vmpackc.low %vm1578_vm7, %vm1562_vm2  ;;  %vm1530_vm13 = vcmp.eq.s32.totalorder %v7915_v34, %v8087_v35  ;;  %vm1098_vm2 = vcmp.eq.s32.totalorder %v7836_v55, %v8087_v35  ;;  %vm1242_vm7 = vcmp.eq.s32.totalorder %v7943_v43, %v8087_v35  ;;  %v8183_v43 = vpack.c.bf16 %v4201_v16, %v4201_v16 }
 0x12f   : > { %4256 = vmatmul.bf16.vlgmr.msra.gmra.mxu3 %v8121_v21 }
 0x130   : > { %6496 = vmatpush.bf16.msk.msrb.mxu3 %vm6495_vm0, %v12249_v27  ;;  %4243 = vmatmul.bf16.vlgmr.msra.gmra.mxu2 %v8116_v30  ;;  %vm1290_vm0 = vcmp.eq.s32.totalorder %v7841_v58, %v8087_v35 }
 0x131   : > { %6480 = vmatpush.bf16.msk.msrb.mxu2 %vm6479_vm11, %v12249_v27  ;;  %v8134_v3 = vpop.permute.xlu1 %413  ;;  %vm6483_vm3 = vmpackc.low %vm1290_vm0, %vm1274_vm9  ;;  %vm1514_vm9 = vcmp.eq.s32.totalorder %v7952_v45, %v8087_v35  ;;  %vm762_vm0 = vcmp.eq.s32.totalorder %v7858_v4, %v8087_v35 }
 0x132   : > { %12442 = vst [vmem:[#allocation56_spill] sm:$0xff] %v8134_v3  ;;  %v8136_v32 = vpop.permute.xlu0 %410  ;;  %vm617_vm11 = vcmp.eq.s32.totalorder %v8134_v3, %v7777_v19 }
 0x133   : > { %vm601_vm10 = vcmp.eq.s32.totalorder %v8136_v32, %v7777_v19 }
 0x134   : > { %6498 = vmatpush.bf16.msk.msrb.mxu3 %vm6497_vm8, %v12249_v27  ;;  %vm6397_vm15 = vmpackc.low %vm617_vm11, %vm601_vm10  ;;  %vm1258_vm8 = vcmp.eq.s32.totalorder %v7941_v42, %v8087_v35  ;;  %v12445_v42 = vmov 1.0|1.0  }
 0x135   : > { %6482 = vmatpush.bf16.msk.msrb.mxu2 %vm6481_vm6, %v12249_v27  ;;  %6398 = vmatpush.bf16.msk.msra.mxu0 %vm6397_vm15, %v12249_v27  ;;  %vm6499_vm6 = vmpackc.low %vm1546_vm14, %vm1530_vm13  ;;  %vm1498_vm14 = vcmp.eq.s32.totalorder %v7897_v26, %v8087_v35 }
 0x136   : > { %vm8175_vm10 = vmpackc.low %vm1098_vm2, %vm1082_vm1  ;;  %vm1226_vm1 = vcmp.eq.s32.totalorder %v7977_v53, %v8087_v35  ;;  %vm857_vm2 = vcmp.eq.s32.totalorder %v8179_v10, %v7777_v19 }
 0x137   : > { %vm6449_vm11 = vmpackc.low %vm810_vm5, %vm794_vm4  ;;  %vm1466_vm5 = vcmp.eq.s32.totalorder %v7979_v54, %v8087_v35  ;;  %v8215_v54 = vadd.s32 256, %v7777_v19 }
 0x138   : > { %6500 = vmatpush.bf16.msk.msrb.mxu3 %vm6499_vm6, %v12249_v27  ;;  %vm6485_vm13 = vmpackc.low %vm1258_vm8, %vm1242_vm7  ;;  %4217 = vmatmul.bf16.vlgmr.msra.gmra.mxu0 %v8183_v43  ;;  %vm1210_vm7 = vcmp.eq.s32.totalorder %v7939_v1, %v8087_v35  ;;  %vm1066_vm8 = vcmp.eq.s32.totalorder %v7894_v24, %v8087_v35 }
 0x139   : > { %6448 = vmatpush.bf16.msk.msrb.mxu0 %vm6447_vm12, %v12249_v27  ;;  %6484 = vmatpush.bf16.msk.msrb.mxu2 %vm6483_vm3, %v12249_v27  ;;  %vm778_vm12 = vcmp.eq.s32.totalorder %v7927_v41, %v8087_v35  ;;  %v4202_v27 = vld [vmem:[#allocation3 + $0x8] sm:$0x1f]  ;;  %vm6501_vm15 = vmpackc.low %vm1514_vm9, %vm1498_vm14  ;;  %vm1050_vm14 = vcmp.eq.s32.totalorder %v7821_v49, %v8087_v35 }
 0x13a   : > { %v8189_v45 = vpop.permute.xlu0 %461  ;;  %vm6451_vm4 = vmpackc.low %vm778_vm12, %vm762_vm0  ;;  %v8207_v16 = vpack.c.bf16 %v4202_v27, %v4202_v27  ;;  %vm730_vm12 = vcmp.eq.s32.totalorder %v7954_v48, %v8087_v35  ;;  %vm746_vm0 = vcmp.eq.s32.totalorder %v7922_v36, %v8087_v35  ;;  %v12453_v27 = vld [vmem:[#allocation38_spill] sm:$0xff] }
 0x13b   : > { %vm873_vm3 = vcmp.eq.s32.totalorder %v8189_v45, %v7777_v19  ;;  %vm6487_vm9 = vmpackc.low %vm1226_vm1, %vm1210_vm7 }
 0x13c   : > { %6502 = vmatpush.bf16.msk.msrb.mxu3 %vm6501_vm15, %v12445_v42  ;;  %vm6413_vm6 = vmpackc.low %vm873_vm3, %vm857_vm2  ;;  %12446 = vst [vmem:[#allocation57_spill] sm:$0xff] %v8207_v16  ;;  %vm1178_vm15 = vcmp.eq.s32.totalorder %v8004_v62, %v8087_v35  ;;  %vm1450_vm2 = vcmp.eq.s32.totalorder %v8020_v5, %v8087_v35 }
 0x13d   : > { %6450 = vmatpush.bf16.msk.msrb.mxu0 %vm6449_vm11, %v12445_v42  ;;  %6486 = vmatpush.bf16.msk.msrb.mxu2 %vm6485_vm13, %v12445_v42  ;;  %vm1482_vm11 = vcmp.eq.s32.totalorder %v7950_v44, %v8087_v35  ;;  %vm6465_vm1 = vmpackc.low %vm1066_vm8, %vm1050_vm14  ;;  %vm698_vm8 = vcmp.eq.s32.totalorder %v7995_v60, %v8087_v35  ;;  %vm1146_vm14 = vcmp.eq.s32.totalorder %v8047_v15, %v8087_v35 }
 0x13e   : > { %6414 = vmatpush.bf16.msk.msra.mxu1 %vm6413_vm6, %v12445_v42  ;;  %vm6503_vm13 = vmpackc.low %vm1482_vm11, %vm1466_vm5  ;;  %vm1018_vm5 = vcmp.eq.s32.totalorder %v7925_v39, %v8087_v35  ;;  %vm1355_vm6 = vcmp.eq.s32.totalorder %v7816_v47, %v8215_v54  ;;  %vm1339_vm11 = vcmp.eq.s32.totalorder %v7804_v38, %v8215_v54 }
 0x13f   : > { %vm6453_vm3 = vmpackc.low %vm746_vm0, %vm730_vm12 }
 0x140   : > { %6504 = vmatpush.bf16.msk.msrb.mxu3 %vm6503_vm13, %v12445_v42  ;;  %vm1034_vm13 = vcmp.eq.s32.totalorder %v7880_v13, %v8087_v35 }
 0x141   : > { %6452 = vmatpush.bf16.msk.msrb.mxu0 %vm6451_vm4, %v12445_v42  ;;  %6488 = vmatpush.bf16.msk.msrb.mxu2 %vm6487_vm9, %v12445_v42  ;;  %vm1194_vm4 = vcmp.eq.s32.totalorder %v7989_v57, %v8087_v35  ;;  %vm714_vm9 = vcmp.eq.s32.totalorder %v7993_v59, %v8087_v35  ;;  %vm6467_vm0 = vmpackc.low %vm1034_vm13, %vm1018_vm5  ;;  %vm1402_vm5 = vcmp.eq.s32.totalorder %v8033_v9, %v8087_v35 }
 0x142   : > { %6464 = vmatpush.bf16.msk.msrb.mxu1 %vm8175_vm10, %v12445_v42  ;;  %vm1434_vm10 = vcmp.eq.s32.totalorder %v8022_v6, %v8087_v35  ;;  %vm6489_vm7 = vmpackc.low %vm1194_vm4, %vm1178_vm15  ;;  %vm1162_vm15 = vcmp.eq.s32.totalorder %v8045_v12, %v8087_v35  ;;  %vm1002_vm4 = vcmp.eq.s32.totalorder %v7968_v51, %v8087_v35 }
 0x143   : > { %4230 = vmatmul.bf16.vlgmr.msra.gmra.mxu1 %v8207_v16  ;;  %vm6505_vm12 = vmpackc.low %vm1450_vm2, %vm1434_vm10 }
 0x144   : > { %6506 = vmatpush.bf16.msk.msrb.mxu3 %vm6505_vm12, %v12445_v42  ;;  %vm8267_vm10 = vmpackc.low %vm1355_vm6, %vm1339_vm11  ;;  %vm682_vm12 = vcmp.eq.s32.totalorder %v8031_v8, %v8087_v35  ;;  %vm666_vm11 = vcmp.eq.s32.totalorder %v8002_v61, %v8087_v35 }
 0x145   : > { %6454 = vmatpush.bf16.msk.msrb.mxu0 %vm6453_vm3, %v12445_v42  ;;  %6490 = vmatpush.bf16.msk.msrb.mxu2 %vm6489_vm7, %v12445_v42  ;;  %vm6455_vm2 = vmpackc.low %vm714_vm9, %vm698_vm8  ;;  %vm986_vm3 = vcmp.eq.s32.totalorder %v7966_v50, %v8087_v35  ;;  %vm1130_vm8 = vcmp.eq.s32.totalorder %v8093_v28, %v8087_v35  ;;  %vm827_vm9 = vcmp.eq.s32.totalorder %v7771_v14, %v8215_v54 }
 0x146   : > { %6466 = vmatpush.bf16.msk.msrb.mxu1 %vm6465_vm1, %v12445_v42  ;;  %vm1418_vm1 = vcmp.eq.s32.totalorder %v8060_v18, %v8087_v35  ;;  %vm6491_vm7 = vmpackc.low %vm1162_vm15, %vm1146_vm14  ;;  %vm1370_vm14 = vcmp.eq.s32.totalorder %v8095_v17, %v8087_v35  ;;  %vm843_vm15 = vcmp.eq.s32.totalorder %v7784_v23, %v8215_v54 }
 0x147   : > { %vm6507_vm6 = vmpackc.low %vm1418_vm1, %vm1402_vm5  ;;  %vm1114_vm1 = vcmp.eq.s32.totalorder %v8074_v25, %v8087_v35 }
 0x148   : > { %6508 = vmatpush.bf16.msk.msrb.mxu3 %vm6507_vm6, %v12445_v42  ;;  %vm6469_vm13 = vmpackc.low %vm1002_vm4, %vm986_vm3  ;;  %vm1386_vm3 = vcmp.eq.s32.totalorder %v8091_v29, %v8087_v35  ;;  %vm970_vm4 = vcmp.eq.s32.totalorder %v8006_v63, %v8087_v35  ;;  %vm634_vm6 = vcmp.eq.s32.totalorder %v8062_v20, %v8087_v35  ;;  %v12451_v20 = vld [vmem:[#allocation45_spill] sm:$0xff] }
 0x149   : > { %6456 = vmatpush.bf16.msk.msrb.mxu0 %vm6455_vm2, %v12445_v42  ;;  %6492 = vmatpush.bf16.msk.msrb.mxu2 %vm6491_vm7, %v12445_v42  ;;  %vm1595_vm2 = vcmp.eq.s32.totalorder %v7802_v37, %v8215_v54  ;;  %vm1611_vm7 = vcmp.eq.s32.totalorder %v7814_v46, %v8215_v54  ;;  %vm6493_vm5 = vmpackc.low %vm1130_vm8, %vm1114_vm1 }
 0x14a   : > { %6468 = vmatpush.bf16.msk.msrb.mxu1 %vm6467_vm0, %v12445_v42  ;;  %vm6457_vm0 = vmpackc.low %vm682_vm12, %vm666_vm11 }
 0x14b   : > { %vm6509_vm12 = vmpackc.low %vm1386_vm3, %vm1370_vm14  ;;  %vm602_vm3 = vcmp.eq.s32.totalorder %v8136_v32, %v8087_v35 }
 0x14c   : > { %vm8310_vm11 = vmpackc.low %vm843_vm15, %vm827_vm9  ;;  %6510 = vmatpush.bf16.msk.msrb.mxu3 %vm6509_vm12, %v12445_v42  ;;  %vm650_vm9 = vcmp.eq.s32.totalorder %v12451_v20, %v8087_v35  ;;  %vm1563_vm15 = vcmp.eq.s32.totalorder %v7853_v0, %v8215_v54  ;;  %vm1083_vm12 = vcmp.eq.s32.totalorder %v7838_v56, %v8215_v54 }
 0x14d   : > { %6458 = vmatpush.bf16.msk.msrb.mxu0 %vm6457_vm0, %v12445_v42  ;;  %6494 = vmatpush.bf16.msk.msrb.mxu2 %vm6493_vm5, %v12445_v42  ;;  %vm6559_vm8 = vmpackc.low %vm1611_vm7, %vm1595_vm2  ;;  %vm954_vm0 = vcmp.eq.s32.totalorder %v7970_v52, %v8087_v35  ;;  %vm1307_vm2 = vcmp.eq.s32.totalorder %v7795_v31, %v8215_v54  ;;  %vm1579_vm7 = vcmp.eq.s32.totalorder %v7807_v40, %v8215_v54 }
 0x14e   : > { %6470 = vmatpush.bf16.msk.msrb.mxu1 %vm6469_vm13, %v12445_v42  ;;  %vm1323_vm13 = vcmp.eq.s32.totalorder %v7855_v2, %v8215_v54  ;;  %vm6471_vm14 = vmpackc.low %vm970_vm4, %vm954_vm0  ;;  %v12452_v2 = vld [vmem:[#allocation40_spill] sm:$0xff]  ;;  %vm618_vm4 = vcmp.eq.s32.totalorder %v8134_v3, %v8087_v35  ;;  %vm1275_vm0 = vcmp.eq.s32.totalorder %v7892_v22, %v8215_v54 }
 0x14f   : > { %vm6459_vm1 = vmpackc.low %vm650_vm9, %vm634_vm6  ;;  %vm922_vm5 = vcmp.eq.s32.totalorder %v12452_v2, %v8087_v35  ;;  %vm1099_vm9 = vcmp.eq.s32.totalorder %v7836_v55, %v8215_v54  ;;  %4308 = vmatmul.bf16.vlgmr.msrb.gmra.mxu3 %v8121_v21  ;;  %v12454_v21 = vld [vmem:[#allocation18_spill] sm:$0xff] }
 0x150   : > { %6560 = vmatpush.bf16.msk.msra.mxu3 %vm6559_vm8, %v12445_v42  ;;  %vm6561_vm6 = vmpackc.low %vm1579_vm7, %vm1563_vm15  ;;  %vm938_vm8 = vcmp.eq.s32.totalorder %v12453_v27, %v8087_v35  ;;  %4295 = vmatmul.bf16.vlgmr.msrb.gmra.mxu2 %v8116_v30  ;;  %vm1547_vm15 = vcmp.eq.s32.totalorder %v7913_v33, %v8215_v54  ;;  %vm795_vm7 = vcmp.eq.s32.totalorder %v7877_v11, %v8215_v54  ;;  %v12455_v33 = vld [vmem:[#allocation49_spill] sm:$0xff]  ;;  %v12461_v11 = vld [vmem:[#allocation28_spill] sm:$0xff] }
 0x151   : > { %6544 = vmatpush.bf16.msk.msra.mxu2 %vm8267_vm10, %v12445_v42  ;;  %6460 = vmatpush.bf16.msk.msrb.mxu0 %vm6459_vm1, %v12445_v42  ;;  %vm6545_vm10 = vmpackc.low %vm1323_vm13, %vm1307_vm2  ;;  %vm1291_vm2 = vcmp.eq.s32.totalorder %v7841_v58, %v8215_v54 }
 0x152   : > { %6472 = vmatpush.bf16.msk.msrb.mxu1 %vm6471_vm14, %v12445_v42  ;;  %vm6473_vm13 = vmpackc.low %vm938_vm8, %vm922_vm5  ;;  %vm1531_vm14 = vcmp.eq.s32.totalorder %v7915_v34, %v8215_v54  ;;  %v12456_v34 = vld [vmem:[#allocation50_spill] sm:$0xff] }
 0x153   : > { %vm6461_vm1 = vmpackc.low %vm618_vm4, %vm602_vm3  ;;  %vm890_vm3 = vcmp.eq.s32.totalorder %v12455_v33, %v8087_v35  ;;  %vm906_vm4 = vcmp.eq.s32.totalorder %v12456_v34, %v8087_v35  ;;  %v12459_v33 = vld [vmem:[#allocation27_spill] sm:$0xff]  ;;  %v12460_v34 = vld [vmem:[#allocation26_spill] sm:$0xff] }
 0x154   : > { %6562 = vmatpush.bf16.msk.msra.mxu3 %vm6561_vm6, %v12445_v42  ;;  %vm6547_vm5 = vmpackc.low %vm1291_vm2, %vm1275_vm0  ;;  %vm1243_vm0 = vcmp.eq.s32.totalorder %v12459_v33, %v8215_v54  ;;  %vm779_vm2 = vcmp.eq.s32.totalorder %v7927_v41, %v8215_v54 }
 0x155   : > { %6546 = vmatpush.bf16.msk.msra.mxu2 %vm6545_vm10, %v12445_v42  ;;  %vm811_vm10 = vcmp.eq.s32.totalorder %v12454_v21, %v8215_v54  ;;  %6462 = vmatpush.bf16.msk.msrb.mxu0 %vm6461_vm1, %v12445_v42  ;;  %vm8380_vm6 = vmpackc.low %vm1099_vm9, %vm1083_vm12  ;;  %vm1515_vm12 = vcmp.eq.s32.totalorder %v12461_v11, %v8215_v54  ;;  %v12469_v21 = vld [vmem:[#allocation55_spill] sm:$0xff] }
 0x156   : > { %6474 = vmatpush.bf16.msk.msrb.mxu1 %vm6473_vm13, %v12445_v42  ;;  %vm6563_vm8 = vmpackc.low %vm1547_vm15, %vm1531_vm14  ;;  %vm1259_vm13 = vcmp.eq.s32.totalorder %v12460_v34, %v8215_v54  ;;  %vm1499_vm14 = vcmp.eq.s32.totalorder %v7897_v26, %v8215_v54  ;;  %vm874_vm15 = vcmp.eq.s32.totalorder %v8189_v45, %v8087_v35 }
 0x157   : > { %vm6513_vm1 = vmpackc.low %vm811_vm10, %vm795_vm7  ;;  %vm763_vm10 = vcmp.eq.s32.totalorder %v7858_v4, %v8215_v54 }
 0x158   : > { %6564 = vmatpush.bf16.msk.msra.mxu3 %vm6563_vm8, %v12445_v42  ;;  %vm6475_vm9 = vmpackc.low %vm906_vm4, %vm890_vm3  ;;  %4269 = vmatmul.bf16.vlgmr.msrb.gmra.mxu0 %v8183_v43  ;;  %vm858_vm3 = vcmp.eq.s32.totalorder %v8179_v10, %v8087_v35  ;;  %vm1467_vm8 = vcmp.eq.s32.totalorder %v12462_v7, %v8215_v54  ;;  %v8424_v35 = vadd.s32 384, %v7777_v19 }
 0x159   : > { %6512 = vmatpush.bf16.msk.msra.mxu0 %vm8310_vm11, %v12445_v42  ;;  %6548 = vmatpush.bf16.msk.msra.mxu2 %vm6547_vm5, %v12445_v42  ;;  %vm6549_vm11 = vmpackc.low %vm1259_vm13, %vm1243_vm0  ;;  %vm1227_vm5 = vcmp.eq.s32.totalorder %v7977_v53, %v8215_v54  ;;  %vm1211_vm13 = vcmp.eq.s32.totalorder %v7939_v1, %v8215_v54 }
 0x15a   : > { %6476 = vmatpush.bf16.msk.msrb.mxu1 %vm6475_vm9, %v12445_v42  ;;  %vm6565_vm7 = vmpackc.low %vm1515_vm12, %vm1499_vm14  ;;  %vm1483_vm9 = vcmp.eq.s32.totalorder %v7950_v44, %v8215_v54  ;;  %vm1051_vm14 = vcmp.eq.s32.totalorder %v7821_v49, %v8215_v54 }
 0x15b   : > { %vm6515_vm4 = vmpackc.low %vm779_vm2, %vm763_vm10 }
 0x15c   : > { %6566 = vmatpush.bf16.msk.msra.mxu3 %vm6565_vm7, %v12445_v42  ;;  %vm6477_vm0 = vmpackc.low %vm874_vm15, %vm858_vm3  ;;  %vm1179_vm15 = vcmp.eq.s32.totalorder %v8004_v62, %v8215_v54  ;;  %vm747_vm7 = vcmp.eq.s32.totalorder %v7922_v36, %v8215_v54 }
 0x15d   : > { %6514 = vmatpush.bf16.msk.msra.mxu0 %vm6513_vm1, %v12445_v42  ;;  %6550 = vmatpush.bf16.msk.msra.mxu2 %vm6549_vm11, %v12445_v42  ;;  %vm1067_vm1 = vcmp.eq.s32.totalorder %v7894_v24, %v8215_v54  ;;  %vm6551_vm12 = vmpackc.low %vm1227_vm5, %vm1211_vm13  ;;  %vm731_vm11 = vcmp.eq.s32.totalorder %v7954_v48, %v8215_v54  ;;  %vm1435_vm5 = vcmp.eq.s32.totalorder %v8022_v6, %v8215_v54 }
 0x15e   : > { %6478 = vmatpush.bf16.msk.msrb.mxu1 %vm6477_vm0, %v12445_v42  ;;  %vm6567_vm2 = vmpackc.low %vm1483_vm9, %vm1467_vm8  ;;  %vm1019_vm8 = vcmp.eq.s32.totalorder %v7925_v39, %v8215_v54  ;;  %vm1356_vm0 = vcmp.eq.s32.totalorder %v7816_v47, %v8424_v35  ;;  %vm1340_vm9 = vcmp.eq.s32.totalorder %v7804_v38, %v8424_v35 }
 0x15f   : > { %vm6529_vm10 = vmpackc.low %vm1067_vm1, %vm1051_vm14  ;;  %vm699_vm1 = vcmp.eq.s32.totalorder %v7995_v60, %v8215_v54  ;;  %vm1147_vm14 = vcmp.eq.s32.totalorder %v8047_v15, %v8215_v54 }
 0x160   : > { %6568 = vmatpush.bf16.msk.msra.mxu3 %vm6567_vm2, %v12445_v42  ;;  %vm6517_vm3 = vmpackc.low %vm747_vm7, %vm731_vm11  ;;  %vm1035_vm2 = vcmp.eq.s32.totalorder %v7880_v13, %v8215_v54 }
 0x161   : > { %6516 = vmatpush.bf16.msk.msra.mxu0 %vm6515_vm4, %v12445_v42  ;;  %6552 = vmatpush.bf16.msk.msra.mxu2 %vm6551_vm12, %v12445_v42  ;;  %vm1195_vm4 = vcmp.eq.s32.totalorder %v7989_v57, %v8215_v54  ;;  %vm715_vm12 = vcmp.eq.s32.totalorder %v7993_v59, %v8215_v54  ;;  %vm6531_vm7 = vmpackc.low %vm1035_vm2, %vm1019_vm8  ;;  %vm1403_vm8 = vcmp.eq.s32.totalorder %v8033_v9, %v8215_v54 }
 0x162   : > { %6528 = vmatpush.bf16.msk.msra.mxu1 %vm8380_vm6, %v12445_v42  ;;  %vm1451_vm6 = vcmp.eq.s32.totalorder %v8020_v5, %v8215_v54  ;;  %vm6553_vm13 = vmpackc.low %vm1195_vm4, %vm1179_vm15  ;;  %vm1163_vm15 = vcmp.eq.s32.totalorder %v8045_v12, %v8215_v54  ;;  %vm1003_vm4 = vcmp.eq.s32.totalorder %v7968_v51, %v8215_v54 }
 0x163   : > { %4282 = vmatmul.bf16.vlgmr.msrb.gmra.mxu1 %v8207_v16  ;;  %vm6569_vm11 = vmpackc.low %vm1451_vm6, %vm1435_vm5 }
 0x164   : > { %6570 = vmatpush.bf16.msk.msra.mxu3 %vm6569_vm11, %v12445_v42  ;;  %vm8473_vm5 = vmpackc.low %vm1356_vm0, %vm1340_vm9  ;;  %vm683_vm11 = vcmp.eq.s32.totalorder %v8031_v8, %v8215_v54  ;;  %vm667_vm9 = vcmp.eq.s32.totalorder %v8002_v61, %v8215_v54 }
 0x165   : > { %6518 = vmatpush.bf16.msk.msra.mxu0 %vm6517_vm3, %v12445_v42  ;;  %6554 = vmatpush.bf16.msk.msra.mxu2 %vm6553_vm13, %v12445_v42  ;;  %vm6519_vm6 = vmpackc.low %vm715_vm12, %vm699_vm1  ;;  %vm987_vm3 = vcmp.eq.s32.totalorder %v7966_v50, %v8215_v54  ;;  %vm1131_vm1 = vcmp.eq.s32.totalorder %v8093_v28, %v8215_v54  ;;  %vm828_vm12 = vcmp.eq.s32.totalorder %v7771_v14, %v8424_v35 }
 0x166   : > { %6530 = vmatpush.bf16.msk.msra.mxu1 %vm6529_vm10, %v12445_v42  ;;  %vm1419_vm10 = vcmp.eq.s32.totalorder %v8060_v18, %v8215_v54  ;;  %vm6555_vm13 = vmpackc.low %vm1163_vm15, %vm1147_vm14  ;;  %vm1371_vm14 = vcmp.eq.s32.totalorder %v8095_v17, %v8215_v54  ;;  %vm844_vm15 = vcmp.eq.s32.totalorder %v7784_v23, %v8424_v35 }
 0x167   : > { %vm6571_vm0 = vmpackc.low %vm1419_vm10, %vm1403_vm8  ;;  %vm1115_vm10 = vcmp.eq.s32.totalorder %v8074_v25, %v8215_v54  ;;  %v12465_v25 = vld [vmem:[#allocation47_spill] sm:$0xff] }
 0x168   : > { %6572 = vmatpush.bf16.msk.msra.mxu3 %vm6571_vm0, %v12445_v42  ;;  %vm6533_vm2 = vmpackc.low %vm1003_vm4, %vm987_vm3  ;;  %vm1387_vm3 = vcmp.eq.s32.totalorder %v8091_v29, %v8215_v54  ;;  %vm971_vm4 = vcmp.eq.s32.totalorder %v8006_v63, %v8215_v54  ;;  %vm635_vm0 = vcmp.eq.s32.totalorder %v12465_v25, %v8215_v54  ;;  %v12468_v63 = vld [vmem:[#allocation17_spill] sm:$0xff] }
 0x169   : > { %6520 = vmatpush.bf16.msk.msra.mxu0 %vm6519_vm6, %v12445_v42  ;;  %6556 = vmatpush.bf16.msk.msra.mxu2 %vm6555_vm13, %v12445_v42  ;;  %vm1596_vm6 = vcmp.eq.s32.totalorder %v7802_v37, %v8424_v35  ;;  %vm1612_vm13 = vcmp.eq.s32.totalorder %v7814_v46, %v8424_v35  ;;  %vm6557_vm8 = vmpackc.low %vm1131_vm1, %vm1115_vm10  ;;  %v8630_v46 = vadd.s32 512, %v7777_v19 }
 0x16a   : > { %6532 = vmatpush.bf16.msk.msra.mxu1 %vm6531_vm7, %v12445_v42  ;;  %vm6521_vm7 = vmpackc.low %vm683_vm11, %vm667_vm9 }
 0x16b   : > { %vm6573_vm11 = vmpackc.low %vm1387_vm3, %vm1371_vm14  ;;  %vm603_vm3 = vcmp.eq.s32.totalorder %v8136_v32, %v8215_v54 }
 0x16c   : > { %vm8516_vm9 = vmpackc.low %vm844_vm15, %vm828_vm12  ;;  %6574 = vmatpush.bf16.msk.msra.mxu3 %vm6573_vm11, %v12445_v42  ;;  %vm651_vm12 = vcmp.eq.s32.totalorder %v12451_v20, %v8215_v54  ;;  %vm1564_vm15 = vcmp.eq.s32.totalorder %v7853_v0, %v8424_v35  ;;  %vm1084_vm11 = vcmp.eq.s32.totalorder %v7838_v56, %v8424_v35 }
 0x16d   : > { %6522 = vmatpush.bf16.msk.msra.mxu0 %vm6521_vm7, %v12445_v42  ;;  %6558 = vmatpush.bf16.msk.msra.mxu2 %vm6557_vm8, %v12445_v42  ;;  %vm6623_vm1 = vmpackc.low %vm1612_vm13, %vm1596_vm6  ;;  %vm955_vm7 = vcmp.eq.s32.totalorder %v7970_v52, %v8215_v54  ;;  %vm1308_vm6 = vcmp.eq.s32.totalorder %v7795_v31, %v8424_v35  ;;  %vm1580_vm13 = vcmp.eq.s32.totalorder %v7807_v40, %v8424_v35 }
 0x16e   : > { %6534 = vmatpush.bf16.msk.msra.mxu1 %vm6533_vm2, %v12445_v42  ;;  %vm1324_vm2 = vcmp.eq.s32.totalorder %v12468_v63, %v8424_v35  ;;  %vm6535_vm14 = vmpackc.low %vm971_vm4, %vm955_vm7  ;;  %vm923_vm8 = vcmp.eq.s32.totalorder %v12452_v2, %v8215_v54  ;;  %vm619_vm4 = vcmp.eq.s32.totalorder %v8134_v3, %v8215_v54  ;;  %vm1276_vm7 = vcmp.eq.s32.totalorder %v7892_v22, %v8424_v35  ;;  %v12471_v3 = vld [vmem:[#allocation22_spill] sm:$0xff] }
 0x16f   : > { %vm6523_vm10 = vmpackc.low %vm651_vm12, %vm635_vm0  ;;  %vm1100_vm12 = vcmp.eq.s32.totalorder %v7836_v55, %v8424_v35  ;;  %4360 = vmatmul.bf16.vlgmr.msra.gmra.mxu3 %v12469_v21  ;;  %v12472_v21 = vld [vmem:[#allocation19_spill] sm:$0xff] }
 0x170   : > { %6624 = vmatpush.bf16.msk.msrb.mxu3 %vm6623_vm1, %v12445_v42  ;;  %vm6625_vm0 = vmpackc.low %vm1580_vm13, %vm1564_vm15  ;;  %vm939_vm1 = vcmp.eq.s32.totalorder %v12453_v27, %v8215_v54  ;;  %4347 = vmatmul.bf16.vlgmr.msra.gmra.mxu2 %v8116_v30  ;;  %v12470_v27 = vld [vmem:[#allocation23_spill] sm:$0xff]  ;;  %vm1548_vm15 = vcmp.eq.s32.totalorder %v12471_v3, %v8424_v35  ;;  %vm796_vm13 = vcmp.eq.s32.totalorder %v12472_v21, %v8424_v35  ;;  %v12473_v30 = vld [vmem:[#allocation18_spill] sm:$0xff] }
 0x171   : > { %6608 = vmatpush.bf16.msk.msrb.mxu2 %vm8473_vm5, %v12445_v42  ;;  %6524 = vmatpush.bf16.msk.msra.mxu0 %vm6523_vm10, %v12445_v42  ;;  %vm6609_vm5 = vmpackc.low %vm1324_vm2, %vm1308_vm6  ;;  %vm1292_vm6 = vcmp.eq.s32.totalorder %v7841_v58, %v8424_v35  ;;  %v12474_v3 = vld [vmem:[#allocation49_spill] sm:$0xff] }
 0x172   : > { %6536 = vmatpush.bf16.msk.msra.mxu1 %vm6535_vm14, %v12445_v42  ;;  %vm6537_vm2 = vmpackc.low %vm939_vm1, %vm923_vm8  ;;  %vm1532_vm14 = vcmp.eq.s32.totalorder %v12470_v27, %v8424_v35  ;;  %v12475_v27 = vld [vmem:[#allocation50_spill] sm:$0xff] }
 0x173   : > { %vm6525_vm10 = vmpackc.low %vm619_vm4, %vm603_vm3  ;;  %vm891_vm3 = vcmp.eq.s32.totalorder %v12474_v3, %v8215_v54  ;;  %vm907_vm4 = vcmp.eq.s32.totalorder %v12475_v27, %v8215_v54 }
 0x174   : > { %6626 = vmatpush.bf16.msk.msrb.mxu3 %vm6625_vm0, %v12445_v42  ;;  %vm6611_vm8 = vmpackc.low %vm1292_vm6, %vm1276_vm7  ;;  %vm1244_vm7 = vcmp.eq.s32.totalorder %v12459_v33, %v8424_v35  ;;  %vm780_vm6 = vcmp.eq.s32.totalorder %v7927_v41, %v8424_v35 }
 0x175   : > { %6610 = vmatpush.bf16.msk.msrb.mxu2 %vm6609_vm5, %v12445_v42  ;;  %vm812_vm5 = vcmp.eq.s32.totalorder %v12473_v30, %v8424_v35  ;;  %6526 = vmatpush.bf16.msk.msra.mxu0 %vm6525_vm10, %v12445_v42  ;;  %vm8586_vm0 = vmpackc.low %vm1100_vm12, %vm1084_vm11  ;;  %vm1516_vm11 = vcmp.eq.s32.totalorder %v12461_v11, %v8424_v35  ;;  %v12480_v30 = vld [vmem:[#allocation48_spill] sm:$0xff] }
 0x176   : > { %6538 = vmatpush.bf16.msk.msra.mxu1 %vm6537_vm2, %v12445_v42  ;;  %vm6627_vm1 = vmpackc.low %vm1548_vm15, %vm1532_vm14  ;;  %vm1260_vm2 = vcmp.eq.s32.totalorder %v12460_v34, %v8424_v35  ;;  %vm1500_vm14 = vcmp.eq.s32.totalorder %v7897_v26, %v8424_v35  ;;  %vm875_vm15 = vcmp.eq.s32.totalorder %v8189_v45, %v8215_v54 }
 0x177   : > { %vm6577_vm10 = vmpackc.low %vm812_vm5, %vm796_vm13  ;;  %vm764_vm5 = vcmp.eq.s32.totalorder %v7858_v4, %v8424_v35 }
 0x178   : > { %6628 = vmatpush.bf16.msk.msrb.mxu3 %vm6627_vm1, %v12445_v42  ;;  %vm6539_vm12 = vmpackc.low %vm907_vm4, %vm891_vm3  ;;  %4321 = vmatmul.bf16.vlgmr.msra.gmra.mxu0 %v8183_v43  ;;  %vm859_vm3 = vcmp.eq.s32.totalorder %v8179_v10, %v8215_v54  ;;  %vm1468_vm1 = vcmp.eq.s32.totalorder %v12462_v7, %v8424_v35  ;;  %v12485_v54 = vld [vmem:[#allocation56_spill] sm:$0xff] }
 0x179   : > { %6576 = vmatpush.bf16.msk.msrb.mxu0 %vm8516_vm9, %v12445_v42  ;;  %6612 = vmatpush.bf16.msk.msrb.mxu2 %vm6611_vm8, %v12445_v42  ;;  %vm6613_vm9 = vmpackc.low %vm1260_vm2, %vm1244_vm7  ;;  %vm1228_vm8 = vcmp.eq.s32.totalorder %v7977_v53, %v8424_v35  ;;  %vm1212_vm2 = vcmp.eq.s32.totalorder %v7939_v1, %v8424_v35 }
 0x17a   : > { %6540 = vmatpush.bf16.msk.msra.mxu1 %vm6539_vm12, %v12445_v42  ;;  %vm6629_vm13 = vmpackc.low %vm1516_vm11, %vm1500_vm14  ;;  %vm1484_vm12 = vcmp.eq.s32.totalorder %v7950_v44, %v8424_v35  ;;  %vm1052_vm14 = vcmp.eq.s32.totalorder %v7821_v49, %v8424_v35 }
 0x17b   : > { %vm6579_vm4 = vmpackc.low %vm780_vm6, %vm764_vm5 }
 0x17c   : > { %6630 = vmatpush.bf16.msk.msrb.mxu3 %vm6629_vm13, %v12445_v42  ;;  %vm6541_vm7 = vmpackc.low %vm875_vm15, %vm859_vm3  ;;  %vm1180_vm15 = vcmp.eq.s32.totalorder %v8004_v62, %v8424_v35  ;;  %vm748_vm13 = vcmp.eq.s32.totalorder %v7922_v36, %v8424_v35 }
 0x17d   : > { %6578 = vmatpush.bf16.msk.msrb.mxu0 %vm6577_vm10, %v12445_v42  ;;  %6614 = vmatpush.bf16.msk.msrb.mxu2 %vm6613_vm9, %v12445_v42  ;;  %vm1068_vm10 = vcmp.eq.s32.totalorder %v7894_v24, %v8424_v35  ;;  %vm6615_vm11 = vmpackc.low %vm1228_vm8, %vm1212_vm2  ;;  %vm732_vm9 = vcmp.eq.s32.totalorder %v7954_v48, %v8424_v35  ;;  %vm1436_vm8 = vcmp.eq.s32.totalorder %v8022_v6, %v8424_v35 }
 0x17e   : > { %6542 = vmatpush.bf16.msk.msra.mxu1 %vm6541_vm7, %v12445_v42  ;;  %vm6631_vm6 = vmpackc.low %vm1484_vm12, %vm1468_vm1  ;;  %vm1020_vm1 = vcmp.eq.s32.totalorder %v7925_v39, %v8424_v35  ;;  %vm1357_vm7 = vcmp.eq.s32.totalorder %v7816_v47, %v8630_v46  ;;  %vm1341_vm12 = vcmp.eq.s32.totalorder %v7804_v38, %v8630_v46 }
 0x17f   : > { %vm6593_vm5 = vmpackc.low %vm1068_vm10, %vm1052_vm14  ;;  %vm700_vm10 = vcmp.eq.s32.totalorder %v7995_v60, %v8424_v35  ;;  %vm1148_vm14 = vcmp.eq.s32.totalorder %v8047_v15, %v8424_v35 }
 0x180   : > { %6632 = vmatpush.bf16.msk.msrb.mxu3 %vm6631_vm6, %v12445_v42  ;;  %vm6581_vm3 = vmpackc.low %vm748_vm13, %vm732_vm9  ;;  %vm1036_vm6 = vcmp.eq.s32.totalorder %v7880_v13, %v8424_v35 }
 0x181   : > { %6580 = vmatpush.bf16.msk.msrb.mxu0 %vm6579_vm4, %v12445_v42  ;;  %6616 = vmatpush.bf16.msk.msrb.mxu2 %vm6615_vm11, %v12445_v42  ;;  %vm1196_vm4 = vcmp.eq.s32.totalorder %v7989_v57, %v8424_v35  ;;  %vm716_vm11 = vcmp.eq.s32.totalorder %v7993_v59, %v8424_v35  ;;  %vm6595_vm13 = vmpackc.low %vm1036_vm6, %vm1020_vm1  ;;  %vm1404_vm1 = vcmp.eq.s32.totalorder %v8033_v9, %v8424_v35 }
 0x182   : > { %6592 = vmatpush.bf16.msk.msrb.mxu1 %vm8586_vm0, %v12445_v42  ;;  %vm1452_vm0 = vcmp.eq.s32.totalorder %v8020_v5, %v8424_v35  ;;  %vm6617_vm2 = vmpackc.low %vm1196_vm4, %vm1180_vm15  ;;  %vm1164_vm15 = vcmp.eq.s32.totalorder %v8045_v12, %v8424_v35  ;;  %vm1004_vm4 = vcmp.eq.s32.totalorder %v7968_v51, %v8424_v35 }
 0x183   : > { %4334 = vmatmul.bf16.vlgmr.msra.gmra.mxu1 %v8207_v16  ;;  %vm6633_vm9 = vmpackc.low %vm1452_vm0, %vm1436_vm8 }
 0x184   : > { %6634 = vmatpush.bf16.msk.msrb.mxu3 %vm6633_vm9, %v12445_v42  ;;  %vm8679_vm8 = vmpackc.low %vm1357_vm7, %vm1341_vm12  ;;  %vm684_vm9 = vcmp.eq.s32.totalorder %v8031_v8, %v8424_v35  ;;  %vm668_vm12 = vcmp.eq.s32.totalorder %v8002_v61, %v8424_v35  ;;  %v12482_v61 = vld [vmem:[#allocation37_spill] sm:$0xff] }
 0x185   : > { %6582 = vmatpush.bf16.msk.msrb.mxu0 %vm6581_vm3, %v12445_v42  ;;  %6618 = vmatpush.bf16.msk.msrb.mxu2 %vm6617_vm2, %v12445_v42  ;;  %vm6583_vm0 = vmpackc.low %vm716_vm11, %vm700_vm10  ;;  %vm988_vm3 = vcmp.eq.s32.totalorder %v7966_v50, %v8424_v35  ;;  %vm1132_vm10 = vcmp.eq.s32.totalorder %v8093_v28, %v8424_v35  ;;  %vm829_vm11 = vcmp.eq.s32.totalorder %v7771_v14, %v8630_v46  ;;  %v12481_v28 = vld [vmem:[#allocation13_spill] sm:$0xff]  ;;  %v12487_v14 = vld [vmem:[#allocation54_spill] sm:$0xff] }
 0x186   : > { %6594 = vmatpush.bf16.msk.msrb.mxu1 %vm6593_vm5, %v12445_v42  ;;  %vm1420_vm5 = vcmp.eq.s32.totalorder %v8060_v18, %v8424_v35  ;;  %vm6619_vm2 = vmpackc.low %vm1164_vm15, %vm1148_vm14  ;;  %vm1372_vm14 = vcmp.eq.s32.totalorder %v8095_v17, %v8424_v35  ;;  %vm845_vm15 = vcmp.eq.s32.totalorder %v7784_v23, %v8630_v46  ;;  %v8831_v23 = vadd.s32 640, %v7777_v19 }
 0x187   : > { %vm6635_vm7 = vmpackc.low %vm1420_vm5, %vm1404_vm1  ;;  %vm1116_vm5 = vcmp.eq.s32.totalorder %v12480_v30, %v8424_v35 }
 0x188   : > { %6636 = vmatpush.bf16.msk.msrb.mxu3 %vm6635_vm7, %v12445_v42  ;;  %vm6597_vm6 = vmpackc.low %vm1004_vm4, %vm988_vm3  ;;  %vm1388_vm3 = vcmp.eq.s32.totalorder %v8091_v29, %v8424_v35  ;;  %vm972_vm4 = vcmp.eq.s32.totalorder %v12482_v61, %v8424_v35  ;;  %vm636_vm7 = vcmp.eq.s32.totalorder %v12465_v25, %v8424_v35 }
 0x189   : > { %6584 = vmatpush.bf16.msk.msrb.mxu0 %vm6583_vm0, %v12445_v42  ;;  %6620 = vmatpush.bf16.msk.msrb.mxu2 %vm6619_vm2, %v12445_v42  ;;  %vm1597_vm0 = vcmp.eq.s32.totalorder %v7802_v37, %v8630_v46  ;;  %vm1613_vm2 = vcmp.eq.s32.totalorder %v12481_v28, %v8630_v46  ;;  %vm6621_vm1 = vmpackc.low %vm1132_vm10, %vm1116_vm5 }
 0x18a   : > { %6596 = vmatpush.bf16.msk.msrb.mxu1 %vm6595_vm13, %v12445_v42  ;;  %vm6585_vm13 = vmpackc.low %vm684_vm9, %vm668_vm12 }
 0x18b   : > { %vm6637_vm9 = vmpackc.low %vm1388_vm3, %vm1372_vm14  ;;  %vm604_vm3 = vcmp.eq.s32.totalorder %v8136_v32, %v8424_v35 }
 0x18c   : > { %vm8722_vm12 = vmpackc.low %vm845_vm15, %vm829_vm11  ;;  %6638 = vmatpush.bf16.msk.msrb.mxu3 %vm6637_vm9, %v12445_v42  ;;  %vm652_vm11 = vcmp.eq.s32.totalorder %v12451_v20, %v8424_v35  ;;  %vm1565_vm15 = vcmp.eq.s32.totalorder %v7853_v0, %v8630_v46  ;;  %vm1085_vm9 = vcmp.eq.s32.totalorder %v7838_v56, %v8630_v46  ;;  %v12486_v20 = vld [vmem:[#allocation38_spill] sm:$0xff] }
 0x18d   : > { %6586 = vmatpush.bf16.msk.msrb.mxu0 %vm6585_vm13, %v12445_v42  ;;  %6622 = vmatpush.bf16.msk.msrb.mxu2 %vm6621_vm1, %v12445_v42  ;;  %vm6687_vm10 = vmpackc.low %vm1613_vm2, %vm1597_vm0  ;;  %vm956_vm13 = vcmp.eq.s32.totalorder %v7970_v52, %v8424_v35  ;;  %vm1309_vm0 = vcmp.eq.s32.totalorder %v7795_v31, %v8630_v46  ;;  %vm1581_vm2 = vcmp.eq.s32.totalorder %v7807_v40, %v8630_v46  ;;  %v12488_v52 = vld [vmem:[#allocation55_spill] sm:$0xff] }
 0x18e   : > { %6598 = vmatpush.bf16.msk.msrb.mxu1 %vm6597_vm6, %v12445_v42  ;;  %vm1325_vm6 = vcmp.eq.s32.totalorder %v12468_v63, %v8630_v46  ;;  %vm6599_vm14 = vmpackc.low %vm972_vm4, %vm956_vm13  ;;  %vm924_vm1 = vcmp.eq.s32.totalorder %v12452_v2, %v8424_v35  ;;  %vm620_vm4 = vcmp.eq.s32.totalorder %v12485_v54, %v8424_v35  ;;  %vm1277_vm13 = vcmp.eq.s32.totalorder %v7892_v22, %v8630_v46  ;;  %v12490_v54 = vld [vmem:[#allocation22_spill] sm:$0xff] }
 0x18f   : > { %vm6587_vm5 = vmpackc.low %vm652_vm11, %vm636_vm7  ;;  %4412 = vmatmul.bf16.vlgmr.msrb.gmra.mxu3 %v12488_v52  ;;  %v12491_v52 = vld [vmem:[#allocation18_spill] sm:$0xff] }
 0x190   : > { %6688 = vmatpush.bf16.msk.msra.mxu3 %vm6687_vm10, %v12445_v42  ;;  %vm6689_vm7 = vmpackc.low %vm1581_vm2, %vm1565_vm15  ;;  %vm940_vm10 = vcmp.eq.s32.totalorder %v12486_v20, %v8424_v35  ;;  %4399 = vmatmul.bf16.vlgmr.msrb.gmra.mxu2 %v12487_v14  ;;  %v12489_v20 = vld [vmem:[#allocation23_spill] sm:$0xff]  ;;  %vm1549_vm15 = vcmp.eq.s32.totalorder %v12490_v54, %v8630_v46  ;;  %vm797_vm2 = vcmp.eq.s32.totalorder %v12472_v21, %v8630_v46 }
 0x191   : > { %6672 = vmatpush.bf16.msk.msra.mxu2 %vm8679_vm8, %v12445_v42  ;;  %6588 = vmatpush.bf16.msk.msrb.mxu0 %vm6587_vm5, %v12445_v42  ;;  %vm6673_vm8 = vmpackc.low %vm1325_vm6, %vm1309_vm0  ;;  %vm1101_vm6 = vcmp.eq.s32.totalorder %v7836_v55, %v8630_v46  ;;  %vm1293_vm0 = vcmp.eq.s32.totalorder %v7841_v58, %v8630_v46 }
 0x192   : > { %6600 = vmatpush.bf16.msk.msrb.mxu1 %vm6599_vm14, %v12445_v42  ;;  %vm6601_vm11 = vmpackc.low %vm940_vm10, %vm924_vm1  ;;  %vm1533_vm14 = vcmp.eq.s32.totalorder %v12489_v20, %v8630_v46 }
 0x193   : > { %vm6589_vm5 = vmpackc.low %vm620_vm4, %vm604_vm3  ;;  %vm892_vm3 = vcmp.eq.s32.totalorder %v12474_v3, %v8424_v35  ;;  %vm908_vm4 = vcmp.eq.s32.totalorder %v12475_v27, %v8424_v35 }
 0x194   : > { %6690 = vmatpush.bf16.msk.msra.mxu3 %vm6689_vm7, %v12445_v42  ;;  %vm6675_vm1 = vmpackc.low %vm1293_vm0, %vm1277_vm13  ;;  %vm1245_vm13 = vcmp.eq.s32.totalorder %v12459_v33, %v8630_v46  ;;  %vm781_vm0 = vcmp.eq.s32.totalorder %v7927_v41, %v8630_v46 }
 0x195   : > { %6674 = vmatpush.bf16.msk.msra.mxu2 %vm6673_vm8, %v12445_v42  ;;  %vm813_vm8 = vcmp.eq.s32.totalorder %v12491_v52, %v8630_v46  ;;  %6590 = vmatpush.bf16.msk.msrb.mxu0 %vm6589_vm5, %v12445_v42  ;;  %vm8792_vm7 = vmpackc.low %vm1101_vm6, %vm1085_vm9  ;;  %vm1517_vm9 = vcmp.eq.s32.totalorder %v12461_v11, %v8630_v46  ;;  %v12509_v52 = vld [vmem:[#allocation56_spill] sm:$0xff] }
 0x196   : > { %6602 = vmatpush.bf16.msk.msrb.mxu1 %vm6601_vm11, %v12445_v42  ;;  %vm6691_vm10 = vmpackc.low %vm1549_vm15, %vm1533_vm14  ;;  %vm1261_vm11 = vcmp.eq.s32.totalorder %v12460_v34, %v8630_v46  ;;  %vm1501_vm14 = vcmp.eq.s32.totalorder %v7897_v26, %v8630_v46  ;;  %vm876_vm15 = vcmp.eq.s32.totalorder %v8189_v45, %v8424_v35 }
 0x197   : > { %vm6641_vm5 = vmpackc.low %vm813_vm8, %vm797_vm2  ;;  %vm765_vm8 = vcmp.eq.s32.totalorder %v7858_v4, %v8630_v46 }
 0x198   : > { %6692 = vmatpush.bf16.msk.msra.mxu3 %vm6691_vm10, %v12445_v42  ;;  %vm6603_vm6 = vmpackc.low %vm908_vm4, %vm892_vm3  ;;  %4373 = vmatmul.bf16.vlgmr.msrb.gmra.mxu0 %v8183_v43  ;;  %vm860_vm3 = vcmp.eq.s32.totalorder %v8179_v10, %v8424_v35  ;;  %vm1469_vm10 = vcmp.eq.s32.totalorder %v12462_v7, %v8630_v46  ;;  %v12496_v35 = vmov 0 }
 0x199   : > { %6640 = vmatpush.bf16.msk.msra.mxu0 %vm8722_vm12, %v12445_v42  ;;  %6676 = vmatpush.bf16.msk.msra.mxu2 %vm6675_vm1, %v12445_v42  ;;  %vm6677_vm12 = vmpackc.low %vm1261_vm11, %vm1245_vm13  ;;  %vm1229_vm1 = vcmp.eq.s32.totalorder %v7977_v53, %v8630_v46  ;;  %vm1213_vm11 = vcmp.eq.s32.totalorder %v7939_v1, %v8630_v46 }
 0x19a   : > { %6604 = vmatpush.bf16.msk.msrb.mxu1 %vm6603_vm6, %v12445_v42  ;;  %vm6693_vm2 = vmpackc.low %vm1517_vm9, %vm1501_vm14  ;;  %vm1485_vm6 = vcmp.eq.s32.totalorder %v7950_v44, %v8630_v46  ;;  %vm1053_vm14 = vcmp.eq.s32.totalorder %v7821_v49, %v8630_v46 }
 0x19b   : > { %vm6643_vm4 = vmpackc.low %vm781_vm0, %vm765_vm8  ;;  %vm733_vm0 = vcmp.eq.s32.totalorder %v7954_v48, %v8630_v46  ;;  %vm749_vm8 = vcmp.eq.s32.totalorder %v7922_v36, %v8630_v46 }
 0x19c   : > { %6694 = vmatpush.bf16.msk.msra.mxu3 %vm6693_vm2, %v12445_v42  ;;  %vm6605_vm13 = vmpackc.low %vm876_vm15, %vm860_vm3  ;;  %vm1181_vm15 = vcmp.eq.s32.totalorder %v8004_v62, %v8630_v46  ;;  %vm1598_vm2 = vcmp.eq.s32.totalorder %v7802_v37, %v8831_v23  ;;  %vm1453_vm3 = vcmp.eq.s32.totalorder %v8020_v5, %v8630_v46 }
 0x19d   : > { %6642 = vmatpush.bf16.msk.msra.mxu0 %vm6641_vm5, %v12445_v42  ;;  %6678 = vmatpush.bf16.msk.msra.mxu2 %vm6677_vm12, %v12445_v42  ;;  %vm1069_vm5 = vcmp.eq.s32.totalorder %v7894_v24, %v8630_v46  ;;  %vm6679_vm9 = vmpackc.low %vm1229_vm1, %vm1213_vm11  ;;  %vm1437_vm1 = vcmp.eq.s32.totalorder %v8022_v6, %v8630_v46  ;;  %vm1358_vm11 = vcmp.eq.s32.totalorder %v7816_v47, %v8831_v23 }
 0x19e   : > { %6606 = vmatpush.bf16.msk.msrb.mxu1 %vm6605_vm13, %v12445_v42  ;;  %vm6695_vm12 = vmpackc.low %vm1485_vm6, %vm1469_vm10  ;;  %vm1197_vm10 = vcmp.eq.s32.totalorder %v7989_v57, %v8630_v46  ;;  %vm1021_vm13 = vcmp.eq.s32.totalorder %v7925_v39, %v8630_v46  ;;  %vm701_vm6 = vcmp.eq.s32.totalorder %v7995_v60, %v8630_v46 }
 0x1a0   : > { %6696 = vmatpush.bf16.msk.msra.mxu3 %vm6695_vm12, %v12445_v42  ;;  %vm717_vm12 = vcmp.eq.s32.totalorder %v7993_v59, %v8630_v46 }
 0x1a1   : > { %6644 = vmatpush.bf16.msk.msra.mxu0 %vm6643_vm4, %v12445_v42  ;;  %6680 = vmatpush.bf16.msk.msra.mxu2 %vm6679_vm9, %v12445_v42  ;;  %vm6645_vm4 = vmpackc.low %vm749_vm8, %vm733_vm0  ;;  %vm1342_vm0 = vcmp.eq.s32.totalorder %v7804_v38, %v8831_v23  ;;  %vm1037_vm8 = vcmp.eq.s32.totalorder %v7880_v13, %v8630_v46 }
 0x1a2   : > { %6656 = vmatpush.bf16.msk.msra.mxu1 %vm8792_vm7, %v12445_v42  ;;  %vm6657_vm7 = vmpackc.low %vm1069_vm5, %vm1053_vm14  ;;  %vm1614_vm5 = vcmp.eq.s32.totalorder %v12481_v28, %v8831_v23 }
 0x1a3   : > { %4386 = vmatmul.bf16.vlgmr.msrb.gmra.mxu1 %v8207_v16  ;;  %vm6681_vm9 = vmpackc.low %vm1197_vm10, %vm1181_vm15  ;;  %vm1149_vm15 = vcmp.eq.s32.totalorder %v8047_v15, %v8630_v46  ;;  %vm1165_vm10 = vcmp.eq.s32.totalorder %v8045_v12, %v8630_v46 }
 0x1a4   : > { %vm6697_vm14 = vmpackc.low %vm1453_vm3, %vm1437_vm1 }
 0x1a5   : > { %6646 = vmatpush.bf16.msk.msra.mxu0 %vm6645_vm4, %v12445_v42  ;;  %6682 = vmatpush.bf16.msk.msra.mxu2 %vm6681_vm9, %v12445_v42  ;;  %vm6659_vm4 = vmpackc.low %vm1037_vm8, %vm1021_vm13  ;;  %vm1005_vm9 = vcmp.eq.s32.totalorder %v7968_v51, %v8630_v46  ;;  %vm1310_vm8 = vcmp.eq.s32.totalorder %v7795_v31, %v8831_v23 }
 0x1a6   : > { %6658 = vmatpush.bf16.msk.msra.mxu1 %vm6657_vm7, %v12445_v42  ;;  %6698 = vmatpush.bf16.msk.msra.mxu3 %vm6697_vm14, %v12445_v42  ;;  %vm1421_vm7 = vcmp.eq.s32.totalorder %v8060_v18, %v8630_v46  ;;  %vm8892_vm1 = vmpackc.low %vm1358_vm11, %vm1342_vm0  ;;  %vm989_vm11 = vcmp.eq.s32.totalorder %v7966_v50, %v8630_v46  ;;  %vm1326_vm0 = vcmp.eq.s32.totalorder %v12468_v63, %v8831_v23  ;;  %v12498_v50 = vld [vmem:[#allocation52_spill] sm:$0xff] }
 0x1a7   : > { %vm8902_vm3 = vmpackc.low %vm1614_vm5, %vm1598_vm2  ;;  %vm1405_vm2 = vcmp.eq.s32.totalorder %v8033_v9, %v8630_v46  ;;  %vm685_vm5 = vcmp.eq.s32.totalorder %v8031_v8, %v8630_v46  ;;  %v12499_v9 = vld [vmem:[#allocation36_spill] sm:$0xff]  ;;  %v9067_v8 = vadd.s32 768, %v7777_v19 }
 0x1a8   : > { %v12497_v35 = vsel %vm8902_vm3, 4294967295, %v12496_v35  ;;  %vm6647_vm13 = vmpackc.low %vm717_vm12, %vm701_vm6  ;;  %vm1133_vm12 = vcmp.eq.s32.totalorder %v12498_v50, %v8630_v46 }
 0x1a9   : > { %vm6683_vm14 = vmpackc.low %vm1165_vm10, %vm1149_vm15  ;;  %6648 = vmatpush.bf16.msk.msra.mxu0 %vm6647_vm13, %v12445_v42  ;;  %vm669_vm15 = vcmp.eq.s32.totalorder %v12499_v9, %v8630_v46  ;;  %vm1373_vm13 = vcmp.eq.s32.totalorder %v8095_v17, %v8630_v46  ;;  %v12506_v17 = vld [vmem:[#allocation8_spill] sm:$0xff] }
 0x1aa   : > { %6660 = vmatpush.bf16.msk.msra.mxu1 %vm6659_vm4, %v12445_v42  ;;  %vm6699_vm6 = vmpackc.low %vm1421_vm7, %vm1405_vm2  ;;  %6684 = vmatpush.bf16.msk.msra.mxu2 %vm6683_vm14, %v12445_v42  ;;  %vm1117_vm7 = vcmp.eq.s32.totalorder %v12480_v30, %v8630_v46  ;;  %vm1566_vm14 = vcmp.eq.s32.totalorder %v7853_v0, %v8831_v23  ;;  %v12505_v30 = vld [vmem:[#allocation7_spill] sm:$0xff]  ;;  %v12309_v0 = vmov 0.0  }
 0x1ab   : > { %6700 = vmatpush.bf16.msk.msra.mxu3 %vm6699_vm6, %v12445_v42  ;;  %vm6661_vm10 = vmpackc.low %vm1005_vm9, %vm989_vm11  ;;  %vm1389_vm6 = vcmp.eq.s32.totalorder %v8091_v29, %v8630_v46  ;;  %vm973_vm11 = vcmp.eq.s32.totalorder %v12482_v61, %v8630_v46  ;;  %v12502_v29 = vld [vmem:[#allocation31_spill] sm:$0xff]  ;;  %220 = vst [vmem:[#allocation2] sm:$0x1f] %v12309_v0 }
 0x1ac   : > { %vm8931_vm3 = vmpackc.low %vm1326_vm0, %vm1310_vm8  ;;  %vm637_vm0 = vcmp.eq.s32.totalorder %v12465_v25, %v8630_v46  ;;  %221 = vst [vmem:[#allocation2 + $0x8] sm:$0x1f] %v12309_v0 }
 0x1ad   : > { %vm6649_vm4 = vmpackc.low %vm685_vm5, %vm669_vm15  ;;  %vm1582_vm5 = vcmp.eq.s32.totalorder %v7807_v40, %v8831_v23  ;;  %vm830_vm15 = vcmp.eq.s32.totalorder %v12505_v30, %v8831_v23 }
 0x1ae   : > { %vm6685_vm2 = vmpackc.low %vm1133_vm12, %vm1117_vm7  ;;  %6650 = vmatpush.bf16.msk.msra.mxu0 %vm6649_vm4, %v12445_v42  ;;  %6662 = vmatpush.bf16.msk.msra.mxu1 %vm6661_vm10, %v12445_v42  ;;  %vm957_vm12 = vcmp.eq.s32.totalorder %v12502_v29, %v8630_v46  ;;  %vm846_vm10 = vcmp.eq.s32.totalorder %v12506_v17, %v8831_v23  ;;  %v12508_v29 = vld [vmem:[#allocation45_spill] sm:$0xff] }
 0x1af   : > { %vm6701_vm9 = vmpackc.low %vm1389_vm6, %vm1373_vm13  ;;  %6686 = vmatpush.bf16.msk.msra.mxu2 %vm6685_vm2, %v12445_v42  ;;  %vm12507_vm13 = vnez %v12497_v35  ;;  %vm653_vm4 = vcmp.eq.s32.totalorder %v12508_v29, %v8630_v46  ;;  %vm925_vm6 = vcmp.eq.s32.totalorder %v12452_v2, %v8630_v46  ;;  %v12539_v29 = vld [vmem:[#allocation31_spill] sm:$0xff] }
 0x1b0   : > { %6702 = vmatpush.bf16.msk.msra.mxu3 %vm6701_vm9, %v12445_v42  ;;  %vm8953_vm8 = vmpackc.low %vm1582_vm5, %vm1566_vm14  ;;  %vm1278_vm14 = vcmp.eq.s32.totalorder %v7892_v22, %v8831_v23  ;;  %vm621_vm9 = vcmp.eq.s32.totalorder %v12509_v52, %v8630_v46  ;;  %v12512_v22 = vld [vmem:[#allocation38_spill] sm:$0xff]  ;;  %v12515_v52 = vld [vmem:[#allocation55_spill] sm:$0xff] }
 0x1b1   : > { %vm6663_vm7 = vmpackc.low %vm973_vm11, %vm957_vm12  ;;  %vm1294_vm11 = vcmp.eq.s32.totalorder %v7841_v58, %v8831_v23 }
 0x1b2   : > { %vm6651_vm2 = vmpackc.low %vm653_vm4, %vm637_vm0  ;;  %6664 = vmatpush.bf16.msk.msra.mxu1 %vm6663_vm7, %v12445_v42  ;;  %vm941_vm0 = vcmp.eq.s32.totalorder %v12512_v22, %v8630_v46  ;;  %vm1550_vm4 = vcmp.eq.s32.totalorder %v12490_v54, %v8831_v23  ;;  %4451 = vmatmul.bf16.vlgmr.msra.gmra.mxu2 %v12487_v14  ;;  %v12516_v54 = vld [vmem:[#allocation18_spill] sm:$0xff]  ;;  %v9113_v35 = vpop.f32.mrf.mxu3  ;;  %v4185_v0 = vld [vmem:[#allocation2] sm:$0x1f] }
 0x1b3   : > { %6736 = vmatpush.bf16.msk.msrb.mxu2 %vm8892_vm1, %v12445_v42  ;;  %6652 = vmatpush.bf16.msk.msra.mxu0 %vm6651_vm2, %v12445_v42  ;;  %vm605_vm1 = vcmp.eq.s32.totalorder %v8136_v32, %v8630_v46  ;;  %vm8982_vm5 = vmpackc.low %vm846_vm10, %vm830_vm15  ;;  %vm798_vm10 = vcmp.eq.s32.totalorder %v12472_v21, %v8831_v23  ;;  %vm814_vm7 = vcmp.eq.s32.totalorder %v12516_v54, %v8831_v23 }
 0x1b4   : > { %6752 = vmatpush.bf16.msk.msrb.mxu3 %vm12507_vm13, %v12445_v42  ;;  %vm8990_vm12 = vmpackc.low %vm1294_vm11, %vm1278_vm14  ;;  %vm1534_vm13 = vcmp.eq.s32.totalorder %v12489_v20, %v8831_v23  ;;  %vm909_vm11 = vcmp.eq.s32.totalorder %v12475_v27, %v8630_v46 }
 0x1b5   : > { %4464 = vmatmul.bf16.vlgmr.msra.gmra.mxu3 %v12515_v52  ;;  %vm6665_vm15 = vmpackc.low %vm941_vm0, %vm925_vm6  ;;  %vm893_vm6 = vcmp.eq.s32.totalorder %v12474_v3, %v8630_v46 }
 0x1b6   : > { %vm6653_vm14 = vmpackc.low %vm621_vm9, %vm605_vm1  ;;  %6666 = vmatpush.bf16.msk.msra.mxu1 %vm6665_vm15, %v12445_v42  ;;  %vm1518_vm9 = vcmp.eq.s32.totalorder %v12461_v11, %v8831_v23  ;;  %vm1502_vm15 = vcmp.eq.s32.totalorder %v7897_v26, %v8831_v23 }
 0x1b7   : > { %6738 = vmatpush.bf16.msk.msrb.mxu2 %vm8931_vm3, %v12445_v42  ;;  %vm1246_vm3 = vcmp.eq.s32.totalorder %v12459_v33, %v8831_v23  ;;  %6654 = vmatpush.bf16.msk.msra.mxu0 %vm6653_vm14, %v12445_v42  ;;  %vm6755_vm2 = vmpackc.low %vm1550_vm4, %vm1534_vm13  ;;  %vm782_vm13 = vcmp.eq.s32.totalorder %v7927_v41, %v8831_v23  ;;  %vm766_vm14 = vcmp.eq.s32.totalorder %v7858_v4, %v8831_v23 }
 0x1b8   : > { %6754 = vmatpush.bf16.msk.msrb.mxu3 %vm8953_vm8, %v12445_v42  ;;  %vm1262_vm8 = vcmp.eq.s32.totalorder %v12460_v34, %v8831_v23  ;;  %vm6705_vm1 = vmpackc.low %vm814_vm7, %vm798_vm10  ;;  %vm1102_vm10 = vcmp.eq.s32.totalorder %v7836_v55, %v8831_v23  ;;  %vm877_vm7 = vcmp.eq.s32.totalorder %v8189_v45, %v8630_v46 }
 0x1b9   : > { %vm6741_vm0 = vmpackc.low %vm1262_vm8, %vm1246_vm3  ;;  %vm1230_vm8 = vcmp.eq.s32.totalorder %v7977_v53, %v8831_v23 }
 0x1ba   : > { %vm6667_vm4 = vmpackc.low %vm909_vm11, %vm893_vm6  ;;  %4425 = vmatmul.bf16.vlgmr.msra.gmra.mxu0 %v8183_v43  ;;  %vm1470_vm11 = vcmp.eq.s32.totalorder %v12462_v7, %v8831_v23 }
 0x1bb   : > { %6704 = vmatpush.bf16.msk.msrb.mxu0 %vm8982_vm5, %v12445_v42  ;;  %6740 = vmatpush.bf16.msk.msrb.mxu2 %vm8990_vm12, %v12445_v42  ;;  %vm1086_vm5 = vcmp.eq.s32.totalorder %v7838_v56, %v8831_v23  ;;  %vm6757_vm12 = vmpackc.low %vm1518_vm9, %vm1502_vm15  ;;  %vm734_vm15 = vcmp.eq.s32.totalorder %v7954_v48, %v8831_v23 }
 0x1bc   : > { %6756 = vmatpush.bf16.msk.msrb.mxu3 %vm6755_vm2, %v12445_v42  ;;  %6668 = vmatpush.bf16.msk.msra.mxu1 %vm6667_vm4, %v12445_v42  ;;  %vm9050_vm3 = vmpackc.low %vm782_vm13, %vm766_vm14  ;;  %vm861_vm2 = vcmp.eq.s32.totalorder %v8179_v10, %v8630_v46  ;;  %vm1070_vm13 = vcmp.eq.s32.totalorder %v7894_v24, %v8831_v23  ;;  %vm1486_vm4 = vcmp.eq.s32.totalorder %v7950_v44, %v8831_v23  ;;  %v9101_v46 = vpop.f32.mrf.mxu2 }
 0x1bd   : > { %vm6719_vm6 = vmpackc.low %vm1102_vm10, %vm1086_vm5  ;;  %vm1054_vm5 = vcmp.eq.s32.totalorder %v7821_v49, %v8831_v23  ;;  %vm1599_vm14 = vcmp.eq.s32.totalorder %v7802_v37, %v9067_v8 }
 0x1be   : > { %vm6669_vm9 = vmpackc.low %vm877_vm7, %vm861_vm2  ;;  %vm1359_vm7 = vcmp.eq.s32.totalorder %v7816_v47, %v9067_v8  ;;  %vm1438_vm2 = vcmp.eq.s32.totalorder %v8022_v6, %v8831_v23 }
 0x1bf   : > { %6706 = vmatpush.bf16.msk.msrb.mxu0 %vm6705_vm1, %v12445_v42  ;;  %6742 = vmatpush.bf16.msk.msrb.mxu2 %vm6741_vm0, %v12445_v42  ;;  %vm1214_vm1 = vcmp.eq.s32.totalorder %v7939_v1, %v8831_v23  ;;  %vm6759_vm10 = vmpackc.low %vm1486_vm4, %vm1470_vm11  ;;  %vm702_vm4 = vcmp.eq.s32.totalorder %v7995_v60, %v8831_v23  ;;  %v12530_v60 = vld [vmem:[#allocation41_spill] sm:$0xff] }
 0x1c0   : > { %6758 = vmatpush.bf16.msk.msrb.mxu3 %vm6757_vm12, %v12445_v42  ;;  %6670 = vmatpush.bf16.msk.msra.mxu1 %vm6669_vm9, %v12445_v42  ;;  %vm6743_vm0 = vmpackc.low %vm1230_vm8, %vm1214_vm1  ;;  %vm1182_vm12 = vcmp.eq.s32.totalorder %v8004_v62, %v8831_v23  ;;  %vm750_vm8 = vcmp.eq.s32.totalorder %v7922_v36, %v8831_v23  ;;  %vm1198_vm9 = vcmp.eq.s32.totalorder %v7989_v57, %v8831_v23 }
 0x1c1   : > { %vm6709_vm11 = vmpackc.low %vm750_vm8, %vm734_vm15  ;;  %vm1022_vm1 = vcmp.eq.s32.totalorder %v7925_v39, %v8831_v23  ;;  %vm718_vm15 = vcmp.eq.s32.totalorder %v7993_v59, %v8831_v23  ;;  %vm1150_vm8 = vcmp.eq.s32.totalorder %v8047_v15, %v8831_v23  ;;  %v12529_v59 = vld [vmem:[#allocation42_spill] sm:$0xff] }
 0x1c3   : > { %6708 = vmatpush.bf16.msk.msrb.mxu0 %vm9050_vm3, %v12445_v42  ;;  %6744 = vmatpush.bf16.msk.msrb.mxu2 %vm6743_vm0, %v12445_v42  ;;  %vm9093_vm3 = vmpackc.low %vm1070_vm13, %vm1054_vm5  ;;  %vm1615_vm13 = vcmp.eq.s32.totalorder %v12481_v28, %v9067_v8  ;;  %vm1343_vm5 = vcmp.eq.s32.totalorder %v7804_v38, %v9067_v8  ;;  %v12527_v38 = vmov 0.0   ;;  %v4218_v28 = vpop.f32.mrf.mxu0 }
 0x1c4   : > { %6720 = vmatpush.bf16.msk.msrb.mxu1 %vm6719_vm6, %v12445_v42  ;;  %6760 = vmatpush.bf16.msk.msrb.mxu3 %vm6759_vm10, %v12445_v42  ;;  %vm1454_vm6 = vcmp.eq.s32.totalorder %v8020_v5, %v8831_v23  ;;  %vm6745_vm0 = vmpackc.low %vm1198_vm9, %vm1182_vm12  ;;  %vm1038_vm12 = vcmp.eq.s32.totalorder %v7880_v13, %v8831_v23  ;;  %222 = vst [vmem:[#allocation2 + $0x10] sm:$0x1f] %v12527_v38 }
 0x1c5   : > { %4438 = vmatmul.bf16.vlgmr.msra.gmra.mxu1 %v8207_v16  ;;  %vm6761_vm10 = vmpackc.low %vm1454_vm6, %vm1438_vm2  ;;  %vm1422_vm2 = vcmp.eq.s32.totalorder %v8060_v18, %v8831_v23  ;;  %v12528_v16 = vld [vmem:[#allocation29_spill] sm:$0xff]  ;;  %223 = vst [vmem:[#allocation2 + $0x18] sm:$0x1f] %v12527_v38  ;;  %v12538_v18 = vld [vmem:[#allocation51_spill] sm:$0xff] }
 0x1c6   : > { %vm9156_vm6 = vmpackc.low %vm1359_vm7, %vm1343_vm5  ;;  %224 = vst [vmem:[#allocation2 + $0x20] sm:$0x1f] %v12527_v38 }
 0x1c7   : > { %6710 = vmatpush.bf16.msk.msrb.mxu0 %vm6709_vm11, %v12445_v42  ;;  %vm1166_vm11 = vcmp.eq.s32.totalorder %v8045_v12, %v8831_v23  ;;  %6746 = vmatpush.bf16.msk.msrb.mxu2 %vm6745_vm0, %v12445_v42  ;;  %vm9166_vm9 = vmpackc.low %vm1615_vm13, %vm1599_vm14  ;;  %vm1006_vm0 = vcmp.eq.s32.totalorder %v7968_v51, %v8831_v23  ;;  %vm1327_vm14 = vcmp.eq.s32.totalorder %v12468_v63, %v9067_v8  ;;  %v12536_v51 = vld [vmem:[#allocation48_spill] sm:$0xff]  ;;  %v4259_v63 = vpop.f32.mrf.mxu3 }
 0x1c8   : > { %6722 = vmatpush.bf16.msk.msrb.mxu1 %vm9093_vm3, %v12445_v42  ;;  %6762 = vmatpush.bf16.msk.msrb.mxu3 %vm6761_vm10, %v12445_v42  ;;  %vm9147_vm3 = vmpackc.low %vm1038_vm12, %vm1022_vm1  ;;  %vm990_vm1 = vcmp.eq.s32.totalorder %v12528_v16, %v8831_v23  ;;  %vm1134_vm10 = vcmp.eq.s32.totalorder %v12498_v50, %v8831_v23  ;;  %vm1311_vm12 = vcmp.eq.s32.totalorder %v7795_v31, %v9067_v8  ;;  %v12533_v31 = vld [vmem:[#allocation53_spill] sm:$0xff]  ;;  %v12537_v16 = vld [vmem:[#allocation16_spill] sm:$0xff] }
 0x1c9   : > { %vm6711_vm7 = vmpackc.low %vm718_vm15, %vm702_vm4  ;;  %vm1406_vm4 = vcmp.eq.s32.totalorder %v12529_v59, %v8831_v23  ;;  %vm686_vm15 = vcmp.eq.s32.totalorder %v12530_v60, %v8831_v23  ;;  %225 = vst [vmem:[#allocation2 + $0x28] sm:$0x1f] %v12527_v38 }
 0x1ca   : > { %vm6747_vm13 = vmpackc.low %vm1166_vm11, %vm1150_vm8  ;;  %vm670_vm8 = vcmp.eq.s32.totalorder %v12499_v9, %v8831_v23  ;;  %226 = vst [vmem:[#allocation2 + $0x30] sm:$0x1f] %v12527_v38  ;;  %v4246_v9 = vpop.f32.mrf.mxu2 }
 0x1cb   : > { %6712 = vmatpush.bf16.msk.msrb.mxu0 %vm6711_vm7, %v12445_v42  ;;  %vm6763_vm5 = vmpackc.low %vm1422_vm2, %vm1406_vm4  ;;  %6748 = vmatpush.bf16.msk.msrb.mxu2 %vm6747_vm13, %v12445_v42  ;;  %227 = vst [vmem:[#allocation2 + $0x38] sm:$0x1f] %v12527_v38  ;;  %vm1390_vm13 = vcmp.eq.s32.totalorder %v12538_v18, %v8831_v23  ;;  %vm974_vm4 = vcmp.eq.s32.totalorder %v12482_v61, %v8831_v23  ;;  %v4231_v9 = vpop.f32.mrf.mxu1  ;;  %v4220_v13 = vpop.f32.mrf.mxu0 }
 0x1cc   : > { %6724 = vmatpush.bf16.msk.msrb.mxu1 %vm9147_vm3, %v12445_v42  ;;  %6764 = vmatpush.bf16.msk.msrb.mxu3 %vm6763_vm5, %v12445_v42  ;;  %vm9217_vm11 = vmpackc.low %vm1006_vm0, %vm990_vm1  ;;  %vm1374_vm3 = vcmp.eq.s32.totalorder %v12533_v31, %v8831_v23  ;;  %vm1118_vm1 = vcmp.eq.s32.totalorder %v12536_v51, %v8831_v23  ;;  %vm1567_vm0 = vcmp.eq.s32.totalorder %v12537_v16, %v9067_v8 }
 0x1cd   : > { %vm9226_vm2 = vmpackc.low %vm1327_vm14, %vm1311_vm12  ;;  %228 = vst [vmem:[#allocation2 + $0x40] sm:$0x1f] %v12527_v38  ;;  %vm638_vm5 = vcmp.eq.s32.totalorder %v12465_v25, %v8831_v23  ;;  %v4232_v63 = vadd.f32 %v4231_v9, %v4218_v28  ;;  %vm958_vm12 = vcmp.eq.s32.totalorder %v12539_v29, %v8831_v23  ;;  %v12542_v28 = vld [vmem:[#allocation45_spill] sm:$0xff] }
 0x1ce   : > { %vm6713_vm7 = vmpackc.low %vm686_vm15, %vm670_vm8  ;;  %229 = vst [vmem:[#allocation2 + $0x48] sm:$0x1f] %v12527_v38  ;;  %v12543_v9 = vld [vmem:[#allocation21_spill] sm:$0xff] }
 0x1cf   : > { %vm6749_vm14 = vmpackc.low %vm1134_vm10, %vm1118_vm1  ;;  %6714 = vmatpush.bf16.msk.msrb.mxu0 %vm6713_vm7, %v12445_v42  ;;  %vm1583_vm10 = vcmp.eq.s32.totalorder %v7807_v40, %v9067_v8  ;;  %230 = vst [vmem:[#allocation2 + $0x50] sm:$0x1f] %v12527_v38  ;;  %vm654_vm7 = vcmp.eq.s32.totalorder %v12542_v28, %v8831_v23  ;;  %v4245_v29 = vadd.f32 %v9101_v46, %v4232_v63  ;;  %v12544_v46 = vld [vmem:[#allocation56_spill] sm:$0xff]  ;;  %v12557_v63 = vld [vmem:[#allocation57_spill] sm:$0xff] }
 0x1d0   : > { %6726 = vmatpush.bf16.msk.msrb.mxu1 %vm9217_vm11, %v12445_v42  ;;  %vm6765_vm15 = vmpackc.low %vm1390_vm13, %vm1374_vm3  ;;  %6750 = vmatpush.bf16.msk.msrb.mxu2 %vm6749_vm14, %v12445_v42  ;;  %vm831_vm11 = vcmp.eq.s32.totalorder %v12505_v30, %v9067_v8  ;;  %vm847_vm3 = vcmp.eq.s32.totalorder %v12506_v17, %v9067_v8  ;;  %231 = vst [vmem:[#allocation2 + $0x58] sm:$0x1f] %v12527_v38 }
 0x1d1   : > { %6766 = vmatpush.bf16.msk.msrb.mxu3 %vm6765_vm15, %v12445_v42  ;;  %vm9266_vm8 = vmpackc.low %vm1583_vm10, %vm1567_vm0  ;;  %vm1279_vm0 = vcmp.eq.s32.totalorder %v12543_v9, %v9067_v8  ;;  %vm1295_vm14 = vcmp.eq.s32.totalorder %v7841_v58, %v9067_v8  ;;  %232 = vst [vmem:[#allocation2 + $0x60] sm:$0x1f] %v12527_v38  ;;  %vm606_vm13 = vcmp.eq.s32.totalorder %v8136_v32, %v8831_v23  ;;  %v9424_v58 = vadd.s32 896, %v7777_v19 }
 0x1d2   : > { %vm6727_vm1 = vmpackc.low %vm974_vm4, %vm958_vm12  ;;  %vm622_vm4 = vcmp.eq.s32.totalorder %v12544_v46, %v8831_v23  ;;  %v4258_v13 = vadd.f32 %v9113_v35, %v4245_v29  ;;  %233 = vst [vmem:[#allocation2 + $0x68] sm:$0x1f] %v12527_v38  ;;  %vm799_vm12 = vcmp.eq.s32.totalorder %v12472_v21, %v9067_v8  ;;  %v12549_v35 = vld [vmem:[#allocation22_spill] sm:$0xff] }
 0x1d3   : > { %vm9310_vm15 = vmpackc.low %vm847_vm3, %vm831_vm11  ;;  %vm815_vm11 = vcmp.eq.s32.totalorder %v12516_v54, %v9067_v8  ;;  %234 = vst [vmem:[#allocation2 + $0x70] sm:$0x1f] %v12527_v38  ;;  %4503 = vmatmul.bf16.vlgmr.msrb.gmra.mxu2 %v12487_v14  ;;  %v4233_v59 = vpop.f32.mrf.mxu1  ;;  %v4296_v18 = vpop.f32.mrf.mxu2 }
 0x1d4   : > { %6800 = vmatpush.bf16.msk.msra.mxu2 %vm9156_vm6, %v12445_v42  ;;  %vm6715_vm6 = vmpackc.low %vm654_vm7, %vm638_vm5  ;;  %6728 = vmatpush.bf16.msk.msrb.mxu1 %vm6727_vm1, %v12445_v42  ;;  %vm942_vm5 = vcmp.eq.s32.totalorder %v12512_v22, %v8831_v23  ;;  %vm1535_vm7 = vcmp.eq.s32.totalorder %v12489_v20, %v9067_v8  ;;  %vm1551_vm1 = vcmp.eq.s32.totalorder %v12549_v35, %v9067_v8  ;;  %v12560_v59 = vld [vmem:[#allocation11_spill] sm:$0xff] }
 0x1d5   : > { %6816 = vmatpush.bf16.msk.msra.mxu3 %vm9166_vm9, %v12445_v42  ;;  %vm926_vm9 = vcmp.eq.s32.totalorder %v12452_v2, %v8831_v23  ;;  %6716 = vmatpush.bf16.msk.msrb.mxu0 %vm6715_vm6, %v12445_v42  ;;  %vm9321_vm10 = vmpackc.low %vm1295_vm14, %vm1279_vm0  ;;  %v5041_v29 = vadd.f32 %v4258_v13, %v4185_v0  ;;  %235 = vst [vmem:[#allocation2 + $0x78] sm:$0x1f] %v12527_v38  ;;  %v12556_v0 = vld [vmem:[#allocation13_spill] sm:$0xff]  ;;  %v12558_v13 = vld [vmem:[#allocation35_spill] sm:$0xff]  ;;  %v4270_v38 = vpop.f32.mrf.mxu0 }
 0x1d6   : > { %4516 = vmatmul.bf16.vlgmr.msrb.gmra.mxu3 %v12515_v52  ;;  %vm6729_vm3 = vmpackc.low %vm942_vm5, %vm926_vm9  ;;  %vm1103_vm0 = vcmp.eq.s32.totalorder %v7836_v55, %v9067_v8  ;;  %vm894_vm6 = vcmp.eq.s32.totalorder %v12474_v3, %v8831_v23  ;;  %vm910_vm9 = vcmp.eq.s32.totalorder %v12475_v27, %v8831_v23  ;;  %vm1263_vm5 = vcmp.eq.s32.totalorder %v12460_v34, %v9067_v8 }
 0x1d7   : > { %vm9368_vm14 = vmpackc.low %vm815_vm11, %vm799_vm12  ;;  %5057 = vst [vmem:[#allocation2] sm:$0x1f] %v5041_v29  ;;  %vm1519_vm12 = vcmp.eq.s32.totalorder %v12461_v11, %v9067_v8  ;;  %v12559_v29 = vld [vmem:[#allocation34_spill] sm:$0xff] }
 0x1d8   : > { %6802 = vmatpush.bf16.msk.msra.mxu2 %vm9226_vm2, %v12445_v42  ;;  %vm6717_vm2 = vmpackc.low %vm622_vm4, %vm606_vm13  ;;  %6730 = vmatpush.bf16.msk.msrb.mxu1 %vm6729_vm3, %v12445_v42  ;;  %vm1247_vm4 = vcmp.eq.s32.totalorder %v12459_v33, %v9067_v8  ;;  %vm783_vm3 = vcmp.eq.s32.totalorder %v7927_v41, %v9067_v8 }
 0x1d9   : > { %6818 = vmatpush.bf16.msk.msra.mxu3 %vm9266_vm8, %v12445_v42  ;;  %vm1087_vm8 = vcmp.eq.s32.totalorder %v7838_v56, %v9067_v8  ;;  %6718 = vmatpush.bf16.msk.msrb.mxu0 %vm6717_vm2, %v12445_v42  ;;  %vm6819_vm13 = vmpackc.low %vm1551_vm1, %vm1535_vm7  ;;  %vm1503_vm7 = vcmp.eq.s32.totalorder %v7897_v26, %v9067_v8  ;;  %vm878_vm1 = vcmp.eq.s32.totalorder %v8189_v45, %v8831_v23 }
 0x1da   : > { %vm6731_vm11 = vmpackc.low %vm910_vm9, %vm894_vm6  ;;  %vm862_vm6 = vcmp.eq.s32.totalorder %v8179_v10, %v8831_v23  ;;  %v12562_v23 = vld [vmem:[#allocation46_spill] sm:$0xff] }
 0x1db   : > { %vm6821_vm2 = vmpackc.low %vm1519_vm12, %vm1503_vm7  ;;  %vm1055_vm7 = vcmp.eq.s32.totalorder %v7821_v49, %v9067_v8 }
 0x1dc   : > { %6804 = vmatpush.bf16.msk.msra.mxu2 %vm9321_vm10, %v12445_v42  ;;  %4477 = vmatmul.bf16.vlgmr.msrb.gmra.mxu0 %v8183_v43  ;;  %vm6805_vm10 = vmpackc.low %vm1263_vm5, %vm1247_vm4  ;;  %vm1071_vm5 = vcmp.eq.s32.totalorder %v7894_v24, %v9067_v8 }
 0x1dd   : > { %6768 = vmatpush.bf16.msk.msra.mxu0 %vm9310_vm15, %v12445_v42  ;;  %6820 = vmatpush.bf16.msk.msra.mxu3 %vm6819_vm13, %v12445_v42  ;;  %vm9394_vm15 = vmpackc.low %vm1103_vm0, %vm1087_vm8  ;;  %vm767_vm8 = vcmp.eq.s32.totalorder %v7858_v4, %v9067_v8  ;;  %vm1231_vm0 = vcmp.eq.s32.totalorder %v7977_v53, %v9067_v8  ;;  %vm1471_vm13 = vcmp.eq.s32.totalorder %v12462_v7, %v9067_v8 }
 0x1de   : > { %6732 = vmatpush.bf16.msk.msrb.mxu1 %vm6731_vm11, %v12445_v42  ;;  %vm6771_vm9 = vmpackc.low %vm783_vm3, %vm767_vm8  ;;  %vm1487_vm11 = vcmp.eq.s32.totalorder %v7950_v44, %v9067_v8  ;;  %vm735_vm3 = vcmp.eq.s32.totalorder %v7954_v48, %v9067_v8  ;;  %vm751_vm8 = vcmp.eq.s32.totalorder %v7922_v36, %v9067_v8 }
 0x1df   : > { %vm6733_vm4 = vmpackc.low %vm878_vm1, %vm862_vm6  ;;  %vm1183_vm1 = vcmp.eq.s32.totalorder %v8004_v62, %v9067_v8  ;;  %vm1455_vm6 = vcmp.eq.s32.totalorder %v8020_v5, %v9067_v8 }
 0x1e0   : > { %6806 = vmatpush.bf16.msk.msra.mxu2 %vm6805_vm10, %v12445_v42  ;;  %vm6823_vm10 = vmpackc.low %vm1487_vm11, %vm1471_vm13  ;;  %vm1199_vm13 = vcmp.eq.s32.totalorder %v7989_v57, %v9067_v8  ;;  %vm703_vm11 = vcmp.eq.s32.totalorder %v12558_v13, %v9067_v8 }
 0x1e1   : > { %6770 = vmatpush.bf16.msk.msra.mxu0 %vm9368_vm14, %v12445_v42  ;;  %6822 = vmatpush.bf16.msk.msra.mxu3 %vm6821_vm2, %v12445_v42  ;;  %vm1215_vm14 = vcmp.eq.s32.totalorder %v7939_v1, %v9067_v8  ;;  %vm1360_vm2 = vcmp.eq.s32.totalorder %v7816_v47, %v9424_v58 }
 0x1e2   : > { %6734 = vmatpush.bf16.msk.msrb.mxu1 %vm6733_vm4, %v12445_v42  ;;  %vm6807_vm12 = vmpackc.low %vm1231_vm0, %vm1215_vm14  ;;  %vm1439_vm0 = vcmp.eq.s32.totalorder %v8022_v6, %v9067_v8  ;;  %vm1023_vm4 = vcmp.eq.s32.totalorder %v7925_v39, %v9067_v8  ;;  %vm1600_vm14 = vcmp.eq.s32.totalorder %v7802_v37, %v9424_v58  ;;  %v12569_v37 = vld [vmem:[#allocation17_spill] sm:$0xff] }
 0x1e4   : > { %6808 = vmatpush.bf16.msk.msra.mxu2 %vm6807_vm12, %v12445_v42  ;;  %vm6809_vm12 = vmpackc.low %vm1199_vm13, %vm1183_vm1 }
 0x1e5   : > { %6772 = vmatpush.bf16.msk.msra.mxu0 %vm6771_vm9, %v12445_v42  ;;  %6824 = vmatpush.bf16.msk.msra.mxu3 %vm6823_vm10, %v12445_v42  ;;  %vm6773_vm9 = vmpackc.low %vm751_vm8, %vm735_vm3  ;;  %vm719_vm3 = vcmp.eq.s32.totalorder %v12559_v29, %v9067_v8  ;;  %vm1344_vm10 = vcmp.eq.s32.totalorder %v12560_v59, %v9424_v58  ;;  %vm1151_vm8 = vcmp.eq.s32.totalorder %v8047_v15, %v9067_v8  ;;  %v4309_v59 = vpop.f32.mrf.mxu3 }
 0x1e6   : > { %6784 = vmatpush.bf16.msk.msra.mxu1 %vm9394_vm15, %v12445_v42  ;;  %vm9448_vm15 = vmpackc.low %vm1071_vm5, %vm1055_vm7  ;;  %vm1616_vm5 = vcmp.eq.s32.totalorder %v12556_v0, %v9424_v58  ;;  %v12570_v0 = vld [vmem:[#allocation42_spill] sm:$0xff] }
 0x1e7   : > { %4490 = vmatmul.bf16.vlgmr.msrb.gmra.mxu1 %v12557_v63  ;;  %vm6825_vm7 = vmpackc.low %vm1455_vm6, %vm1439_vm0  ;;  %v12561_v63 = vld [vmem:[#allocation20_spill] sm:$0xff]  ;;  %vm1423_vm0 = vcmp.eq.s32.totalorder %v12562_v23, %v9067_v8  ;;  %v12567_v23 = vld [vmem:[#allocation29_spill] sm:$0xff] }
 0x1e8   : > { %vm1039_vm1 = vcmp.eq.s32.totalorder %v12561_v63, %v9067_v8  ;;  %6810 = vmatpush.bf16.msk.msra.mxu2 %vm6809_vm12, %v12445_v42  ;;  %vm9497_vm6 = vmpackc.low %vm1360_vm2, %vm1344_vm10  ;;  %v12568_v63 = vld [vmem:[#allocation30_spill] sm:$0xff]  ;;  %vm1328_vm10 = vcmp.eq.s32.totalorder %v12569_v37, %v9424_v58 }
 0x1e9   : > { %6774 = vmatpush.bf16.msk.msra.mxu0 %vm6773_vm9, %v12445_v42  ;;  %vm1167_vm9 = vcmp.eq.s32.totalorder %v8045_v12, %v9067_v8  ;;  %6826 = vmatpush.bf16.msk.msra.mxu3 %vm6825_vm7, %v12445_v42  ;;  %vm9507_vm13 = vmpackc.low %vm1616_vm5, %vm1600_vm14  ;;  %v12565_v12 = vmov 0  ;;  %vm1007_vm12 = vcmp.eq.s32.totalorder %v12568_v63, %v9067_v8  ;;  %vm1407_vm5 = vcmp.eq.s32.totalorder %v12570_v0, %v9067_v8  ;;  %v12571_v63 = vld [vmem:[#allocation9_spill] sm:$0xff]  ;;  %v12572_v0 = vld [vmem:[#allocation36_spill] sm:$0xff] }
 0x1ea   : > { %6786 = vmatpush.bf16.msk.msra.mxu1 %vm9448_vm15, %v12445_v42  ;;  %vm6787_vm15 = vmpackc.low %vm1039_vm1, %vm1023_vm4  ;;  %v12566_v12 = vsel %vm9507_vm13, 4294967295, %v12565_v12  ;;  %vm991_vm4 = vcmp.eq.s32.totalorder %v12567_v23, %v9067_v8  ;;  %vm687_vm7 = vcmp.eq.s32.totalorder %v12530_v60, %v9067_v8  ;;  %vm1312_vm1 = vcmp.eq.s32.totalorder %v12571_v63, %v9424_v58  ;;  %v12575_v63 = vld [vmem:[#allocation51_spill] sm:$0xff] }
 0x1eb   : > { %vm6775_vm2 = vmpackc.low %vm719_vm3, %vm703_vm11  ;;  %vm1135_vm3 = vcmp.eq.s32.totalorder %v12498_v50, %v9067_v8  ;;  %v4298_v50 = vpop.f32.mrf.mxu2 }
 0x1ec   : > { %vm6811_vm14 = vmpackc.low %vm1167_vm9, %vm1151_vm8  ;;  %vm671_vm8 = vcmp.eq.s32.totalorder %v12572_v0, %v9067_v8  ;;  %v4283_v0 = vpop.f32.mrf.mxu1  ;;  %v12580_v50 = vld [vmem:[#allocation15_spill] sm:$0xff] }
 0x1ed   : > { %6776 = vmatpush.bf16.msk.msra.mxu0 %vm6775_vm2, %v12445_v42  ;;  %vm6827_vm11 = vmpackc.low %vm1423_vm0, %vm1407_vm5  ;;  %6812 = vmatpush.bf16.msk.msra.mxu2 %vm6811_vm14, %v12445_v42  ;;  %vm1375_vm2 = vcmp.eq.s32.totalorder %v12533_v31, %v9067_v8  ;;  %vm1119_vm0 = vcmp.eq.s32.totalorder %v12536_v51, %v9067_v8  ;;  %vm1568_vm14 = vcmp.eq.s32.totalorder %v12537_v16, %v9424_v58  ;;  %v4272_v31 = vpop.f32.mrf.mxu0  ;;  %v4311_v37 = vpop.f32.mrf.mxu3 }
 0x1ee   : > { %6788 = vmatpush.bf16.msk.msra.mxu1 %vm6787_vm15, %v12445_v42  ;;  %6828 = vmatpush.bf16.msk.msra.mxu3 %vm6827_vm11, %v12445_v42  ;;  %vm6789_vm9 = vmpackc.low %vm1007_vm12, %vm991_vm4  ;;  %vm1391_vm11 = vcmp.eq.s32.totalorder %v12575_v63, %v9067_v8  ;;  %vm975_vm4 = vcmp.eq.s32.totalorder %v12482_v61, %v9067_v8  ;;  %v4284_v51 = vadd.f32 %v4283_v0, %v4270_v38  ;;  %v12576_v31 = vld [vmem:[#allocation31_spill] sm:$0xff]  ;;  %v12596_v63 = vld [vmem:[#allocation44_spill] sm:$0xff] }
 0x1ef   : > { %vm9539_vm13 = vmpackc.low %vm1328_vm10, %vm1312_vm1  ;;  %vm639_vm10 = vcmp.eq.s32.totalorder %v12465_v25, %v9067_v8  ;;  %v12597_v38 = vld [vmem:[#allocation43_spill] sm:$0xff] }
 0x1f0   : > { %vm6777_vm15 = vmpackc.low %vm687_vm7, %vm671_vm8  ;;  %vm1584_vm7 = vcmp.eq.s32.totalorder %v7807_v40, %v9424_v58  ;;  %vm832_vm8 = vcmp.eq.s32.totalorder %v12505_v30, %v9424_v58  ;;  %v4297_v37 = vadd.f32 %v4296_v18, %v4284_v51  ;;  %v9708_v18 = vadd.s32 1024, %v7777_v19  ;;  %v12593_v51 = vld [vmem:[#allocation57_spill] sm:$0xff] }
 0x1f1   : > { %vm6813_vm5 = vmpackc.low %vm1135_vm3, %vm1119_vm0  ;;  %6778 = vmatpush.bf16.msk.msra.mxu0 %vm6777_vm15, %v12445_v42  ;;  %vm959_vm3 = vcmp.eq.s32.totalorder %v12576_v31, %v9067_v8  ;;  %vm655_vm15 = vcmp.eq.s32.totalorder %v12542_v28, %v9067_v8 }
 0x1f2   : > { %6790 = vmatpush.bf16.msk.msra.mxu1 %vm6789_vm9, %v12445_v42  ;;  %vm6829_vm12 = vmpackc.low %vm1391_vm11, %vm1375_vm2  ;;  %6814 = vmatpush.bf16.msk.msra.mxu2 %vm6813_vm5, %v12445_v42  ;;  %vm848_vm9 = vcmp.eq.s32.totalorder %v12506_v17, %v9424_v58  ;;  %vm12579_vm2 = vnez %v12566_v12  ;;  %vm1296_vm11 = vcmp.eq.s32.totalorder %v12580_v50, %v9424_v58  ;;  %v4186_v12 = vld [vmem:[#allocation2 + $0x8] sm:$0x1f]  ;;  %v4310_v15 = vadd.f32 %v4309_v59, %v4297_v37  ;;  %v12591_v37 = vld [vmem:[#allocation10_spill] sm:$0xff] }
 0x1f3   : > { %6830 = vmatpush.bf16.msk.msra.mxu3 %vm6829_vm12, %v12445_v42  ;;  %vm9564_vm1 = vmpackc.low %vm1584_vm7, %vm1568_vm14  ;;  %vm1280_vm14 = vcmp.eq.s32.totalorder %v12543_v9, %v9424_v58  ;;  %vm623_vm12 = vcmp.eq.s32.totalorder %v12544_v46, %v9067_v8  ;;  %vm943_vm7 = vcmp.eq.s32.totalorder %v12512_v22, %v9067_v8 }
 0x1f4   : > { %vm6791_vm0 = vmpackc.low %vm975_vm4, %vm959_vm3  ;;  %vm607_vm4 = vcmp.eq.s32.totalorder %v8136_v32, %v9067_v8  ;;  %v5042_v59 = vadd.f32 %v4310_v15, %v4186_v12  ;;  %v4285_v60 = vpop.f32.mrf.mxu1  ;;  %v12592_v12 = vld [vmem:[#allocation13_spill] sm:$0xff]  ;;  %v12594_v15 = vld [vmem:[#allocation11_spill] sm:$0xff] }
 0x1f5   : > { %vm6779_vm5 = vmpackc.low %vm655_vm15, %vm639_vm10  ;;  %vm816_vm15 = vcmp.eq.s32.totalorder %v12516_v54, %v9424_v58  ;;  %4555 = vmatmul.bf16.vlgmr.msra.gmra.mxu2 %v12487_v14  ;;  %v4322_v0 = vpop.f32.mrf.mxu0  ;;  %v12595_v60 = vld [vmem:[#allocation20_spill] sm:$0xff] }
 0x1f6   : > { %6864 = vmatpush.bf16.msk.msrb.mxu2 %vm9497_vm6, %v12445_v42  ;;  %vm927_vm6 = vcmp.eq.s32.totalorder %v12452_v2, %v9067_v8  ;;  %6780 = vmatpush.bf16.msk.msra.mxu0 %vm6779_vm5, %v12445_v42  ;;  %vm9604_vm10 = vmpackc.low %vm848_vm9, %vm832_vm8  ;;  %vm1536_vm9 = vcmp.eq.s32.totalorder %v12489_v20, %v9424_v58  ;;  %vm895_vm5 = vcmp.eq.s32.totalorder %v12474_v3, %v9067_v8 }
 0x1f7   : > { %6880 = vmatpush.bf16.msk.msrb.mxu3 %vm12579_vm2, %v12445_v42  ;;  %6792 = vmatpush.bf16.msk.msra.mxu1 %vm6791_vm0, %v12445_v42  ;;  %vm9610_vm3 = vmpackc.low %vm1296_vm11, %vm1280_vm14  ;;  %vm800_vm2 = vcmp.eq.s32.totalorder %v12472_v21, %v9424_v58  ;;  %vm1552_vm0 = vcmp.eq.s32.totalorder %v12549_v35, %v9424_v58  ;;  %vm1104_vm14 = vcmp.eq.s32.totalorder %v7836_v55, %v9424_v58 }
 0x1f8   : > { %4568 = vmatmul.bf16.vlgmr.msra.gmra.mxu3 %v12515_v52  ;;  %vm6793_vm8 = vmpackc.low %vm943_vm7, %vm927_vm6  ;;  %vm911_vm6 = vcmp.eq.s32.totalorder %v12475_v27, %v9067_v8  ;;  %5058 = vst [vmem:[#allocation2 + $0x8] sm:$0x1f] %v5042_v59  ;;  %vm1264_vm7 = vcmp.eq.s32.totalorder %v12460_v34, %v9424_v58  ;;  %v4348_v59 = vpop.f32.mrf.mxu2 }
 0x1f9   : > { %vm9655_vm11 = vmpackc.low %vm816_vm15, %vm800_vm2  ;;  %vm1520_vm2 = vcmp.eq.s32.totalorder %v12461_v11, %v9424_v58 }
 0x1fa   : > { %6866 = vmatpush.bf16.msk.msrb.mxu2 %vm9539_vm13, %v12445_v42  ;;  %vm6781_vm13 = vmpackc.low %vm623_vm12, %vm607_vm4  ;;  %vm1248_vm12 = vcmp.eq.s32.totalorder %v12459_v33, %v9424_v58 }
 0x1fb   : > { %6882 = vmatpush.bf16.msk.msrb.mxu3 %vm9564_vm1, %v12445_v42  ;;  %vm1088_vm1 = vcmp.eq.s32.totalorder %v7838_v56, %v9424_v58  ;;  %6782 = vmatpush.bf16.msk.msra.mxu0 %vm6781_vm13, %v12445_v42  ;;  %vm6883_vm4 = vmpackc.low %vm1552_vm0, %vm1536_vm9  ;;  %vm1504_vm9 = vcmp.eq.s32.totalorder %v7897_v26, %v9424_v58  ;;  %vm879_vm0 = vcmp.eq.s32.totalorder %v8189_v45, %v9067_v8 }
 0x1fc   : > { %6794 = vmatpush.bf16.msk.msra.mxu1 %vm6793_vm8, %v12445_v42  ;;  %vm6795_vm15 = vmpackc.low %vm911_vm6, %vm895_vm5  ;;  %vm784_vm8 = vcmp.eq.s32.totalorder %v7927_v41, %v9424_v58  ;;  %vm863_vm5 = vcmp.eq.s32.totalorder %v8179_v10, %v9067_v8  ;;  %v12598_v8 = vld [vmem:[#allocation46_spill] sm:$0xff] }
 0x1fd   : > { %vm6885_vm13 = vmpackc.low %vm1520_vm2, %vm1504_vm9  ;;  %vm1056_vm9 = vcmp.eq.s32.totalorder %v7821_v49, %v9424_v58 }
 0x1fe   : > { %6868 = vmatpush.bf16.msk.msrb.mxu2 %vm9610_vm3, %v12445_v42  ;;  %4529 = vmatmul.bf16.vlgmr.msra.gmra.mxu0 %v8183_v43  ;;  %vm6869_vm3 = vmpackc.low %vm1264_vm7, %vm1248_vm12  ;;  %vm1072_vm7 = vcmp.eq.s32.totalorder %v7894_v24, %v9424_v58 }
 0x1ff   : > { %6832 = vmatpush.bf16.msk.msrb.mxu0 %vm9604_vm10, %v12445_v42  ;;  %6884 = vmatpush.bf16.msk.msrb.mxu3 %vm6883_vm4, %v12445_v42  ;;  %vm9678_vm10 = vmpackc.low %vm1104_vm14, %vm1088_vm1  ;;  %vm768_vm1 = vcmp.eq.s32.totalorder %v7858_v4, %v9424_v58  ;;  %vm1232_vm14 = vcmp.eq.s32.totalorder %v7977_v53, %v9424_v58  ;;  %vm1472_vm4 = vcmp.eq.s32.totalorder %v12462_v7, %v9424_v58 }
 0x200   : > { %6796 = vmatpush.bf16.msk.msra.mxu1 %vm6795_vm15, %v12445_v42  ;;  %vm6835_vm6 = vmpackc.low %vm784_vm8, %vm768_vm1  ;;  %vm1488_vm15 = vcmp.eq.s32.totalorder %v7950_v44, %v9424_v58  ;;  %vm736_vm8 = vcmp.eq.s32.totalorder %v7954_v48, %v9424_v58  ;;  %vm752_vm1 = vcmp.eq.s32.totalorder %v7922_v36, %v9424_v58 }
 0x201   : > { %vm6797_vm12 = vmpackc.low %vm879_vm0, %vm863_vm5  ;;  %vm1184_vm0 = vcmp.eq.s32.totalorder %v8004_v62, %v9424_v58  ;;  %vm1456_vm5 = vcmp.eq.s32.totalorder %v8020_v5, %v9424_v58 }
 0x202   : > { %6870 = vmatpush.bf16.msk.msrb.mxu2 %vm6869_vm3, %v12445_v42  ;;  %vm6887_vm3 = vmpackc.low %vm1488_vm15, %vm1472_vm4  ;;  %vm1200_vm4 = vcmp.eq.s32.totalorder %v7989_v57, %v9424_v58  ;;  %vm704_vm15 = vcmp.eq.s32.totalorder %v12558_v13, %v9424_v58 }
 0x203   : > { %6834 = vmatpush.bf16.msk.msrb.mxu0 %vm9655_vm11, %v12445_v42  ;;  %6886 = vmatpush.bf16.msk.msrb.mxu3 %vm6885_vm13, %v12445_v42  ;;  %vm1216_vm11 = vcmp.eq.s32.totalorder %v7939_v1, %v9424_v58  ;;  %vm1361_vm13 = vcmp.eq.s32.totalorder %v7816_v47, %v9708_v18  ;;  %v12606_v47 = vld [vmem:[#allocation41_spill] sm:$0xff] }
 0x204   : > { %6798 = vmatpush.bf16.msk.msra.mxu1 %vm6797_vm12, %v12445_v42  ;;  %vm6871_vm2 = vmpackc.low %vm1232_vm14, %vm1216_vm11  ;;  %vm1440_vm14 = vcmp.eq.s32.totalorder %v8022_v6, %v9424_v58  ;;  %vm1024_vm12 = vcmp.eq.s32.totalorder %v7925_v39, %v9424_v58  ;;  %vm1601_vm11 = vcmp.eq.s32.totalorder %v12591_v37, %v9708_v18  ;;  %v12604_v37 = vld [vmem:[#allocation17_spill] sm:$0xff] }
 0x206   : > { %6872 = vmatpush.bf16.msk.msrb.mxu2 %vm6871_vm2, %v12445_v42  ;;  %vm6873_vm2 = vmpackc.low %vm1200_vm4, %vm1184_vm0  ;;  %vm1040_vm0 = vcmp.eq.s32.totalorder %v12595_v60, %v9424_v58 }
 0x207   : > { %6836 = vmatpush.bf16.msk.msrb.mxu0 %vm6835_vm6, %v12445_v42  ;;  %6888 = vmatpush.bf16.msk.msrb.mxu3 %vm6887_vm3, %v12445_v42  ;;  %vm6837_vm6 = vmpackc.low %vm752_vm1, %vm736_vm8  ;;  %vm720_vm8 = vcmp.eq.s32.totalorder %v12559_v29, %v9424_v58  ;;  %vm1345_vm3 = vcmp.eq.s32.totalorder %v12594_v15, %v9708_v18  ;;  %vm1152_vm1 = vcmp.eq.s32.totalorder %v12596_v63, %v9424_v58  ;;  %v4361_v15 = vpop.f32.mrf.mxu3  ;;  %v4350_v29 = vpop.f32.mrf.mxu2 }
 0x208   : > { %6848 = vmatpush.bf16.msk.msrb.mxu1 %vm9678_vm10, %v12445_v42  ;;  %vm9732_vm10 = vmpackc.low %vm1072_vm7, %vm1056_vm9  ;;  %vm1617_vm7 = vcmp.eq.s32.totalorder %v12592_v12, %v9708_v18  ;;  %v12605_v12 = vld [vmem:[#allocation42_spill] sm:$0xff]  ;;  %v4187_v29 = vld [vmem:[#allocation2 + $0x10] sm:$0x1f] }
 0x209   : > { %4542 = vmatmul.bf16.vlgmr.msra.gmra.mxu1 %v12593_v51  ;;  %vm6889_vm9 = vmpackc.low %vm1456_vm5, %vm1440_vm14  ;;  %vm1424_vm14 = vcmp.eq.s32.totalorder %v12598_v8, %v9424_v58  ;;  %v12603_v8 = vld [vmem:[#allocation30_spill] sm:$0xff] }
 0x20a   : > { %6874 = vmatpush.bf16.msk.msrb.mxu2 %vm6873_vm2, %v12445_v42  ;;  %vm9781_vm5 = vmpackc.low %vm1361_vm13, %vm1345_vm3  ;;  %vm1008_vm2 = vcmp.eq.s32.totalorder %v12603_v8, %v9424_v58  ;;  %vm1329_vm3 = vcmp.eq.s32.totalorder %v12604_v37, %v9708_v18  ;;  %v12608_v8 = vld [vmem:[#allocation9_spill] sm:$0xff] }
 0x20b   : > { %6838 = vmatpush.bf16.msk.msrb.mxu0 %vm6837_vm6, %v12445_v42  ;;  %vm1168_vm6 = vcmp.eq.s32.totalorder %v12597_v38, %v9424_v58  ;;  %6890 = vmatpush.bf16.msk.msrb.mxu3 %vm6889_vm9, %v12445_v42  ;;  %vm9791_vm4 = vmpackc.low %vm1617_vm7, %vm1601_vm11  ;;  %v12601_v38 = vmov 0  ;;  %vm1408_vm7 = vcmp.eq.s32.totalorder %v12605_v12, %v9424_v58  ;;  %vm688_vm9 = vcmp.eq.s32.totalorder %v12606_v47, %v9424_v58  ;;  %v12609_v12 = vld [vmem:[#allocation36_spill] sm:$0xff]  ;;  %v12610_v47 = vld [vmem:[#allocation53_spill] sm:$0xff] }
 0x20c   : > { %6850 = vmatpush.bf16.msk.msrb.mxu1 %vm9732_vm10, %v12445_v42  ;;  %vm6851_vm10 = vmpackc.low %vm1040_vm0, %vm1024_vm12  ;;  %v12602_v38 = vsel %vm9791_vm4, 4294967295, %v12601_v38  ;;  %vm992_vm12 = vcmp.eq.s32.totalorder %v12567_v23, %v9424_v58  ;;  %v12607_v23 = vld [vmem:[#allocation52_spill] sm:$0xff]  ;;  %vm1313_vm0 = vcmp.eq.s32.totalorder %v12608_v8, %v9708_v18  ;;  %v12614_v8 = vld [vmem:[#allocation51_spill] sm:$0xff] }
 0x20d   : > { %vm6839_vm13 = vmpackc.low %vm720_vm8, %vm704_vm15  ;;  %vm1136_vm8 = vcmp.eq.s32.totalorder %v12607_v23, %v9424_v58  ;;  %v12613_v23 = vld [vmem:[#allocation48_spill] sm:$0xff] }
 0x20e   : > { %vm6875_vm11 = vmpackc.low %vm1168_vm6, %vm1152_vm1  ;;  %vm672_vm1 = vcmp.eq.s32.totalorder %v12609_v12, %v9424_v58  ;;  %v4335_v12 = vpop.f32.mrf.mxu1 }
 0x20f   : > { %6840 = vmatpush.bf16.msk.msrb.mxu0 %vm6839_vm13, %v12445_v42  ;;  %vm6891_vm15 = vmpackc.low %vm1424_vm14, %vm1408_vm7  ;;  %6876 = vmatpush.bf16.msk.msrb.mxu2 %vm6875_vm11, %v12445_v42  ;;  %vm1376_vm13 = vcmp.eq.s32.totalorder %v12610_v47, %v9424_v58  ;;  %vm1120_vm14 = vcmp.eq.s32.totalorder %v12613_v23, %v9424_v58  ;;  %vm1569_vm11 = vcmp.eq.s32.totalorder %v12537_v16, %v9708_v18  ;;  %v4324_v47 = vpop.f32.mrf.mxu0  ;;  %v4363_v13 = vpop.f32.mrf.mxu3 }
 0x210   : > { %6852 = vmatpush.bf16.msk.msrb.mxu1 %vm6851_vm10, %v12445_v42  ;;  %6892 = vmatpush.bf16.msk.msrb.mxu3 %vm6891_vm15, %v12445_v42  ;;  %vm6853_vm6 = vmpackc.low %vm1008_vm2, %vm992_vm12  ;;  %vm1392_vm15 = vcmp.eq.s32.totalorder %v12614_v8, %v9424_v58  ;;  %vm976_vm12 = vcmp.eq.s32.totalorder %v12482_v61, %v9424_v58  ;;  %v4336_v23 = vadd.f32 %v4335_v12, %v4322_v0  ;;  %v12634_v0 = vld [vmem:[#allocation34_spill] sm:$0xff]  ;;  %v12651_v47 = vld [vmem:[#allocation53_spill] sm:$0xff] }
 0x211   : > { %vm9823_vm4 = vmpackc.low %vm1329_vm3, %vm1313_vm0  ;;  %vm640_vm3 = vcmp.eq.s32.totalorder %v12465_v25, %v9424_v58 }
 0x212   : > { %vm6841_vm10 = vmpackc.low %vm688_vm9, %vm672_vm1  ;;  %vm1585_vm9 = vcmp.eq.s32.totalorder %v7807_v40, %v9708_v18  ;;  %vm833_vm1 = vcmp.eq.s32.totalorder %v12505_v30, %v9708_v18  ;;  %v4349_v13 = vadd.f32 %v4348_v59, %v4336_v23  ;;  %v12632_v23 = vld [vmem:[#allocation13_spill] sm:$0xff]  ;;  %v12636_v59 = vld [vmem:[#allocation43_spill] sm:$0xff] }
 0x213   : > { %vm6877_vm7 = vmpackc.low %vm1136_vm8, %vm1120_vm14  ;;  %6842 = vmatpush.bf16.msk.msrb.mxu0 %vm6841_vm10, %v12445_v42  ;;  %vm960_vm8 = vcmp.eq.s32.totalorder %v12576_v31, %v9424_v58  ;;  %vm656_vm10 = vcmp.eq.s32.totalorder %v12542_v28, %v9424_v58  ;;  %v4400_v63 = vpop.f32.mrf.mxu2 }
 0x214   : > { %6854 = vmatpush.bf16.msk.msrb.mxu1 %vm6853_vm6, %v12445_v42  ;;  %vm6893_vm2 = vmpackc.low %vm1392_vm15, %vm1376_vm13  ;;  %6878 = vmatpush.bf16.msk.msrb.mxu2 %vm6877_vm7, %v12445_v42  ;;  %vm849_vm6 = vcmp.eq.s32.totalorder %v12506_v17, %v9708_v18  ;;  %vm12617_vm13 = vnez %v12602_v38  ;;  %vm1297_vm15 = vcmp.eq.s32.totalorder %v12580_v50, %v9708_v18  ;;  %v4362_v12 = vadd.f32 %v4361_v15, %v4349_v13  ;;  %v12630_v13 = vld [vmem:[#allocation14_spill] sm:$0xff] }
 0x215   : > { %6894 = vmatpush.bf16.msk.msrb.mxu3 %vm6893_vm2, %v12445_v42  ;;  %vm9848_vm0 = vmpackc.low %vm1585_vm9, %vm1569_vm11  ;;  %vm1281_vm11 = vcmp.eq.s32.totalorder %v12543_v9, %v9708_v18  ;;  %vm624_vm2 = vcmp.eq.s32.totalorder %v12544_v46, %v9424_v58  ;;  %vm944_vm9 = vcmp.eq.s32.totalorder %v12512_v22, %v9424_v58  ;;  %v12638_v38 = vld [vmem:[#allocation46_spill] sm:$0xff] }
 0x216   : > { %vm6855_vm14 = vmpackc.low %vm976_vm12, %vm960_vm8  ;;  %vm608_vm12 = vcmp.eq.s32.totalorder %v8136_v32, %v9424_v58  ;;  %v5043_v15 = vadd.f32 %v4362_v12, %v4187_v29  ;;  %v4337_v37 = vpop.f32.mrf.mxu1  ;;  %v12631_v29 = vld [vmem:[#allocation10_spill] sm:$0xff]  ;;  %v12633_v12 = vld [vmem:[#allocation35_spill] sm:$0xff] }
 0x217   : > { %vm6843_vm7 = vmpackc.low %vm656_vm10, %vm640_vm3  ;;  %vm817_vm10 = vcmp.eq.s32.totalorder %v12516_v54, %v9708_v18  ;;  %4607 = vmatmul.bf16.vlgmr.msrb.gmra.mxu2 %v12487_v14  ;;  %v12635_v37 = vld [vmem:[#allocation44_spill] sm:$0xff] }
 0x218   : > { %6928 = vmatpush.bf16.msk.msra.mxu2 %vm9781_vm5, %v12445_v42  ;;  %vm928_vm5 = vcmp.eq.s32.totalorder %v12452_v2, %v9424_v58  ;;  %6844 = vmatpush.bf16.msk.msrb.mxu0 %vm6843_vm7, %v12445_v42  ;;  %vm9888_vm3 = vmpackc.low %vm849_vm6, %vm833_vm1  ;;  %vm1537_vm6 = vcmp.eq.s32.totalorder %v12489_v20, %v9708_v18  ;;  %vm896_vm7 = vcmp.eq.s32.totalorder %v12474_v3, %v9424_v58 }
 0x219   : > { %6944 = vmatpush.bf16.msk.msra.mxu3 %vm12617_vm13, %v12445_v42  ;;  %6856 = vmatpush.bf16.msk.msrb.mxu1 %vm6855_vm14, %v12445_v42  ;;  %vm9894_vm8 = vmpackc.low %vm1297_vm15, %vm1281_vm11  ;;  %vm801_vm13 = vcmp.eq.s32.totalorder %v12472_v21, %v9708_v18  ;;  %vm1553_vm14 = vcmp.eq.s32.totalorder %v12549_v35, %v9708_v18  ;;  %vm1105_vm11 = vcmp.eq.s32.totalorder %v7836_v55, %v9708_v18 }
 0x21a   : > { %4620 = vmatmul.bf16.vlgmr.msrb.gmra.mxu3 %v12515_v52  ;;  %vm6857_vm1 = vmpackc.low %vm944_vm9, %vm928_vm5  ;;  %vm912_vm5 = vcmp.eq.s32.totalorder %v12475_v27, %v9424_v58  ;;  %5059 = vst [vmem:[#allocation2 + $0x10] sm:$0x1f] %v5043_v15  ;;  %vm1265_vm9 = vcmp.eq.s32.totalorder %v12460_v34, %v9708_v18  ;;  %v4374_v15 = vpop.f32.mrf.mxu0 }
 0x21b   : > { %vm9939_vm15 = vmpackc.low %vm817_vm10, %vm801_vm13  ;;  %vm1521_vm13 = vcmp.eq.s32.totalorder %v12461_v11, %v9708_v18 }
 0x21c   : > { %6930 = vmatpush.bf16.msk.msra.mxu2 %vm9823_vm4, %v12445_v42  ;;  %vm6845_vm4 = vmpackc.low %vm624_vm2, %vm608_vm12  ;;  %vm1249_vm2 = vcmp.eq.s32.totalorder %v12459_v33, %v9708_v18 }
 0x21d   : > { %6946 = vmatpush.bf16.msk.msra.mxu3 %vm9848_vm0, %v12445_v42  ;;  %vm1089_vm0 = vcmp.eq.s32.totalorder %v7838_v56, %v9708_v18  ;;  %6846 = vmatpush.bf16.msk.msrb.mxu0 %vm6845_vm4, %v12445_v42  ;;  %vm6947_vm12 = vmpackc.low %vm1553_vm14, %vm1537_vm6  ;;  %vm785_vm6 = vcmp.eq.s32.totalorder %v7927_v41, %v9708_v18  ;;  %vm1505_vm4 = vcmp.eq.s32.totalorder %v7897_v26, %v9708_v18 }
 0x21e   : > { %6858 = vmatpush.bf16.msk.msrb.mxu1 %vm6857_vm1, %v12445_v42  ;;  %vm1073_vm1 = vcmp.eq.s32.totalorder %v7894_v24, %v9708_v18  ;;  %vm6859_vm10 = vmpackc.low %vm912_vm5, %vm896_vm7  ;;  %vm769_vm5 = vcmp.eq.s32.totalorder %v7858_v4, %v9708_v18 }
 0x21f   : > { %vm6933_vm14 = vmpackc.low %vm1265_vm9, %vm1249_vm2  ;;  %vm864_vm2 = vcmp.eq.s32.totalorder %v8179_v10, %v9424_v58 }
 0x220   : > { %6932 = vmatpush.bf16.msk.msra.mxu2 %vm9894_vm8, %v12445_v42  ;;  %4581 = vmatmul.bf16.vlgmr.msrb.gmra.mxu0 %v8183_v43  ;;  %vm1057_vm8 = vcmp.eq.s32.totalorder %v7821_v49, %v9708_v18  ;;  %vm6949_vm7 = vmpackc.low %vm1521_vm13, %vm1505_vm4  ;;  %vm1217_vm13 = vcmp.eq.s32.totalorder %v7939_v1, %v9708_v18  ;;  %vm737_vm4 = vcmp.eq.s32.totalorder %v7954_v48, %v9708_v18 }
 0x221   : > { %6896 = vmatpush.bf16.msk.msra.mxu0 %vm9888_vm3, %v12445_v42  ;;  %6948 = vmatpush.bf16.msk.msra.mxu3 %vm6947_vm12, %v12445_v42  ;;  %vm9964_vm3 = vmpackc.low %vm1105_vm11, %vm1089_vm0  ;;  %vm880_vm0 = vcmp.eq.s32.totalorder %v8189_v45, %v9424_v58  ;;  %vm1233_vm12 = vcmp.eq.s32.totalorder %v7977_v53, %v9708_v18  ;;  %v10016_v58 = vadd.s32 1152, %v7777_v19 }
 0x222   : > { %6860 = vmatpush.bf16.msk.msrb.mxu1 %vm6859_vm10, %v12445_v42  ;;  %vm9978_vm11 = vmpackc.low %vm1073_vm1, %vm1057_vm8  ;;  %vm1025_vm10 = vcmp.eq.s32.totalorder %v7925_v39, %v9708_v18 }
 0x223   : > { %vm6899_vm9 = vmpackc.low %vm785_vm6, %vm769_vm5  ;;  %vm753_vm5 = vcmp.eq.s32.totalorder %v7922_v36, %v9708_v18 }
 0x224   : > { %6934 = vmatpush.bf16.msk.msra.mxu2 %vm6933_vm14, %v12445_v42  ;;  %vm6861_vm1 = vmpackc.low %vm880_vm0, %vm864_vm2  ;;  %vm1489_vm14 = vcmp.eq.s32.totalorder %v7950_v44, %v9708_v18  ;;  %vm1185_vm0 = vcmp.eq.s32.totalorder %v8004_v62, %v9708_v18 }
 0x225   : > { %6898 = vmatpush.bf16.msk.msra.mxu0 %vm9939_vm15, %v12445_v42  ;;  %6950 = vmatpush.bf16.msk.msra.mxu3 %vm6949_vm7, %v12445_v42  ;;  %vm1473_vm15 = vcmp.eq.s32.totalorder %v12462_v7, %v9708_v18  ;;  %vm6935_vm8 = vmpackc.low %vm1233_vm12, %vm1217_vm13  ;;  %vm1041_vm7 = vcmp.eq.s32.totalorder %v12595_v60, %v9708_v18  ;;  %vm1457_vm12 = vcmp.eq.s32.totalorder %v8020_v5, %v9708_v18 }
 0x226   : > { %6862 = vmatpush.bf16.msk.msrb.mxu1 %vm6861_vm1, %v12445_v42  ;;  %vm6951_vm6 = vmpackc.low %vm1489_vm14, %vm1473_vm15  ;;  %vm1201_vm15 = vcmp.eq.s32.totalorder %v7989_v57, %v9708_v18  ;;  %vm1362_vm1 = vcmp.eq.s32.totalorder %v12630_v13, %v10016_v58  ;;  %vm1602_vm13 = vcmp.eq.s32.totalorder %v12631_v29, %v10016_v58  ;;  %vm705_vm14 = vcmp.eq.s32.totalorder %v12633_v12, %v9708_v18  ;;  %v4413_v57 = vpop.f32.mrf.mxu3  ;;  %v12645_v29 = vld [vmem:[#allocation17_spill] sm:$0xff]  ;;  %v12646_v12 = vld [vmem:[#allocation42_spill] sm:$0xff] }
 0x227   : > { %vm10029_vm2 = vmpackc.low %vm1041_vm7, %vm1025_vm10  ;;  %vm1169_vm7 = vcmp.eq.s32.totalorder %v12636_v59, %v9708_v18  ;;  %v12644_v59 = vld [vmem:[#allocation30_spill] sm:$0xff]  ;;  %v12649_v13 = vld [vmem:[#allocation9_spill] sm:$0xff] }
 0x228   : > { %6936 = vmatpush.bf16.msk.msra.mxu2 %vm6935_vm8, %v12445_v42  ;;  %vm1618_vm8 = vcmp.eq.s32.totalorder %v12632_v23, %v10016_v58  ;;  %vm6937_vm10 = vmpackc.low %vm1201_vm15, %vm1185_vm0  ;;  %vm1153_vm0 = vcmp.eq.s32.totalorder %v12635_v37, %v9708_v18  ;;  %v12648_v23 = vld [vmem:[#allocation52_spill] sm:$0xff] }
 0x229   : > { %6900 = vmatpush.bf16.msk.msra.mxu0 %vm6899_vm9, %v12445_v42  ;;  %6952 = vmatpush.bf16.msk.msra.mxu3 %vm6951_vm6, %v12445_v42  ;;  %vm6901_vm9 = vmpackc.low %vm753_vm5, %vm737_vm4  ;;  %vm721_vm4 = vcmp.eq.s32.totalorder %v12634_v0, %v9708_v18  ;;  %v12647_v0 = vld [vmem:[#allocation41_spill] sm:$0xff] }
 0x22a   : > { %6912 = vmatpush.bf16.msk.msra.mxu1 %vm9964_vm3, %v12445_v42  ;;  %vm1441_vm3 = vcmp.eq.s32.totalorder %v8022_v6, %v9708_v18 }
 0x22b   : > { %4594 = vmatmul.bf16.vlgmr.msrb.gmra.mxu1 %v12593_v51  ;;  %vm6953_vm6 = vmpackc.low %vm1457_vm12, %vm1441_vm3  ;;  %v12637_v51 = vld [vmem:[#allocation11_spill] sm:$0xff] }
 0x22c   : > { %vm1346_vm5 = vcmp.eq.s32.totalorder %v12637_v51, %v10016_v58  ;;  %6938 = vmatpush.bf16.msk.msra.mxu2 %vm6937_vm10, %v12445_v42  ;;  %vm10079_vm12 = vmpackc.low %vm1618_vm8, %vm1602_vm13  ;;  %vm1330_vm10 = vcmp.eq.s32.totalorder %v12645_v29, %v10016_v58  ;;  %vm1314_vm13 = vcmp.eq.s32.totalorder %v12649_v13, %v10016_v58  ;;  %v12657_v13 = vld [vmem:[#allocation48_spill] sm:$0xff]  ;;  %v12677_v51 = vld [vmem:[#allocation10_spill] sm:$0xff] }
 0x22d   : > { %6902 = vmatpush.bf16.msk.msra.mxu0 %vm6901_vm9, %v12445_v42  ;;  %6954 = vmatpush.bf16.msk.msra.mxu3 %vm6953_vm6, %v12445_v42  ;;  %vm10069_vm3 = vmpackc.low %vm1362_vm1, %vm1346_vm5  ;;  %vm1009_vm1 = vcmp.eq.s32.totalorder %v12644_v59, %v9708_v18  ;;  %vm1409_vm6 = vcmp.eq.s32.totalorder %v12646_v12, %v9708_v18  ;;  %vm1137_vm5 = vcmp.eq.s32.totalorder %v12648_v23, %v9708_v18  ;;  %v4387_v12 = vpop.f32.mrf.mxu1 }
 0x22e   : > { %6914 = vmatpush.bf16.msk.msra.mxu1 %vm9978_vm11, %v12445_v42  ;;  %vm1425_vm11 = vcmp.eq.s32.totalorder %v12638_v38, %v9708_v18  ;;  %vm6903_vm9 = vmpackc.low %vm721_vm4, %vm705_vm14  ;;  %v12643_v38 = vld [vmem:[#allocation29_spill] sm:$0xff]  ;;  %vm689_vm14 = vcmp.eq.s32.totalorder %v12647_v0, %v9708_v18  ;;  %v12650_v0 = vld [vmem:[#allocation36_spill] sm:$0xff]  ;;  %v4388_v29 = vadd.f32 %v4387_v12, %v4374_v15  ;;  %v4415_v23 = vpop.f32.mrf.mxu3 }
 0x22f   : > { %vm993_vm15 = vcmp.eq.s32.totalorder %v12643_v38, %v9708_v18  ;;  %vm6939_vm8 = vmpackc.low %vm1169_vm7, %vm1153_vm0  ;;  %vm1586_vm0 = vcmp.eq.s32.totalorder %v7807_v40, %v10016_v58  ;;  %vm673_vm7 = vcmp.eq.s32.totalorder %v12650_v0, %v9708_v18  ;;  %v4188_v23 = vld [vmem:[#allocation2 + $0x18] sm:$0x1f] }
 0x230   : > { %vm6955_vm4 = vmpackc.low %vm1425_vm11, %vm1409_vm6  ;;  %6940 = vmatpush.bf16.msk.msra.mxu2 %vm6939_vm8, %v12445_v42  ;;  %vm1377_vm11 = vcmp.eq.s32.totalorder %v12651_v47, %v9708_v18  ;;  %vm12654_vm8 = vcmp.eq.s32.totalorder %v12537_v16, %v10016_v58  ;;  %v4376_v16 = vpop.f32.mrf.mxu0  ;;  %v12681_v12 = vld [vmem:[#allocation34_spill] sm:$0xff] }
 0x231   : > { %6904 = vmatpush.bf16.msk.msra.mxu0 %vm6903_vm9, %v12445_v42  ;;  %6956 = vmatpush.bf16.msk.msra.mxu3 %vm6955_vm4, %v12445_v42  ;;  %vm10129_vm9 = vmpackc.low %vm1330_vm10, %vm1314_vm13  ;;  %vm850_vm10 = vcmp.eq.s32.totalorder %v12506_v17, %v10016_v58  ;;  %v12672_v16 = vld [vmem:[#allocation39_spill] sm:$0xff] }
 0x232   : > { %6916 = vmatpush.bf16.msk.msra.mxu1 %vm10029_vm2, %v12445_v42  ;;  %vm6917_vm2 = vmpackc.low %vm1009_vm1, %vm993_vm15  ;;  %vm1121_vm15 = vcmp.eq.s32.totalorder %v12657_v13, %v9708_v18  ;;  %vm834_vm1 = vcmp.eq.s32.totalorder %v12505_v30, %v10016_v58  ;;  %v4402_v13 = vpop.f32.mrf.mxu2 }
 0x233   : > { %vm10136_vm6 = vmpackc.low %vm1586_vm0, %vm12654_vm8  ;;  %vm1393_vm0 = vcmp.eq.s32.totalorder %v12614_v8, %v9708_v18  ;;  %vm641_vm8 = vcmp.eq.s32.totalorder %v12465_v25, %v9708_v18  ;;  %v4401_v13 = vadd.f32 %v4400_v63, %v4388_v29  ;;  %v12684_v63 = vld [vmem:[#allocation46_spill] sm:$0xff] }
 0x234   : > { %vm6905_vm4 = vmpackc.low %vm689_vm14, %vm673_vm7  ;;  %vm977_vm14 = vcmp.eq.s32.totalorder %v12482_v61, %v9708_v18 }
 0x235   : > { %vm6941_vm13 = vmpackc.low %vm1137_vm5, %vm1121_vm15  ;;  %6906 = vmatpush.bf16.msk.msra.mxu0 %vm6905_vm4, %v12445_v42  ;;  %vm961_vm5 = vcmp.eq.s32.totalorder %v12576_v31, %v9708_v18  ;;  %vm1538_vm4 = vcmp.eq.s32.totalorder %v12489_v20, %v10016_v58  ;;  %vm657_vm15 = vcmp.eq.s32.totalorder %v12542_v28, %v9708_v18  ;;  %v4414_v5 = vadd.f32 %v4413_v57, %v4401_v13  ;;  %v4389_v40 = vpop.f32.mrf.mxu1  ;;  %v12678_v57 = vld [vmem:[#allocation13_spill] sm:$0xff]  ;;  %v12723_v13 = vld [vmem:[#allocation46_spill] sm:$0xff] }
 0x236   : > { %6918 = vmatpush.bf16.msk.msra.mxu1 %vm6917_vm2, %v12445_v42  ;;  %vm6957_vm7 = vmpackc.low %vm1393_vm0, %vm1377_vm11  ;;  %6942 = vmatpush.bf16.msk.msra.mxu2 %vm6941_vm13, %v12445_v42  ;;  %vm1282_vm11 = vcmp.eq.s32.totalorder %v12543_v9, %v10016_v58  ;;  %vm609_vm0 = vcmp.eq.s32.totalorder %v8136_v32, %v9708_v18  ;;  %v12680_v40 = vld [vmem:[#allocation35_spill] sm:$0xff] }
 0x237   : > { %6958 = vmatpush.bf16.msk.msra.mxu3 %vm6957_vm7, %v12445_v42  ;;  %vm10170_vm2 = vmpackc.low %vm850_vm10, %vm834_vm1  ;;  %vm1554_vm10 = vcmp.eq.s32.totalorder %v12549_v35, %v10016_v58  ;;  %v5044_v29 = vadd.f32 %v4414_v5, %v4188_v23  ;;  %v12675_v23 = vld [vmem:[#allocation33_spill] sm:$0xff]  ;;  %v12676_v5 = vld [vmem:[#allocation14_spill] sm:$0xff] }
 0x238   : > { %vm6919_vm1 = vmpackc.low %vm977_vm14, %vm961_vm5  ;;  %vm625_vm14 = vcmp.eq.s32.totalorder %v12544_v46, %v9708_v18  ;;  %v4426_v0 = vpop.f32.mrf.mxu0 }
 0x239   : > { %vm6907_vm13 = vmpackc.low %vm657_vm15, %vm641_vm8  ;;  %vm945_vm8 = vcmp.eq.s32.totalorder %v12512_v22, %v9708_v18  ;;  %vm802_vm15 = vcmp.eq.s32.totalorder %v12472_v21, %v10016_v58  ;;  %4659 = vmatmul.bf16.vlgmr.msra.gmra.mxu2 %v12487_v14  ;;  %5060 = vst [vmem:[#allocation2 + $0x18] sm:$0x1f] %v5044_v29  ;;  %v12679_v29 = vld [vmem:[#allocation57_spill] sm:$0xff] }
 0x23a   : > { %6992 = vmatpush.bf16.msk.msrb.mxu2 %vm10069_vm3, %v12445_v42  ;;  %vm929_vm3 = vcmp.eq.s32.totalorder %v12452_v2, %v9708_v18  ;;  %6908 = vmatpush.bf16.msk.msra.mxu0 %vm6907_vm13, %v12445_v42  ;;  %vm10216_vm5 = vmpackc.low %vm1554_vm10, %vm1538_vm4  ;;  %vm786_vm4 = vcmp.eq.s32.totalorder %v7927_v41, %v10016_v58  ;;  %vm1090_vm13 = vcmp.eq.s32.totalorder %v7838_v56, %v10016_v58  ;;  %v4452_v15 = vpop.f32.mrf.mxu2 }
 0x23b   : > { %7008 = vmatpush.bf16.msk.msrb.mxu3 %vm10079_vm12, %v12445_v42  ;;  %vm1298_vm12 = vcmp.eq.s32.totalorder %v12580_v50, %v10016_v58  ;;  %6920 = vmatpush.bf16.msk.msra.mxu1 %vm6919_vm1, %v12445_v42  ;;  %vm818_vm1 = vcmp.eq.s32.totalorder %v12516_v54, %v10016_v58  ;;  %vm6909_vm10 = vmpackc.low %vm625_vm14, %vm609_vm0  ;;  %vm770_vm0 = vcmp.eq.s32.totalorder %v7858_v4, %v10016_v58 }
 0x23c   : > { %vm10207_vm7 = vmpackc.low %vm1298_vm12, %vm1282_vm11  ;;  %4672 = vmatmul.bf16.vlgmr.msra.gmra.mxu3 %v12515_v52  ;;  %vm1106_vm12 = vcmp.eq.s32.totalorder %v7836_v55, %v10016_v58  ;;  %vm1250_vm14 = vcmp.eq.s32.totalorder %v12459_v33, %v10016_v58 }
 0x23d   : > { %vm6921_vm11 = vmpackc.low %vm945_vm8, %vm929_vm3  ;;  %vm1266_vm8 = vcmp.eq.s32.totalorder %v12460_v34, %v10016_v58 }
 0x23e   : > { %6994 = vmatpush.bf16.msk.msrb.mxu2 %vm10129_vm9, %v12445_v42  ;;  %6910 = vmatpush.bf16.msk.msra.mxu0 %vm6909_vm10, %v12445_v42  ;;  %vm897_vm9 = vcmp.eq.s32.totalorder %v12474_v3, %v9708_v18  ;;  %vm10253_vm3 = vmpackc.low %vm818_vm1, %vm802_vm15  ;;  %vm881_vm10 = vcmp.eq.s32.totalorder %v8189_v45, %v9708_v18 }
 0x23f   : > { %7010 = vmatpush.bf16.msk.msrb.mxu3 %vm10136_vm6, %v12445_v42  ;;  %6922 = vmatpush.bf16.msk.msra.mxu1 %vm6921_vm11, %v12445_v42  ;;  %vm913_vm6 = vcmp.eq.s32.totalorder %v12475_v27, %v9708_v18  ;;  %vm10269_vm15 = vmpackc.low %vm786_vm4, %vm770_vm0  ;;  %vm1506_vm4 = vcmp.eq.s32.totalorder %v7897_v26, %v10016_v58  ;;  %vm1474_vm0 = vcmp.eq.s32.totalorder %v12462_v7, %v10016_v58 }
 0x240   : > { %vm10287_vm1 = vmpackc.low %vm1106_vm12, %vm1090_vm13  ;;  %vm1234_vm12 = vcmp.eq.s32.totalorder %v7977_v53, %v10016_v58 }
 0x241   : > { %vm6923_vm11 = vmpackc.low %vm913_vm6, %vm897_vm9  ;;  %4633 = vmatmul.bf16.vlgmr.msra.gmra.mxu0 %v8183_v43  ;;  %vm1058_vm9 = vcmp.eq.s32.totalorder %v7821_v49, %v10016_v58  ;;  %vm865_vm6 = vcmp.eq.s32.totalorder %v8179_v10, %v9708_v18  ;;  %v10336_v18 = vadd.s32 1280, %v7777_v19 }
 0x242   : > { %6960 = vmatpush.bf16.msk.msrb.mxu0 %vm10170_vm2, %v12445_v42  ;;  %6996 = vmatpush.bf16.msk.msrb.mxu2 %vm10207_vm7, %v12445_v42  ;;  %vm1522_vm2 = vcmp.eq.s32.totalorder %v12461_v11, %v10016_v58  ;;  %vm1074_vm7 = vcmp.eq.s32.totalorder %v7894_v24, %v10016_v58 }
 0x243   : > { %7012 = vmatpush.bf16.msk.msrb.mxu3 %vm10216_vm5, %v12445_v42  ;;  %6924 = vmatpush.bf16.msk.msra.mxu1 %vm6923_vm11, %v12445_v42  ;;  %vm6997_vm5 = vmpackc.low %vm1266_vm8, %vm1250_vm14  ;;  %vm1218_vm8 = vcmp.eq.s32.totalorder %v7939_v1, %v10016_v58 }
 0x244   : > { %vm7013_vm13 = vmpackc.low %vm1522_vm2, %vm1506_vm4  ;;  %vm1026_vm2 = vcmp.eq.s32.totalorder %v7925_v39, %v10016_v58  ;;  %vm738_vm4 = vcmp.eq.s32.totalorder %v7954_v48, %v10016_v58 }
 0x245   : > { %vm10312_vm14 = vmpackc.low %vm1074_vm7, %vm1058_vm9 }
 0x246   : > { %6962 = vmatpush.bf16.msk.msrb.mxu0 %vm10253_vm3, %v12445_v42  ;;  %6998 = vmatpush.bf16.msk.msrb.mxu2 %vm6997_vm5, %v12445_v42  ;;  %vm6925_vm3 = vmpackc.low %vm881_vm10, %vm865_vm6  ;;  %vm1490_vm5 = vcmp.eq.s32.totalorder %v7950_v44, %v10016_v58  ;;  %vm1186_vm10 = vcmp.eq.s32.totalorder %v8004_v62, %v10016_v58 }
 0x247   : > { %7014 = vmatpush.bf16.msk.msrb.mxu3 %vm7013_vm13, %v12445_v42  ;;  %6926 = vmatpush.bf16.msk.msra.mxu1 %vm6925_vm3, %v12445_v42  ;;  %vm6999_vm11 = vmpackc.low %vm1234_vm12, %vm1218_vm8  ;;  %vm1042_vm13 = vcmp.eq.s32.totalorder %v12595_v60, %v10016_v58  ;;  %vm1458_vm12 = vcmp.eq.s32.totalorder %v12672_v16, %v10016_v58  ;;  %vm1363_vm3 = vcmp.eq.s32.totalorder %v12676_v5, %v10336_v18  ;;  %v4189_v16 = vld [vmem:[#allocation2 + $0x20] sm:$0x1f] }
 0x248   : > { %vm7015_vm7 = vmpackc.low %vm1490_vm5, %vm1474_vm0  ;;  %vm1202_vm0 = vcmp.eq.s32.totalorder %v12675_v23, %v10016_v58  ;;  %vm1603_vm8 = vcmp.eq.s32.totalorder %v12677_v51, %v10336_v18  ;;  %vm706_vm5 = vcmp.eq.s32.totalorder %v12680_v40, %v10016_v58  ;;  %v12683_v23 = vld [vmem:[#allocation11_spill] sm:$0xff] }
 0x249   : > { %vm10349_vm9 = vmpackc.low %vm1042_vm13, %vm1026_vm2 }
 0x24a   : > { %6964 = vmatpush.bf16.msk.msrb.mxu0 %vm10269_vm15, %v12445_v42  ;;  %7000 = vmatpush.bf16.msk.msrb.mxu2 %vm6999_vm11, %v12445_v42  ;;  %vm754_vm15 = vcmp.eq.s32.totalorder %v7922_v36, %v10016_v58  ;;  %vm1619_vm11 = vcmp.eq.s32.totalorder %v12678_v57, %v10336_v18  ;;  %vm7001_vm2 = vmpackc.low %vm1202_vm0, %vm1186_vm10  ;;  %vm1154_vm10 = vcmp.eq.s32.totalorder %v12635_v37, %v10016_v58  ;;  %v4465_v36 = vpop.f32.mrf.mxu3  ;;  %v12691_v37 = vld [vmem:[#allocation41_spill] sm:$0xff] }
 0x24b   : > { %6976 = vmatpush.bf16.msk.msrb.mxu1 %vm10287_vm1, %v12445_v42  ;;  %7016 = vmatpush.bf16.msk.msrb.mxu3 %vm7015_vm7, %v12445_v42  ;;  %vm1442_vm1 = vcmp.eq.s32.totalorder %v8022_v6, %v10016_v58  ;;  %vm6965_vm6 = vmpackc.low %vm754_vm15, %vm738_vm4  ;;  %vm722_vm4 = vcmp.eq.s32.totalorder %v12681_v12, %v10016_v58  ;;  %vm1347_vm15 = vcmp.eq.s32.totalorder %v12683_v23, %v10336_v18  ;;  %v12687_v23 = vmov 0 }
 0x24c   : > { %4646 = vmatmul.bf16.vlgmr.msra.gmra.mxu1 %v12679_v29  ;;  %vm7017_vm7 = vmpackc.low %vm1458_vm12, %vm1442_vm1  ;;  %v12682_v29 = vld [vmem:[#allocation43_spill] sm:$0xff]  ;;  %vm994_vm0 = vcmp.eq.s32.totalorder %v12643_v38, %v10016_v58  ;;  %v12692_v38 = vld [vmem:[#allocation52_spill] sm:$0xff] }
 0x24d   : > { %vm1170_vm13 = vcmp.eq.s32.totalorder %v12682_v29, %v10016_v58  ;;  %vm10392_vm1 = vmpackc.low %vm1363_vm3, %vm1347_vm15  ;;  %vm1010_vm3 = vcmp.eq.s32.totalorder %v12644_v59, %v10016_v58  ;;  %v12690_v29 = vld [vmem:[#allocation42_spill] sm:$0xff]  ;;  %v12693_v59 = vld [vmem:[#allocation9_spill] sm:$0xff] }
 0x24e   : > { %6966 = vmatpush.bf16.msk.msrb.mxu0 %vm6965_vm6, %v12445_v42  ;;  %7002 = vmatpush.bf16.msk.msrb.mxu2 %vm7001_vm2, %v12445_v42  ;;  %vm10402_vm12 = vmpackc.low %vm1619_vm11, %vm1603_vm8  ;;  %vm1410_vm11 = vcmp.eq.s32.totalorder %v12690_v29, %v10016_v58  ;;  %vm1315_vm15 = vcmp.eq.s32.totalorder %v12693_v59, %v10336_v18  ;;  %v12694_v29 = vld [vmem:[#allocation36_spill] sm:$0xff] }
 0x24f   : > { %6978 = vmatpush.bf16.msk.msrb.mxu1 %vm10312_vm14, %v12445_v42  ;;  %7018 = vmatpush.bf16.msk.msrb.mxu3 %vm7017_vm7, %v12445_v42  ;;  %vm1426_vm14 = vcmp.eq.s32.totalorder %v12684_v63, %v10016_v58  ;;  %v12688_v23 = vsel %vm10402_vm12, 4294967295, %v12687_v23  ;;  %vm6967_vm6 = vmpackc.low %vm722_vm4, %vm706_vm5  ;;  %v12689_v63 = vld [vmem:[#allocation17_spill] sm:$0xff]  ;;  %vm690_vm7 = vcmp.eq.s32.totalorder %v12691_v37, %v10016_v58  ;;  %vm1138_vm4 = vcmp.eq.s32.totalorder %v12692_v38, %v10016_v58  ;;  %v12697_v38 = vld [vmem:[#allocation48_spill] sm:$0xff] }
 0x250   : > { %vm1331_vm2 = vcmp.eq.s32.totalorder %v12689_v63, %v10336_v18  ;;  %vm7003_vm8 = vmpackc.low %vm1170_vm13, %vm1154_vm10  ;;  %vm674_vm10 = vcmp.eq.s32.totalorder %v12694_v29, %v10016_v58  ;;  %v12698_v59 = vld [vmem:[#allocation16_spill] sm:$0xff]  ;;  %v4439_v29 = vpop.f32.mrf.mxu1  ;;  %v4454_v63 = vpop.f32.mrf.mxu2 }
 0x251   : > { %vm7019_vm5 = vmpackc.low %vm1426_vm14, %vm1410_vm11  ;;  %vm1122_vm14 = vcmp.eq.s32.totalorder %v12697_v38, %v10016_v58  ;;  %v12699_v38 = vld [vmem:[#allocation12_spill] sm:$0xff]  ;;  %v4440_v37 = vadd.f32 %v4439_v29, %v4426_v0  ;;  %v12721_v63 = vld [vmem:[#allocation43_spill] sm:$0xff] }
 0x252   : > { %6968 = vmatpush.bf16.msk.msrb.mxu0 %vm6967_vm6, %v12445_v42  ;;  %7004 = vmatpush.bf16.msk.msrb.mxu2 %vm7003_vm8, %v12445_v42  ;;  %vm6981_vm13 = vmpackc.low %vm1010_vm3, %vm994_vm0  ;;  %vm1378_vm6 = vcmp.eq.s32.totalorder %v12651_v47, %v10016_v58  ;;  %vm1571_vm8 = vcmp.eq.s32.totalorder %v12698_v59, %v10336_v18  ;;  %vm978_vm0 = vcmp.eq.s32.totalorder %v12482_v61, %v10016_v58  ;;  %v4428_v47 = vpop.f32.mrf.mxu0  ;;  %v4467_v12 = vpop.f32.mrf.mxu3 }
 0x253   : > { %6980 = vmatpush.bf16.msk.msrb.mxu1 %vm10349_vm9, %v12445_v42  ;;  %7020 = vmatpush.bf16.msk.msrb.mxu3 %vm7019_vm5, %v12445_v42  ;;  %vm10436_vm12 = vmpackc.low %vm1331_vm2, %vm1315_vm15  ;;  %vm1394_vm5 = vcmp.eq.s32.totalorder %v12614_v8, %v10016_v58  ;;  %vm642_vm2 = vcmp.eq.s32.totalorder %v12465_v25, %v10016_v58  ;;  %v4453_v29 = vadd.f32 %v4452_v15, %v4440_v37  ;;  %v12713_v47 = vld [vmem:[#allocation24_spill] sm:$0xff]  ;;  %v12717_v37 = vld [vmem:[#allocation33_spill] sm:$0xff] }
 0x254   : > { %vm6969_vm9 = vmpackc.low %vm690_vm7, %vm674_vm10  ;;  %vm1587_vm7 = vcmp.eq.s32.totalorder %v12699_v38, %v10336_v18  ;;  %vm835_vm10 = vcmp.eq.s32.totalorder %v12505_v30, %v10336_v18  ;;  %v12719_v12 = vld [vmem:[#allocation34_spill] sm:$0xff]  ;;  %v12720_v15 = vld [vmem:[#allocation44_spill] sm:$0xff] }
 0x255   : > { %vm7005_vm11 = vmpackc.low %vm1138_vm4, %vm1122_vm14  ;;  %vm962_vm4 = vcmp.eq.s32.totalorder %v12576_v31, %v10016_v58 }
 0x256   : > { %6970 = vmatpush.bf16.msk.msrb.mxu0 %vm6969_vm9, %v12445_v42  ;;  %vm7021_vm3 = vmpackc.low %vm1394_vm5, %vm1378_vm6  ;;  %7006 = vmatpush.bf16.msk.msrb.mxu2 %vm7005_vm11, %v12445_v42  ;;  %vm12702_vm6 = vnez %v12688_v23  ;;  %vm658_vm9 = vcmp.eq.s32.totalorder %v12542_v28, %v10016_v58  ;;  %vm1299_vm5 = vcmp.eq.s32.totalorder %v12580_v50, %v10336_v18  ;;  %v4466_v23 = vadd.f32 %v4465_v36, %v4453_v29  ;;  %v12714_v29 = vld [vmem:[#allocation39_spill] sm:$0xff] }
 0x257   : > { %6982 = vmatpush.bf16.msk.msrb.mxu1 %vm6981_vm13, %v12445_v42  ;;  %7022 = vmatpush.bf16.msk.msrb.mxu3 %vm7021_vm3, %v12445_v42  ;;  %vm10461_vm15 = vmpackc.low %vm1587_vm7, %vm1571_vm8  ;;  %vm851_vm13 = vcmp.eq.s32.totalorder %v12506_v17, %v10336_v18  ;;  %vm1283_vm8 = vcmp.eq.s32.totalorder %v12543_v9, %v10336_v18  ;;  %vm626_vm3 = vcmp.eq.s32.totalorder %v12544_v46, %v10016_v58 }
 0x258   : > { %vm6983_vm14 = vmpackc.low %vm978_vm0, %vm962_vm4  ;;  %vm610_vm0 = vcmp.eq.s32.totalorder %v8136_v32, %v10016_v58  ;;  %vm946_vm7 = vcmp.eq.s32.totalorder %v12512_v22, %v10016_v58  ;;  %v5045_v36 = vadd.f32 %v4466_v23, %v4189_v16  ;;  %v4441_v0 = vpop.f32.mrf.mxu1  ;;  %v12718_v23 = vld [vmem:[#allocation57_spill] sm:$0xff]  ;;  %v10898_v16 = vadd.s32 1536, %v7777_v19 }
 0x259   : > { %vm6971_vm11 = vmpackc.low %vm658_vm9, %vm642_vm2  ;;  %vm1555_vm9 = vcmp.eq.s32.totalorder %v12549_v35, %v10336_v18  ;;  %4711 = vmatmul.bf16.vlgmr.msrb.gmra.mxu2 %v12487_v14  ;;  %v4504_v0 = vpop.f32.mrf.mxu2 }
 0x25a   : > { %7056 = vmatpush.bf16.msk.msra.mxu2 %vm10392_vm1, %v12445_v42  ;;  %vm930_vm1 = vcmp.eq.s32.totalorder %v12452_v2, %v10016_v58  ;;  %6972 = vmatpush.bf16.msk.msrb.mxu0 %vm6971_vm11, %v12445_v42  ;;  %vm10501_vm2 = vmpackc.low %vm851_vm13, %vm835_vm10  ;;  %vm803_vm13 = vcmp.eq.s32.totalorder %v12472_v21, %v10336_v18  ;;  %5061 = vst [vmem:[#allocation2 + $0x20] sm:$0x1f] %v5045_v36  ;;  %v4478_v36 = vpop.f32.mrf.mxu0 }
 0x25b   : > { %7072 = vmatpush.bf16.msk.msra.mxu3 %vm12702_vm6, %v12445_v42  ;;  %6984 = vmatpush.bf16.msk.msrb.mxu1 %vm6983_vm14, %v12445_v42  ;;  %vm10507_vm4 = vmpackc.low %vm1299_vm5, %vm1283_vm8  ;;  %vm1539_vm6 = vcmp.eq.s32.totalorder %v12489_v20, %v10336_v18  ;;  %vm819_vm14 = vcmp.eq.s32.totalorder %v12516_v54, %v10336_v18  ;;  %vm1107_vm8 = vcmp.eq.s32.totalorder %v7836_v55, %v10336_v18 }
 0x25c   : > { %4724 = vmatmul.bf16.vlgmr.msrb.gmra.mxu3 %v12515_v52  ;;  %vm6985_vm10 = vmpackc.low %vm946_vm7, %vm930_vm1  ;;  %vm898_vm1 = vcmp.eq.s32.totalorder %v12474_v3, %v10016_v58  ;;  %vm914_vm5 = vcmp.eq.s32.totalorder %v12475_v27, %v10016_v58  ;;  %vm1267_vm7 = vcmp.eq.s32.totalorder %v12460_v34, %v10336_v18 }
 0x25d   : > { %vm7075_vm11 = vmpackc.low %vm1555_vm9, %vm1539_vm6  ;;  %vm1075_vm6 = vcmp.eq.s32.totalorder %v7894_v24, %v10336_v18 }
 0x25e   : > { %7058 = vmatpush.bf16.msk.msra.mxu2 %vm10436_vm12, %v12445_v42  ;;  %vm6973_vm12 = vmpackc.low %vm626_vm3, %vm610_vm0  ;;  %vm1251_vm3 = vcmp.eq.s32.totalorder %v12459_v33, %v10336_v18 }
 0x25f   : > { %7074 = vmatpush.bf16.msk.msra.mxu3 %vm10461_vm15, %v12445_v42  ;;  %vm1091_vm15 = vcmp.eq.s32.totalorder %v7838_v56, %v10336_v18  ;;  %6974 = vmatpush.bf16.msk.msrb.mxu0 %vm6973_vm12, %v12445_v42  ;;  %vm10555_vm0 = vmpackc.low %vm819_vm14, %vm803_vm13  ;;  %vm787_vm13 = vcmp.eq.s32.totalorder %v7927_v41, %v10336_v18  ;;  %vm1507_vm12 = vcmp.eq.s32.totalorder %v7897_v26, %v10336_v18 }
 0x260   : > { %6986 = vmatpush.bf16.msk.msrb.mxu1 %vm6985_vm10, %v12445_v42  ;;  %vm10577_vm9 = vmpackc.low %vm1107_vm8, %vm1091_vm15  ;;  %vm882_vm15 = vcmp.eq.s32.totalorder %v8189_v45, %v10016_v58 }
 0x261   : > { %vm6987_vm10 = vmpackc.low %vm914_vm5, %vm898_vm1  ;;  %vm771_vm1 = vcmp.eq.s32.totalorder %v7858_v4, %v10336_v18  ;;  %vm1235_vm5 = vcmp.eq.s32.totalorder %v7977_v53, %v10336_v18 }
 0x262   : > { %7060 = vmatpush.bf16.msk.msra.mxu2 %vm10507_vm4, %v12445_v42  ;;  %vm1059_vm4 = vcmp.eq.s32.totalorder %v7821_v49, %v10336_v18  ;;  %4685 = vmatmul.bf16.vlgmr.msrb.gmra.mxu0 %v8183_v43  ;;  %vm7061_vm14 = vmpackc.low %vm1267_vm7, %vm1251_vm3  ;;  %vm866_vm3 = vcmp.eq.s32.totalorder %v8179_v10, %v10016_v58  ;;  %v10629_v58 = vadd.s32 1408, %v7777_v19 }
 0x263   : > { %7024 = vmatpush.bf16.msk.msra.mxu0 %vm10501_vm2, %v12445_v42  ;;  %7076 = vmatpush.bf16.msk.msra.mxu3 %vm7075_vm11, %v12445_v42  ;;  %vm1523_vm2 = vcmp.eq.s32.totalorder %v12461_v11, %v10336_v18  ;;  %vm10591_vm8 = vmpackc.low %vm1075_vm6, %vm1059_vm4 }
 0x264   : > { %6988 = vmatpush.bf16.msk.msrb.mxu1 %vm6987_vm10, %v12445_v42  ;;  %vm7077_vm11 = vmpackc.low %vm1523_vm2, %vm1507_vm12  ;;  %vm1219_vm2 = vcmp.eq.s32.totalorder %v7939_v1, %v10336_v18  ;;  %vm1027_vm10 = vcmp.eq.s32.totalorder %v7925_v39, %v10336_v18  ;;  %vm739_vm12 = vcmp.eq.s32.totalorder %v7954_v48, %v10336_v18  ;;  %v4190_v39 = vld [vmem:[#allocation2 + $0x28] sm:$0x1f] }
 0x265   : > { %vm7027_vm7 = vmpackc.low %vm787_vm13, %vm771_vm1  ;;  %vm755_vm1 = vcmp.eq.s32.totalorder %v12713_v47, %v10336_v18 }
 0x266   : > { %7062 = vmatpush.bf16.msk.msra.mxu2 %vm7061_vm14, %v12445_v42  ;;  %vm6989_vm6 = vmpackc.low %vm882_vm15, %vm866_vm3  ;;  %vm1491_vm14 = vcmp.eq.s32.totalorder %v7950_v44, %v10336_v18  ;;  %vm1187_vm15 = vcmp.eq.s32.totalorder %v8004_v62, %v10336_v18 }
 0x267   : > { %7026 = vmatpush.bf16.msk.msra.mxu0 %vm10555_vm0, %v12445_v42  ;;  %7078 = vmatpush.bf16.msk.msra.mxu3 %vm7077_vm11, %v12445_v42  ;;  %vm1475_vm0 = vcmp.eq.s32.totalorder %v12462_v7, %v10336_v18  ;;  %vm7063_vm4 = vmpackc.low %vm1235_vm5, %vm1219_vm2  ;;  %vm1043_vm11 = vcmp.eq.s32.totalorder %v12595_v60, %v10336_v18  ;;  %vm1459_vm5 = vcmp.eq.s32.totalorder %v12714_v29, %v10336_v18  ;;  %v12722_v60 = vld [vmem:[#allocation11_spill] sm:$0xff] }
 0x268   : > { %6990 = vmatpush.bf16.msk.msrb.mxu1 %vm6989_vm6, %v12445_v42  ;;  %vm7079_vm13 = vmpackc.low %vm1491_vm14, %vm1475_vm0  ;;  %vm1203_vm0 = vcmp.eq.s32.totalorder %v12717_v37, %v10336_v18  ;;  %vm1364_vm6 = vcmp.eq.s32.totalorder %v12676_v5, %v10629_v58  ;;  %vm1604_vm2 = vcmp.eq.s32.totalorder %v12677_v51, %v10629_v58  ;;  %vm707_vm14 = vcmp.eq.s32.totalorder %v12680_v40, %v10336_v18  ;;  %v12732_v51 = vld [vmem:[#allocation41_spill] sm:$0xff] }
 0x269   : > { %vm10642_vm3 = vmpackc.low %vm1043_vm11, %vm1027_vm10  ;;  %vm1171_vm11 = vcmp.eq.s32.totalorder %v12721_v63, %v10336_v18  ;;  %v12726_v63 = vmov 0 }
 0x26a   : > { %7064 = vmatpush.bf16.msk.msra.mxu2 %vm7063_vm4, %v12445_v42  ;;  %vm1620_vm4 = vcmp.eq.s32.totalorder %v12678_v57, %v10629_v58  ;;  %vm7065_vm10 = vmpackc.low %vm1203_vm0, %vm1187_vm15  ;;  %vm1155_vm15 = vcmp.eq.s32.totalorder %v12720_v15, %v10336_v18  ;;  %v12729_v15 = vld [vmem:[#allocation30_spill] sm:$0xff] }
 0x26b   : > { %7028 = vmatpush.bf16.msk.msra.mxu0 %vm7027_vm7, %v12445_v42  ;;  %7080 = vmatpush.bf16.msk.msra.mxu3 %vm7079_vm13, %v12445_v42  ;;  %vm7029_vm7 = vmpackc.low %vm755_vm1, %vm739_vm12  ;;  %vm723_vm12 = vcmp.eq.s32.totalorder %v12719_v12, %v10336_v18  ;;  %vm1348_vm1 = vcmp.eq.s32.totalorder %v12722_v60, %v10629_v58  ;;  %v12730_v60 = vld [vmem:[#allocation17_spill] sm:$0xff]  ;;  %v12731_v57 = vld [vmem:[#allocation42_spill] sm:$0xff] }
 0x26c   : > { %7040 = vmatpush.bf16.msk.msra.mxu1 %vm10577_vm9, %v12445_v42  ;;  %vm1443_vm9 = vcmp.eq.s32.totalorder %v8022_v6, %v10336_v18 }
 0x26d   : > { %4698 = vmatmul.bf16.vlgmr.msrb.gmra.mxu1 %v12718_v23  ;;  %vm7081_vm13 = vmpackc.low %vm1459_vm5, %vm1443_vm9  ;;  %v4517_v23 = vpop.f32.mrf.mxu3 }
 0x26e   : > { %7066 = vmatpush.bf16.msk.msra.mxu2 %vm7065_vm10, %v12445_v42  ;;  %vm10685_vm9 = vmpackc.low %vm1364_vm6, %vm1348_vm1  ;;  %vm1011_vm6 = vcmp.eq.s32.totalorder %v12729_v15, %v10336_v18  ;;  %vm1332_vm10 = vcmp.eq.s32.totalorder %v12730_v60, %v10629_v58  ;;  %v12734_v15 = vld [vmem:[#allocation9_spill] sm:$0xff] }
 0x26f   : > { %7030 = vmatpush.bf16.msk.msra.mxu0 %vm7029_vm7, %v12445_v42  ;;  %7082 = vmatpush.bf16.msk.msra.mxu3 %vm7081_vm13, %v12445_v42  ;;  %vm10695_vm5 = vmpackc.low %vm1620_vm4, %vm1604_vm2  ;;  %vm1411_vm4 = vcmp.eq.s32.totalorder %v12731_v57, %v10336_v18  ;;  %vm691_vm13 = vcmp.eq.s32.totalorder %v12732_v51, %v10336_v18  ;;  %vm1316_vm1 = vcmp.eq.s32.totalorder %v12734_v15, %v10629_v58  ;;  %v12735_v57 = vld [vmem:[#allocation36_spill] sm:$0xff]  ;;  %v12736_v51 = vld [vmem:[#allocation53_spill] sm:$0xff]  ;;  %v4506_v15 = vpop.f32.mrf.mxu2 }
 0x270   : > { %7042 = vmatpush.bf16.msk.msra.mxu1 %vm10591_vm8, %v12445_v42  ;;  %vm1427_vm8 = vcmp.eq.s32.totalorder %v12723_v13, %v10336_v18  ;;  %v12727_v63 = vsel %vm10695_vm5, 4294967295, %v12726_v63  ;;  %vm7031_vm7 = vmpackc.low %vm723_vm12, %vm707_vm14  ;;  %v12728_v13 = vld [vmem:[#allocation29_spill] sm:$0xff] }
 0x271   : > { %vm995_vm0 = vcmp.eq.s32.totalorder %v12728_v13, %v10336_v18  ;;  %vm7067_vm2 = vmpackc.low %vm1171_vm11, %vm1155_vm15  ;;  %v12733_v13 = vld [vmem:[#allocation52_spill] sm:$0xff]  ;;  %vm675_vm15 = vcmp.eq.s32.totalorder %v12735_v57, %v10336_v18  ;;  %v4491_v57 = vpop.f32.mrf.mxu1 }
 0x272   : > { %vm7083_vm14 = vmpackc.low %vm1427_vm8, %vm1411_vm4  ;;  %vm1139_vm12 = vcmp.eq.s32.totalorder %v12733_v13, %v10336_v18  ;;  %7068 = vmatpush.bf16.msk.msra.mxu2 %vm7067_vm2, %v12445_v42  ;;  %v12739_v13 = vld [vmem:[#allocation48_spill] sm:$0xff]  ;;  %vm1572_vm2 = vcmp.eq.s32.totalorder %v12698_v59, %v10629_v58 }
 0x273   : > { %7032 = vmatpush.bf16.msk.msra.mxu0 %vm7031_vm7, %v12445_v42  ;;  %7084 = vmatpush.bf16.msk.msra.mxu3 %vm7083_vm14, %v12445_v42  ;;  %vm7045_vm11 = vmpackc.low %vm1011_vm6, %vm995_vm0  ;;  %vm1379_vm7 = vcmp.eq.s32.totalorder %v12736_v51, %v10336_v18  ;;  %vm1123_vm8 = vcmp.eq.s32.totalorder %v12739_v13, %v10336_v18  ;;  %vm1395_vm14 = vcmp.eq.s32.totalorder %v12614_v8, %v10336_v18  ;;  %v4480_v51 = vpop.f32.mrf.mxu0 }
 0x274   : > { %7044 = vmatpush.bf16.msk.msra.mxu1 %vm10642_vm3, %v12445_v42  ;;  %vm10729_vm5 = vmpackc.low %vm1332_vm10, %vm1316_vm1  ;;  %vm979_vm0 = vcmp.eq.s32.totalorder %v12482_v61, %v10336_v18  ;;  %vm643_vm10 = vcmp.eq.s32.totalorder %v12465_v25, %v10336_v18  ;;  %v4492_v13 = vadd.f32 %v4491_v57, %v4478_v36  ;;  %v12753_v51 = vld [vmem:[#allocation25_spill] sm:$0xff] }
 0x275   : > { %vm7033_vm3 = vmpackc.low %vm691_vm13, %vm675_vm15  ;;  %vm1588_vm13 = vcmp.eq.s32.totalorder %v12699_v38, %v10629_v58  ;;  %v4519_v60 = vpop.f32.mrf.mxu3  ;;  %vm836_vm15 = vcmp.eq.s32.totalorder %v12505_v30, %v10629_v58  ;;  %v12756_v57 = vld [vmem:[#allocation57_spill] sm:$0xff] }
 0x276   : > { %vm7069_vm4 = vmpackc.low %vm1139_vm12, %vm1123_vm8  ;;  %vm963_vm12 = vcmp.eq.s32.totalorder %v12576_v31, %v10336_v18  ;;  %v4505_v60 = vadd.f32 %v4504_v0, %v4492_v13  ;;  %v12760_v13 = vld [vmem:[#allocation43_spill] sm:$0xff] }
 0x277   : > { %7034 = vmatpush.bf16.msk.msra.mxu0 %vm7033_vm3, %v12445_v42  ;;  %vm7085_vm6 = vmpackc.low %vm1395_vm14, %vm1379_vm7  ;;  %7070 = vmatpush.bf16.msk.msra.mxu2 %vm7069_vm4, %v12445_v42  ;;  %vm12742_vm7 = vnez %v12727_v63  ;;  %vm659_vm3 = vcmp.eq.s32.totalorder %v12542_v28, %v10336_v18  ;;  %vm1300_vm14 = vcmp.eq.s32.totalorder %v12580_v50, %v10629_v58  ;;  %v12759_v63 = vld [vmem:[#allocation44_spill] sm:$0xff] }
 0x278   : > { %7046 = vmatpush.bf16.msk.msra.mxu1 %vm7045_vm11, %v12445_v42  ;;  %7086 = vmatpush.bf16.msk.msra.mxu3 %vm7085_vm6, %v12445_v42  ;;  %vm10754_vm1 = vmpackc.low %vm1588_vm13, %vm1572_vm2  ;;  %vm852_vm11 = vcmp.eq.s32.totalorder %v12506_v17, %v10629_v58  ;;  %vm1284_vm2 = vcmp.eq.s32.totalorder %v12543_v9, %v10629_v58  ;;  %vm627_vm6 = vcmp.eq.s32.totalorder %v12544_v46, %v10336_v18 }
 0x279   : > { %vm7047_vm8 = vmpackc.low %vm979_vm0, %vm963_vm12  ;;  %vm611_vm0 = vcmp.eq.s32.totalorder %v8136_v32, %v10336_v18  ;;  %v4518_v36 = vadd.f32 %v4517_v23, %v4505_v60  ;;  %vm947_vm13 = vcmp.eq.s32.totalorder %v12512_v22, %v10336_v18  ;;  %v4493_v15 = vpop.f32.mrf.mxu1  ;;  %v12754_v60 = vld [vmem:[#allocation10_spill] sm:$0xff] }
 0x27a   : > { %vm7035_vm4 = vmpackc.low %vm659_vm3, %vm643_vm10  ;;  %vm820_vm3 = vcmp.eq.s32.totalorder %v12516_v54, %v10629_v58  ;;  %4763 = vmatmul.bf16.vlgmr.msra.gmra.mxu2 %v12487_v14  ;;  %v12758_v15 = vld [vmem:[#allocation20_spill] sm:$0xff] }
 0x27b   : > { %7120 = vmatpush.bf16.msk.msrb.mxu2 %vm10685_vm9, %v12445_v42  ;;  %vm931_vm9 = vcmp.eq.s32.totalorder %v12452_v2, %v10336_v18  ;;  %7036 = vmatpush.bf16.msk.msra.mxu0 %vm7035_vm4, %v12445_v42  ;;  %vm10794_vm10 = vmpackc.low %vm852_vm11, %vm836_vm15  ;;  %vm1540_vm11 = vcmp.eq.s32.totalorder %v12489_v20, %v10629_v58  ;;  %v5046_v23 = vadd.f32 %v4518_v36, %v4190_v39  ;;  %v12755_v39 = vld [vmem:[#allocation13_spill] sm:$0xff]  ;;  %v12757_v36 = vld [vmem:[#allocation11_spill] sm:$0xff]  ;;  %v4530_v0 = vpop.f32.mrf.mxu0 }
 0x27c   : > { %7136 = vmatpush.bf16.msk.msrb.mxu3 %vm12742_vm7, %v12445_v42  ;;  %7048 = vmatpush.bf16.msk.msra.mxu1 %vm7047_vm8, %v12445_v42  ;;  %vm10800_vm12 = vmpackc.low %vm1300_vm14, %vm1284_vm2  ;;  %vm804_vm7 = vcmp.eq.s32.totalorder %v12472_v21, %v10629_v58  ;;  %vm1556_vm8 = vcmp.eq.s32.totalorder %v12549_v35, %v10629_v58  ;;  %vm1108_vm2 = vcmp.eq.s32.totalorder %v7836_v55, %v10629_v58 }
 0x27d   : > { %4776 = vmatmul.bf16.vlgmr.msra.gmra.mxu3 %v12515_v52  ;;  %vm7049_vm15 = vmpackc.low %vm947_vm13, %vm931_vm9  ;;  %vm899_vm4 = vcmp.eq.s32.totalorder %v12474_v3, %v10336_v18  ;;  %vm915_vm9 = vcmp.eq.s32.totalorder %v12475_v27, %v10336_v18  ;;  %5062 = vst [vmem:[#allocation2 + $0x28] sm:$0x1f] %v5046_v23  ;;  %vm1268_vm13 = vcmp.eq.s32.totalorder %v12460_v34, %v10629_v58  ;;  %v4556_v23 = vpop.f32.mrf.mxu2 }
 0x27e   : > { %vm10845_vm14 = vmpackc.low %vm820_vm3, %vm804_vm7  ;;  %vm1524_vm7 = vcmp.eq.s32.totalorder %v12461_v11, %v10629_v58 }
 0x27f   : > { %7122 = vmatpush.bf16.msk.msrb.mxu2 %vm10729_vm5, %v12445_v42  ;;  %vm7037_vm5 = vmpackc.low %vm627_vm6, %vm611_vm0  ;;  %vm1252_vm6 = vcmp.eq.s32.totalorder %v12459_v33, %v10629_v58 }
 0x280   : > { %7138 = vmatpush.bf16.msk.msrb.mxu3 %vm10754_vm1, %v12445_v42  ;;  %vm1092_vm1 = vcmp.eq.s32.totalorder %v7838_v56, %v10629_v58  ;;  %7038 = vmatpush.bf16.msk.msra.mxu0 %vm7037_vm5, %v12445_v42  ;;  %vm7139_vm0 = vmpackc.low %vm1556_vm8, %vm1540_vm11  ;;  %vm1508_vm11 = vcmp.eq.s32.totalorder %v7897_v26, %v10629_v58  ;;  %vm883_vm8 = vcmp.eq.s32.totalorder %v8189_v45, %v10336_v18 }
 0x281   : > { %7050 = vmatpush.bf16.msk.msra.mxu1 %vm7049_vm15, %v12445_v42  ;;  %vm7051_vm3 = vmpackc.low %vm915_vm9, %vm899_vm4  ;;  %vm788_vm15 = vcmp.eq.s32.totalorder %v7927_v41, %v10629_v58  ;;  %vm867_vm4 = vcmp.eq.s32.totalorder %v8179_v10, %v10336_v18  ;;  %v12761_v18 = vld [vmem:[#allocation46_spill] sm:$0xff] }
 0x282   : > { %vm7141_vm5 = vmpackc.low %vm1524_vm7, %vm1508_vm11  ;;  %vm1060_vm11 = vcmp.eq.s32.totalorder %v7821_v49, %v10629_v58 }
 0x283   : > { %7124 = vmatpush.bf16.msk.msrb.mxu2 %vm10800_vm12, %v12445_v42  ;;  %4737 = vmatmul.bf16.vlgmr.msra.gmra.mxu0 %v8183_v43  ;;  %vm7125_vm12 = vmpackc.low %vm1268_vm13, %vm1252_vm6  ;;  %vm1076_vm13 = vcmp.eq.s32.totalorder %v7894_v24, %v10629_v58 }
 0x284   : > { %7088 = vmatpush.bf16.msk.msrb.mxu0 %vm10794_vm10, %v12445_v42  ;;  %7140 = vmatpush.bf16.msk.msrb.mxu3 %vm7139_vm0, %v12445_v42  ;;  %vm10868_vm10 = vmpackc.low %vm1108_vm2, %vm1092_vm1  ;;  %vm772_vm1 = vcmp.eq.s32.totalorder %v7858_v4, %v10629_v58  ;;  %vm1236_vm2 = vcmp.eq.s32.totalorder %v7977_v53, %v10629_v58  ;;  %vm1476_vm0 = vcmp.eq.s32.totalorder %v12462_v7, %v10629_v58 }
 0x285   : > { %7052 = vmatpush.bf16.msk.msra.mxu1 %vm7051_vm3, %v12445_v42  ;;  %vm7091_vm9 = vmpackc.low %vm788_vm15, %vm772_vm1  ;;  %vm1492_vm3 = vcmp.eq.s32.totalorder %v7950_v44, %v10629_v58  ;;  %vm740_vm15 = vcmp.eq.s32.totalorder %v7954_v48, %v10629_v58  ;;  %vm756_vm1 = vcmp.eq.s32.totalorder %v12713_v47, %v10629_v58 }
 0x286   : > { %vm7053_vm6 = vmpackc.low %vm883_vm8, %vm867_vm4  ;;  %vm1188_vm8 = vcmp.eq.s32.totalorder %v8004_v62, %v10629_v58  ;;  %vm1460_vm4 = vcmp.eq.s32.totalorder %v12714_v29, %v10629_v58 }
 0x287   : > { %7126 = vmatpush.bf16.msk.msrb.mxu2 %vm7125_vm12, %v12445_v42  ;;  %vm7143_vm12 = vmpackc.low %vm1492_vm3, %vm1476_vm0  ;;  %vm1204_vm0 = vcmp.eq.s32.totalorder %v12717_v37, %v10629_v58  ;;  %vm708_vm3 = vcmp.eq.s32.totalorder %v12680_v40, %v10629_v58  ;;  %v12770_v37 = vld [vmem:[#allocation41_spill] sm:$0xff] }
 0x288   : > { %7090 = vmatpush.bf16.msk.msrb.mxu0 %vm10845_vm14, %v12445_v42  ;;  %7142 = vmatpush.bf16.msk.msrb.mxu3 %vm7141_vm5, %v12445_v42  ;;  %vm1220_vm14 = vcmp.eq.s32.totalorder %v7939_v1, %v10629_v58  ;;  %vm1365_vm5 = vcmp.eq.s32.totalorder %v12676_v5, %v10898_v16  ;;  %v12767_v5 = vld [vmem:[#allocation30_spill] sm:$0xff] }
 0x289   : > { %7054 = vmatpush.bf16.msk.msra.mxu1 %vm7053_vm6, %v12445_v42  ;;  %vm7127_vm7 = vmpackc.low %vm1236_vm2, %vm1220_vm14  ;;  %vm1444_vm2 = vcmp.eq.s32.totalorder %v8022_v6, %v10629_v58  ;;  %vm1028_vm6 = vcmp.eq.s32.totalorder %v12753_v51, %v10629_v58  ;;  %vm1605_vm14 = vcmp.eq.s32.totalorder %v12754_v60, %v10898_v16  ;;  %v12768_v60 = vld [vmem:[#allocation17_spill] sm:$0xff] }
 0x28b   : > { %7128 = vmatpush.bf16.msk.msrb.mxu2 %vm7127_vm7, %v12445_v42  ;;  %vm7129_vm7 = vmpackc.low %vm1204_vm0, %vm1188_vm8  ;;  %vm1044_vm8 = vcmp.eq.s32.totalorder %v12758_v15, %v10629_v58 }
 0x28c   : > { %7092 = vmatpush.bf16.msk.msrb.mxu0 %vm7091_vm9, %v12445_v42  ;;  %7144 = vmatpush.bf16.msk.msrb.mxu3 %vm7143_vm12, %v12445_v42  ;;  %vm7093_vm9 = vmpackc.low %vm756_vm1, %vm740_vm15  ;;  %vm724_vm15 = vcmp.eq.s32.totalorder %v12719_v12, %v10629_v58  ;;  %vm1349_vm12 = vcmp.eq.s32.totalorder %v12757_v36, %v10898_v16  ;;  %vm1156_vm1 = vcmp.eq.s32.totalorder %v12759_v63, %v10629_v58  ;;  %v4569_v36 = vpop.f32.mrf.mxu3  ;;  %v12799_v63 = vld [vmem:[#allocation43_spill] sm:$0xff] }
 0x28d   : > { %7104 = vmatpush.bf16.msk.msrb.mxu1 %vm10868_vm10, %v12445_v42  ;;  %vm10922_vm10 = vmpackc.low %vm1076_vm13, %vm1060_vm11  ;;  %vm1621_vm13 = vcmp.eq.s32.totalorder %v12755_v39, %v10898_v16  ;;  %v12769_v39 = vld [vmem:[#allocation42_spill] sm:$0xff] }
 0x28e   : > { %4750 = vmatmul.bf16.vlgmr.msra.gmra.mxu1 %v12756_v57  ;;  %vm7145_vm11 = vmpackc.low %vm1460_vm4, %vm1444_vm2  ;;  %vm1428_vm2 = vcmp.eq.s32.totalorder %v12761_v18, %v10629_v58  ;;  %v12766_v18 = vld [vmem:[#allocation29_spill] sm:$0xff] }
 0x28f   : > { %7130 = vmatpush.bf16.msk.msrb.mxu2 %vm7129_vm7, %v12445_v42  ;;  %vm10971_vm4 = vmpackc.low %vm1365_vm5, %vm1349_vm12  ;;  %vm1012_vm7 = vcmp.eq.s32.totalorder %v12767_v5, %v10629_v58  ;;  %vm1333_vm12 = vcmp.eq.s32.totalorder %v12768_v60, %v10898_v16  ;;  %v12772_v5 = vld [vmem:[#allocation9_spill] sm:$0xff] }
 0x290   : > { %7094 = vmatpush.bf16.msk.msrb.mxu0 %vm7093_vm9, %v12445_v42  ;;  %vm1172_vm9 = vcmp.eq.s32.totalorder %v12760_v13, %v10629_v58  ;;  %7146 = vmatpush.bf16.msk.msrb.mxu3 %vm7145_vm11, %v12445_v42  ;;  %vm10981_vm0 = vmpackc.low %vm1621_vm13, %vm1605_vm14  ;;  %v12764_v13 = vmov 0  ;;  %vm1412_vm13 = vcmp.eq.s32.totalorder %v12769_v39, %v10629_v58  ;;  %vm692_vm11 = vcmp.eq.s32.totalorder %v12770_v37, %v10629_v58  ;;  %v12773_v39 = vld [vmem:[#allocation36_spill] sm:$0xff]  ;;  %v12774_v37 = vld [vmem:[#allocation53_spill] sm:$0xff] }
 0x291   : > { %7106 = vmatpush.bf16.msk.msrb.mxu1 %vm10922_vm10, %v12445_v42  ;;  %vm7107_vm10 = vmpackc.low %vm1044_vm8, %vm1028_vm6  ;;  %v12765_v13 = vsel %vm10981_vm0, 4294967295, %v12764_v13  ;;  %vm996_vm6 = vcmp.eq.s32.totalorder %v12766_v18, %v10629_v58  ;;  %v12771_v18 = vld [vmem:[#allocation52_spill] sm:$0xff]  ;;  %vm1317_vm8 = vcmp.eq.s32.totalorder %v12772_v5, %v10898_v16  ;;  %v4558_v5 = vpop.f32.mrf.mxu2 }
 0x292   : > { %vm7095_vm5 = vmpackc.low %vm724_vm15, %vm708_vm3  ;;  %vm1140_vm15 = vcmp.eq.s32.totalorder %v12771_v18, %v10629_v58  ;;  %v12777_v18 = vld [vmem:[#allocation48_spill] sm:$0xff] }
 0x293   : > { %vm7131_vm14 = vmpackc.low %vm1172_vm9, %vm1156_vm1  ;;  %vm676_vm1 = vcmp.eq.s32.totalorder %v12773_v39, %v10629_v58  ;;  %v4543_v39 = vpop.f32.mrf.mxu1 }
 0x294   : > { %7096 = vmatpush.bf16.msk.msrb.mxu0 %vm7095_vm5, %v12445_v42  ;;  %vm7147_vm3 = vmpackc.low %vm1428_vm2, %vm1412_vm13  ;;  %7132 = vmatpush.bf16.msk.msrb.mxu2 %vm7131_vm14, %v12445_v42  ;;  %vm1380_vm5 = vcmp.eq.s32.totalorder %v12774_v37, %v10629_v58  ;;  %vm1124_vm2 = vcmp.eq.s32.totalorder %v12777_v18, %v10629_v58  ;;  %vm1573_vm14 = vcmp.eq.s32.totalorder %v12698_v59, %v10898_v16  ;;  %v4532_v37 = vpop.f32.mrf.mxu0  ;;  %v4571_v12 = vpop.f32.mrf.mxu3 }
 0x295   : > { %7108 = vmatpush.bf16.msk.msrb.mxu1 %vm7107_vm10, %v12445_v42  ;;  %7148 = vmatpush.bf16.msk.msrb.mxu3 %vm7147_vm3, %v12445_v42  ;;  %vm7109_vm9 = vmpackc.low %vm1012_vm7, %vm996_vm6  ;;  %vm1396_vm3 = vcmp.eq.s32.totalorder %v12614_v8, %v10629_v58  ;;  %vm980_vm6 = vcmp.eq.s32.totalorder %v12482_v61, %v10629_v58  ;;  %v4544_v18 = vadd.f32 %v4543_v39, %v4530_v0  ;;  %v4191_v12 = vld [vmem:[#allocation2 + $0x30] sm:$0x1f]  ;;  %v12795_v39 = vld [vmem:[#allocation10_spill] sm:$0xff] }
 0x296   : > { %vm11013_vm0 = vmpackc.low %vm1333_vm12, %vm1317_vm8  ;;  %vm644_vm12 = vcmp.eq.s32.totalorder %v12465_v25, %v10629_v58  ;;  %v12841_v37 = vld [vmem:[#allocation46_spill] sm:$0xff] }
 0x297   : > { %vm7097_vm10 = vmpackc.low %vm692_vm11, %vm676_vm1  ;;  %vm1589_vm11 = vcmp.eq.s32.totalorder %v12699_v38, %v10898_v16  ;;  %vm837_vm1 = vcmp.eq.s32.totalorder %v12505_v30, %v10898_v16  ;;  %v4557_v5 = vadd.f32 %v4556_v23, %v4544_v18  ;;  %v12797_v23 = vld [vmem:[#allocation34_spill] sm:$0xff] }
 0x298   : > { %vm7133_vm13 = vmpackc.low %vm1140_vm15, %vm1124_vm2  ;;  %7098 = vmatpush.bf16.msk.msrb.mxu0 %vm7097_vm10, %v12445_v42  ;;  %vm964_vm15 = vcmp.eq.s32.totalorder %v12576_v31, %v10629_v58  ;;  %vm660_vm10 = vcmp.eq.s32.totalorder %v12542_v28, %v10629_v58  ;;  %v12801_v18 = vld [vmem:[#allocation46_spill] sm:$0xff] }
 0x299   : > { %7110 = vmatpush.bf16.msk.msrb.mxu1 %vm7109_vm9, %v12445_v42  ;;  %vm7149_vm7 = vmpackc.low %vm1396_vm3, %vm1380_vm5  ;;  %7134 = vmatpush.bf16.msk.msrb.mxu2 %vm7133_vm13, %v12445_v42  ;;  %vm853_vm9 = vcmp.eq.s32.totalorder %v12506_v17, %v10898_v16  ;;  %vm12780_vm5 = vnez %v12765_v13  ;;  %vm1301_vm3 = vcmp.eq.s32.totalorder %v12580_v50, %v10898_v16  ;;  %v4570_v0 = vadd.f32 %v4569_v36, %v4557_v5  ;;  %v12793_v5 = vld [vmem:[#allocation33_spill] sm:$0xff] }
 0x29a   : > { %7150 = vmatpush.bf16.msk.msrb.mxu3 %vm7149_vm7, %v12445_v42  ;;  %vm11038_vm8 = vmpackc.low %vm1589_vm11, %vm1573_vm14  ;;  %vm1285_vm14 = vcmp.eq.s32.totalorder %v12543_v9, %v10898_v16  ;;  %vm628_vm7 = vcmp.eq.s32.totalorder %v12544_v46, %v10629_v58  ;;  %vm948_vm11 = vcmp.eq.s32.totalorder %v12512_v22, %v10629_v58  ;;  %v4608_v13 = vpop.f32.mrf.mxu2 }
 0x29b   : > { %vm7111_vm2 = vmpackc.low %vm980_vm6, %vm964_vm15  ;;  %vm612_vm6 = vcmp.eq.s32.totalorder %v8136_v32, %v10629_v58  ;;  %v5047_v36 = vadd.f32 %v4570_v0, %v4191_v12  ;;  %v4545_v60 = vpop.f32.mrf.mxu1  ;;  %v12794_v12 = vld [vmem:[#allocation14_spill] sm:$0xff]  ;;  %v12796_v0 = vld [vmem:[#allocation13_spill] sm:$0xff] }
 0x29c   : > { %vm7099_vm13 = vmpackc.low %vm660_vm10, %vm644_vm12  ;;  %vm821_vm10 = vcmp.eq.s32.totalorder %v12516_v54, %v10898_v16  ;;  %4815 = vmatmul.bf16.vlgmr.msrb.gmra.mxu2 %v12487_v14  ;;  %v12798_v60 = vld [vmem:[#allocation44_spill] sm:$0xff] }
 0x29d   : > { %7184 = vmatpush.bf16.msk.msra.mxu2 %vm10971_vm4, %v12445_v42  ;;  %vm932_vm4 = vcmp.eq.s32.totalorder %v12452_v2, %v10629_v58  ;;  %7100 = vmatpush.bf16.msk.msrb.mxu0 %vm7099_vm13, %v12445_v42  ;;  %vm11078_vm12 = vmpackc.low %vm853_vm9, %vm837_vm1  ;;  %vm1541_vm9 = vcmp.eq.s32.totalorder %v12489_v20, %v10898_v16  ;;  %vm900_vm13 = vcmp.eq.s32.totalorder %v12474_v3, %v10629_v58 }
 0x29e   : > { %7200 = vmatpush.bf16.msk.msra.mxu3 %vm12780_vm5, %v12445_v42  ;;  %7112 = vmatpush.bf16.msk.msrb.mxu1 %vm7111_vm2, %v12445_v42  ;;  %vm11084_vm15 = vmpackc.low %vm1301_vm3, %vm1285_vm14  ;;  %vm805_vm5 = vcmp.eq.s32.totalorder %v12472_v21, %v10898_v16  ;;  %vm1557_vm2 = vcmp.eq.s32.totalorder %v12549_v35, %v10898_v16  ;;  %vm1109_vm14 = vcmp.eq.s32.totalorder %v7836_v55, %v10898_v16 }
 0x29f   : > { %4828 = vmatmul.bf16.vlgmr.msrb.gmra.mxu3 %v12515_v52  ;;  %vm7113_vm1 = vmpackc.low %vm948_vm11, %vm932_vm4  ;;  %vm916_vm4 = vcmp.eq.s32.totalorder %v12475_v27, %v10629_v58  ;;  %5063 = vst [vmem:[#allocation2 + $0x30] sm:$0x1f] %v5047_v36  ;;  %vm1269_vm11 = vcmp.eq.s32.totalorder %v12460_v34, %v10898_v16  ;;  %v4582_v36 = vpop.f32.mrf.mxu0 }
 0x2a0   : > { %vm11129_vm3 = vmpackc.low %vm821_vm10, %vm805_vm5  ;;  %vm1525_vm5 = vcmp.eq.s32.totalorder %v12461_v11, %v10898_v16 }
 0x2a1   : > { %7186 = vmatpush.bf16.msk.msra.mxu2 %vm11013_vm0, %v12445_v42  ;;  %vm7101_vm0 = vmpackc.low %vm628_vm7, %vm612_vm6  ;;  %vm1253_vm7 = vcmp.eq.s32.totalorder %v12459_v33, %v10898_v16 }
 0x2a2   : > { %7202 = vmatpush.bf16.msk.msra.mxu3 %vm11038_vm8, %v12445_v42  ;;  %vm1093_vm8 = vcmp.eq.s32.totalorder %v7838_v56, %v10898_v16  ;;  %7102 = vmatpush.bf16.msk.msrb.mxu0 %vm7101_vm0, %v12445_v42  ;;  %vm7203_vm6 = vmpackc.low %vm1557_vm2, %vm1541_vm9  ;;  %vm789_vm9 = vcmp.eq.s32.totalorder %v7927_v41, %v10898_v16  ;;  %vm1509_vm0 = vcmp.eq.s32.totalorder %v7897_v26, %v10898_v16 }
 0x2a3   : > { %7114 = vmatpush.bf16.msk.msrb.mxu1 %vm7113_vm1, %v12445_v42  ;;  %vm1077_vm1 = vcmp.eq.s32.totalorder %v7894_v24, %v10898_v16  ;;  %vm7115_vm10 = vmpackc.low %vm916_vm4, %vm900_vm13  ;;  %vm773_vm4 = vcmp.eq.s32.totalorder %v7858_v4, %v10898_v16 }
 0x2a4   : > { %vm7189_vm2 = vmpackc.low %vm1269_vm11, %vm1253_vm7  ;;  %vm868_vm7 = vcmp.eq.s32.totalorder %v8179_v10, %v10629_v58 }
 0x2a5   : > { %7188 = vmatpush.bf16.msk.msra.mxu2 %vm11084_vm15, %v12445_v42  ;;  %4789 = vmatmul.bf16.vlgmr.msrb.gmra.mxu0 %v8183_v43  ;;  %vm1061_vm15 = vcmp.eq.s32.totalorder %v7821_v49, %v10898_v16  ;;  %vm7205_vm13 = vmpackc.low %vm1525_vm5, %vm1509_vm0  ;;  %vm1221_vm5 = vcmp.eq.s32.totalorder %v7939_v1, %v10898_v16  ;;  %vm741_vm0 = vcmp.eq.s32.totalorder %v7954_v48, %v10898_v16 }
 0x2a6   : > { %7152 = vmatpush.bf16.msk.msra.mxu0 %vm11078_vm12, %v12445_v42  ;;  %7204 = vmatpush.bf16.msk.msra.mxu3 %vm7203_vm6, %v12445_v42  ;;  %vm11154_vm12 = vmpackc.low %vm1109_vm14, %vm1093_vm8  ;;  %vm884_vm8 = vcmp.eq.s32.totalorder %v8189_v45, %v10629_v58  ;;  %vm1237_vm6 = vcmp.eq.s32.totalorder %v7977_v53, %v10898_v16  ;;  %v11206_v58 = vadd.s32 1664, %v7777_v19 }
 0x2a7   : > { %7116 = vmatpush.bf16.msk.msrb.mxu1 %vm7115_vm10, %v12445_v42  ;;  %vm11168_vm14 = vmpackc.low %vm1077_vm1, %vm1061_vm15  ;;  %vm1029_vm10 = vcmp.eq.s32.totalorder %v12753_v51, %v10898_v16 }
 0x2a8   : > { %vm7155_vm11 = vmpackc.low %vm789_vm9, %vm773_vm4  ;;  %vm757_vm4 = vcmp.eq.s32.totalorder %v12713_v47, %v10898_v16 }
 0x2a9   : > { %7190 = vmatpush.bf16.msk.msra.mxu2 %vm7189_vm2, %v12445_v42  ;;  %vm7117_vm1 = vmpackc.low %vm884_vm8, %vm868_vm7  ;;  %vm1493_vm2 = vcmp.eq.s32.totalorder %v7950_v44, %v10898_v16  ;;  %vm1189_vm8 = vcmp.eq.s32.totalorder %v8004_v62, %v10898_v16 }
 0x2aa   : > { %7154 = vmatpush.bf16.msk.msra.mxu0 %vm11129_vm3, %v12445_v42  ;;  %7206 = vmatpush.bf16.msk.msra.mxu3 %vm7205_vm13, %v12445_v42  ;;  %vm1477_vm3 = vcmp.eq.s32.totalorder %v12462_v7, %v10898_v16  ;;  %vm7191_vm15 = vmpackc.low %vm1237_vm6, %vm1221_vm5  ;;  %vm1045_vm13 = vcmp.eq.s32.totalorder %v12758_v15, %v10898_v16  ;;  %vm1461_vm6 = vcmp.eq.s32.totalorder %v12714_v29, %v10898_v16 }
 0x2ab   : > { %7118 = vmatpush.bf16.msk.msrb.mxu1 %vm7117_vm1, %v12445_v42  ;;  %vm7207_vm9 = vmpackc.low %vm1493_vm2, %vm1477_vm3  ;;  %vm1205_vm3 = vcmp.eq.s32.totalorder %v12793_v5, %v10898_v16  ;;  %vm1366_vm1 = vcmp.eq.s32.totalorder %v12794_v12, %v11206_v58  ;;  %vm1606_vm5 = vcmp.eq.s32.totalorder %v12795_v39, %v11206_v58  ;;  %vm709_vm2 = vcmp.eq.s32.totalorder %v12680_v40, %v10898_v16  ;;  %v4621_v5 = vpop.f32.mrf.mxu3  ;;  %v12808_v39 = vld [vmem:[#allocation17_spill] sm:$0xff] }
 0x2ac   : > { %vm11219_vm7 = vmpackc.low %vm1045_vm13, %vm1029_vm10  ;;  %vm1173_vm13 = vcmp.eq.s32.totalorder %v12799_v63, %v10898_v16  ;;  %v12807_v63 = vld [vmem:[#allocation30_spill] sm:$0xff]  ;;  %v12810_v12 = vld [vmem:[#allocation41_spill] sm:$0xff] }
 0x2ad   : > { %7192 = vmatpush.bf16.msk.msra.mxu2 %vm7191_vm15, %v12445_v42  ;;  %vm1622_vm15 = vcmp.eq.s32.totalorder %v12796_v0, %v11206_v58  ;;  %vm7193_vm10 = vmpackc.low %vm1205_vm3, %vm1189_vm8  ;;  %vm1157_vm8 = vcmp.eq.s32.totalorder %v12798_v60, %v10898_v16  ;;  %v12809_v0 = vld [vmem:[#allocation42_spill] sm:$0xff] }
 0x2ae   : > { %7156 = vmatpush.bf16.msk.msra.mxu0 %vm7155_vm11, %v12445_v42  ;;  %7208 = vmatpush.bf16.msk.msra.mxu3 %vm7207_vm9, %v12445_v42  ;;  %vm7157_vm11 = vmpackc.low %vm757_vm4, %vm741_vm0  ;;  %vm725_vm0 = vcmp.eq.s32.totalorder %v12797_v23, %v10898_v16 }
 0x2af   : > { %7168 = vmatpush.bf16.msk.msra.mxu1 %vm11154_vm12, %v12445_v42  ;;  %vm1445_vm12 = vcmp.eq.s32.totalorder %v8022_v6, %v10898_v16 }
 0x2b0   : > { %4802 = vmatmul.bf16.vlgmr.msrb.gmra.mxu1 %v12756_v57  ;;  %vm7209_vm9 = vmpackc.low %vm1461_vm6, %vm1445_vm12  ;;  %v12800_v57 = vld [vmem:[#allocation11_spill] sm:$0xff] }
 0x2b1   : > { %vm1350_vm4 = vcmp.eq.s32.totalorder %v12800_v57, %v11206_v58  ;;  %7194 = vmatpush.bf16.msk.msra.mxu2 %vm7193_vm10, %v12445_v42  ;;  %vm11269_vm6 = vmpackc.low %vm1622_vm15, %vm1606_vm5  ;;  %v12804_v57 = vmov 0  ;;  %vm1334_vm10 = vcmp.eq.s32.totalorder %v12808_v39, %v11206_v58  ;;  %vm1413_vm15 = vcmp.eq.s32.totalorder %v12809_v0, %v10898_v16  ;;  %v12813_v0 = vld [vmem:[#allocation36_spill] sm:$0xff] }
 0x2b2   : > { %7158 = vmatpush.bf16.msk.msra.mxu0 %vm7157_vm11, %v12445_v42  ;;  %7210 = vmatpush.bf16.msk.msra.mxu3 %vm7209_vm9, %v12445_v42  ;;  %vm11259_vm12 = vmpackc.low %vm1366_vm1, %vm1350_vm4  ;;  %v12805_v57 = vsel %vm11269_vm6, 4294967295, %v12804_v57  ;;  %vm1013_vm1 = vcmp.eq.s32.totalorder %v12807_v63, %v10898_v16  ;;  %vm693_vm9 = vcmp.eq.s32.totalorder %v12810_v12, %v10898_v16  ;;  %v12812_v63 = vld [vmem:[#allocation9_spill] sm:$0xff] }
 0x2b3   : > { %7170 = vmatpush.bf16.msk.msra.mxu1 %vm11168_vm14, %v12445_v42  ;;  %vm1429_vm14 = vcmp.eq.s32.totalorder %v12801_v18, %v10898_v16  ;;  %vm7159_vm11 = vmpackc.low %vm725_vm0, %vm709_vm2  ;;  %v12806_v18 = vld [vmem:[#allocation29_spill] sm:$0xff]  ;;  %vm1318_vm4 = vcmp.eq.s32.totalorder %v12812_v63, %v11206_v58  ;;  %v4595_v63 = vpop.f32.mrf.mxu1  ;;  %v4623_v39 = vpop.f32.mrf.mxu3 }
 0x2b4   : > { %vm997_vm3 = vcmp.eq.s32.totalorder %v12806_v18, %v10898_v16  ;;  %vm7195_vm5 = vmpackc.low %vm1173_vm13, %vm1157_vm8  ;;  %v12811_v18 = vld [vmem:[#allocation52_spill] sm:$0xff]  ;;  %vm677_vm8 = vcmp.eq.s32.totalorder %v12813_v0, %v10898_v16  ;;  %v12814_v12 = vld [vmem:[#allocation53_spill] sm:$0xff]  ;;  %v4596_v0 = vadd.f32 %v4595_v63, %v4582_v36 }
 0x2b5   : > { %vm7211_vm2 = vmpackc.low %vm1429_vm14, %vm1413_vm15  ;;  %vm1141_vm0 = vcmp.eq.s32.totalorder %v12811_v18, %v10898_v16  ;;  %7196 = vmatpush.bf16.msk.msra.mxu2 %vm7195_vm5, %v12445_v42  ;;  %v12817_v18 = vld [vmem:[#allocation48_spill] sm:$0xff]  ;;  %vm1574_vm5 = vcmp.eq.s32.totalorder %v12698_v59, %v11206_v58  ;;  %v4192_v36 = vld [vmem:[#allocation2 + $0x38] sm:$0x1f] }
 0x2b6   : > { %7160 = vmatpush.bf16.msk.msra.mxu0 %vm7159_vm11, %v12445_v42  ;;  %7212 = vmatpush.bf16.msk.msra.mxu3 %vm7211_vm2, %v12445_v42  ;;  %vm7173_vm13 = vmpackc.low %vm1013_vm1, %vm997_vm3  ;;  %vm1381_vm11 = vcmp.eq.s32.totalorder %v12814_v12, %v10898_v16  ;;  %vm1125_vm14 = vcmp.eq.s32.totalorder %v12817_v18, %v10898_v16  ;;  %vm1397_vm2 = vcmp.eq.s32.totalorder %v12614_v8, %v10898_v16  ;;  %v4584_v12 = vpop.f32.mrf.mxu0  ;;  %v4610_v18 = vpop.f32.mrf.mxu2 }
 0x2b7   : > { %7172 = vmatpush.bf16.msk.msra.mxu1 %vm11219_vm7, %v12445_v42  ;;  %vm11303_vm6 = vmpackc.low %vm1334_vm10, %vm1318_vm4  ;;  %vm981_vm3 = vcmp.eq.s32.totalorder %v12482_v61, %v10898_v16  ;;  %vm645_vm10 = vcmp.eq.s32.totalorder %v12465_v25, %v10898_v16  ;;  %v4609_v39 = vadd.f32 %v4608_v13, %v4596_v0  ;;  %v12836_v0 = vld [vmem:[#allocation13_spill] sm:$0xff]  ;;  %v12838_v13 = vld [vmem:[#allocation44_spill] sm:$0xff] }
 0x2b8   : > { %vm7161_vm7 = vmpackc.low %vm693_vm9, %vm677_vm8  ;;  %vm1590_vm9 = vcmp.eq.s32.totalorder %v12699_v38, %v11206_v58  ;;  %vm838_vm8 = vcmp.eq.s32.totalorder %v12505_v30, %v11206_v58  ;;  %v12839_v18 = vld [vmem:[#allocation43_spill] sm:$0xff]  ;;  %v12881_v12 = vld [vmem:[#allocation46_spill] sm:$0xff] }
 0x2b9   : > { %vm7197_vm15 = vmpackc.low %vm1141_vm0, %vm1125_vm14  ;;  %vm965_vm0 = vcmp.eq.s32.totalorder %v12576_v31, %v10898_v16 }
 0x2ba   : > { %7162 = vmatpush.bf16.msk.msra.mxu0 %vm7161_vm7, %v12445_v42  ;;  %vm7213_vm1 = vmpackc.low %vm1397_vm2, %vm1381_vm11  ;;  %7198 = vmatpush.bf16.msk.msra.mxu2 %vm7197_vm15, %v12445_v42  ;;  %vm12820_vm11 = vnez %v12805_v57  ;;  %vm661_vm7 = vcmp.eq.s32.totalorder %v12542_v28, %v10898_v16  ;;  %vm1302_vm2 = vcmp.eq.s32.totalorder %v12580_v50, %v11206_v58  ;;  %v4622_v57 = vadd.f32 %v4621_v5, %v4609_v39  ;;  %v12833_v39 = vld [vmem:[#allocation33_spill] sm:$0xff] }
 0x2bb   : > { %7174 = vmatpush.bf16.msk.msra.mxu1 %vm7173_vm13, %v12445_v42  ;;  %7214 = vmatpush.bf16.msk.msra.mxu3 %vm7213_vm1, %v12445_v42  ;;  %vm11328_vm4 = vmpackc.low %vm1590_vm9, %vm1574_vm5  ;;  %vm854_vm13 = vcmp.eq.s32.totalorder %v12506_v17, %v11206_v58  ;;  %vm1286_vm5 = vcmp.eq.s32.totalorder %v12543_v9, %v11206_v58  ;;  %vm629_vm1 = vcmp.eq.s32.totalorder %v12544_v46, %v10898_v16  ;;  %v4597_v63 = vpop.f32.mrf.mxu1  ;;  %v12837_v5 = vld [vmem:[#allocation57_spill] sm:$0xff] }
 0x2bc   : > { %vm7175_vm14 = vmpackc.low %vm981_vm3, %vm965_vm0  ;;  %vm613_vm3 = vcmp.eq.s32.totalorder %v8136_v32, %v10898_v16  ;;  %vm949_vm9 = vcmp.eq.s32.totalorder %v12512_v22, %v10898_v16  ;;  %v5048_v60 = vadd.f32 %v4622_v57, %v4192_v36  ;;  %v12834_v36 = vld [vmem:[#allocation14_spill] sm:$0xff] }
 0x2bd   : > { %vm7163_vm15 = vmpackc.low %vm661_vm7, %vm645_vm10  ;;  %vm1558_vm7 = vcmp.eq.s32.totalorder %v12549_v35, %v11206_v58  ;;  %4867 = vmatmul.bf16.vlgmr.msra.gmra.mxu2 %v12487_v14  ;;  %v12835_v57 = vld [vmem:[#allocation10_spill] sm:$0xff] }
 0x2be   : > { %7248 = vmatpush.bf16.msk.msrb.mxu2 %vm11259_vm12, %v12445_v42  ;;  %vm933_vm12 = vcmp.eq.s32.totalorder %v12452_v2, %v10898_v16  ;;  %7164 = vmatpush.bf16.msk.msra.mxu0 %vm7163_vm15, %v12445_v42  ;;  %vm11368_vm10 = vmpackc.low %vm854_vm13, %vm838_vm8  ;;  %vm806_vm13 = vcmp.eq.s32.totalorder %v12472_v21, %v11206_v58  ;;  %5064 = vst [vmem:[#allocation2 + $0x38] sm:$0x1f] %v5048_v60  ;;  %v4634_v60 = vpop.f32.mrf.mxu0  ;;  %v4660_v63 = vpop.f32.mrf.mxu2 }
 0x2bf   : > { %7264 = vmatpush.bf16.msk.msrb.mxu3 %vm12820_vm11, %v12445_v42  ;;  %7176 = vmatpush.bf16.msk.msra.mxu1 %vm7175_vm14, %v12445_v42  ;;  %vm11374_vm0 = vmpackc.low %vm1302_vm2, %vm1286_vm5  ;;  %vm1542_vm11 = vcmp.eq.s32.totalorder %v12489_v20, %v11206_v58  ;;  %vm822_vm14 = vcmp.eq.s32.totalorder %v12516_v54, %v11206_v58  ;;  %vm917_vm2 = vcmp.eq.s32.totalorder %v12475_v27, %v10898_v16 }
 0x2c0   : > { %4880 = vmatmul.bf16.vlgmr.msra.gmra.mxu3 %v12515_v52  ;;  %vm7177_vm8 = vmpackc.low %vm949_vm9, %vm933_vm12  ;;  %vm901_vm12 = vcmp.eq.s32.totalorder %v12474_v3, %v10898_v16  ;;  %vm1270_vm9 = vcmp.eq.s32.totalorder %v12460_v34, %v11206_v58 }
 0x2c1   : > { %vm7165_vm5 = vmpackc.low %vm629_vm1, %vm613_vm3  ;;  %vm1254_vm1 = vcmp.eq.s32.totalorder %v12459_v33, %v11206_v58 }
 0x2c2   : > { %7250 = vmatpush.bf16.msk.msrb.mxu2 %vm11303_vm6, %v12445_v42  ;;  %vm1094_vm6 = vcmp.eq.s32.totalorder %v7838_v56, %v11206_v58  ;;  %7166 = vmatpush.bf16.msk.msra.mxu0 %vm7165_vm5, %v12445_v42  ;;  %vm7267_vm15 = vmpackc.low %vm1558_vm7, %vm1542_vm11  ;;  %vm1078_vm11 = vcmp.eq.s32.totalorder %v7894_v24, %v11206_v58  ;;  %vm1510_vm5 = vcmp.eq.s32.totalorder %v7897_v26, %v11206_v58 }
 0x2c3   : > { %7266 = vmatpush.bf16.msk.msrb.mxu3 %vm11328_vm4, %v12445_v42  ;;  %vm1110_vm4 = vcmp.eq.s32.totalorder %v7836_v55, %v11206_v58  ;;  %7178 = vmatpush.bf16.msk.msra.mxu1 %vm7177_vm8, %v12445_v42  ;;  %vm11419_vm3 = vmpackc.low %vm822_vm14, %vm806_vm13  ;;  %vm790_vm13 = vcmp.eq.s32.totalorder %v7927_v41, %v11206_v58 }
 0x2c4   : > { %vm11441_vm7 = vmpackc.low %vm1110_vm4, %vm1094_vm6  ;;  %vm885_vm6 = vcmp.eq.s32.totalorder %v8189_v45, %v10898_v16 }
 0x2c5   : > { %vm7179_vm8 = vmpackc.low %vm917_vm2, %vm901_vm12  ;;  %4841 = vmatmul.bf16.vlgmr.msra.gmra.mxu0 %v8183_v43  ;;  %vm774_vm12 = vcmp.eq.s32.totalorder %v7858_v4, %v11206_v58  ;;  %vm1238_vm2 = vcmp.eq.s32.totalorder %v7977_v53, %v11206_v58 }
 0x2c6   : > { %7216 = vmatpush.bf16.msk.msrb.mxu0 %vm11368_vm10, %v12445_v42  ;;  %7252 = vmatpush.bf16.msk.msrb.mxu2 %vm11374_vm0, %v12445_v42  ;;  %vm1526_vm10 = vcmp.eq.s32.totalorder %v12461_v11, %v11206_v58  ;;  %vm1062_vm0 = vcmp.eq.s32.totalorder %v7821_v49, %v11206_v58  ;;  %vm7253_vm14 = vmpackc.low %vm1270_vm9, %vm1254_vm1  ;;  %vm869_vm1 = vcmp.eq.s32.totalorder %v8179_v10, %v10898_v16  ;;  %v11493_v16 = vadd.s32 1792, %v7777_v19 }
 0x2c7   : > { %7268 = vmatpush.bf16.msk.msrb.mxu3 %vm7267_vm15, %v12445_v42  ;;  %7180 = vmatpush.bf16.msk.msra.mxu1 %vm7179_vm8, %v12445_v42  ;;  %vm11455_vm4 = vmpackc.low %vm1078_vm11, %vm1062_vm0  ;;  %vm1030_vm8 = vcmp.eq.s32.totalorder %v12753_v51, %v11206_v58 }
 0x2c8   : > { %vm7269_vm15 = vmpackc.low %vm1526_vm10, %vm1510_vm5  ;;  %vm1222_vm10 = vcmp.eq.s32.totalorder %v7939_v1, %v11206_v58  ;;  %vm742_vm5 = vcmp.eq.s32.totalorder %v7954_v48, %v11206_v58 }
 0x2c9   : > { %vm7219_vm9 = vmpackc.low %vm790_vm13, %vm774_vm12  ;;  %vm758_vm12 = vcmp.eq.s32.totalorder %v12713_v47, %v11206_v58 }
 0x2ca   : > { %7218 = vmatpush.bf16.msk.msrb.mxu0 %vm11419_vm3, %v12445_v42  ;;  %7254 = vmatpush.bf16.msk.msrb.mxu2 %vm7253_vm14, %v12445_v42  ;;  %vm1478_vm3 = vcmp.eq.s32.totalorder %v12462_v7, %v11206_v58  ;;  %vm7181_vm11 = vmpackc.low %vm885_vm6, %vm869_vm1  ;;  %vm1494_vm14 = vcmp.eq.s32.totalorder %v7950_v44, %v11206_v58  ;;  %vm1190_vm6 = vcmp.eq.s32.totalorder %v8004_v62, %v11206_v58 }
 0x2cb   : > { %7270 = vmatpush.bf16.msk.msrb.mxu3 %vm7269_vm15, %v12445_v42  ;;  %7182 = vmatpush.bf16.msk.msra.mxu1 %vm7181_vm11, %v12445_v42  ;;  %vm7255_vm0 = vmpackc.low %vm1238_vm2, %vm1222_vm10  ;;  %vm1046_vm15 = vcmp.eq.s32.totalorder %v12758_v15, %v11206_v58  ;;  %vm1462_vm2 = vcmp.eq.s32.totalorder %v12714_v29, %v11206_v58  ;;  %vm1367_vm11 = vcmp.eq.s32.totalorder %v12834_v36, %v11493_v16  ;;  %v4193_v29 = vld [vmem:[#allocation2 + $0x40] sm:$0x1f] }
 0x2cc   : > { %vm7271_vm13 = vmpackc.low %vm1494_vm14, %vm1478_vm3  ;;  %vm1206_vm3 = vcmp.eq.s32.totalorder %v12833_v39, %v11206_v58  ;;  %vm1607_vm10 = vcmp.eq.s32.totalorder %v12835_v57, %v11493_v16  ;;  %vm710_vm14 = vcmp.eq.s32.totalorder %v12680_v40, %v11206_v58  ;;  %v4673_v39 = vpop.f32.mrf.mxu3  ;;  %v12850_v57 = vld [vmem:[#allocation41_spill] sm:$0xff] }
 0x2cd   : > { %vm11506_vm1 = vmpackc.low %vm1046_vm15, %vm1030_vm8  ;;  %vm1174_vm15 = vcmp.eq.s32.totalorder %v12839_v18, %v11206_v58  ;;  %v12847_v18 = vld [vmem:[#allocation30_spill] sm:$0xff] }
 0x2ce   : > { %7220 = vmatpush.bf16.msk.msrb.mxu0 %vm7219_vm9, %v12445_v42  ;;  %7256 = vmatpush.bf16.msk.msrb.mxu2 %vm7255_vm0, %v12445_v42  ;;  %vm7221_vm9 = vmpackc.low %vm758_vm12, %vm742_vm5  ;;  %vm1623_vm0 = vcmp.eq.s32.totalorder %v12836_v0, %v11493_v16  ;;  %vm726_vm5 = vcmp.eq.s32.totalorder %v12797_v23, %v11206_v58  ;;  %v12849_v0 = vld [vmem:[#allocation42_spill] sm:$0xff] }
 0x2cf   : > { %7232 = vmatpush.bf16.msk.msrb.mxu1 %vm11441_vm7, %v12445_v42  ;;  %7272 = vmatpush.bf16.msk.msrb.mxu3 %vm7271_vm13, %v12445_v42  ;;  %vm1446_vm7 = vcmp.eq.s32.totalorder %v8022_v6, %v11206_v58  ;;  %vm7257_vm8 = vmpackc.low %vm1206_vm3, %vm1190_vm6  ;;  %vm1158_vm6 = vcmp.eq.s32.totalorder %v12838_v13, %v11206_v58  ;;  %v12848_v13 = vld [vmem:[#allocation17_spill] sm:$0xff] }
 0x2d0   : > { %4854 = vmatmul.bf16.vlgmr.msra.gmra.mxu1 %v12837_v5  ;;  %vm7273_vm13 = vmpackc.low %vm1462_vm2, %vm1446_vm7  ;;  %v12840_v5 = vld [vmem:[#allocation11_spill] sm:$0xff] }
 0x2d1   : > { %vm1351_vm12 = vcmp.eq.s32.totalorder %v12840_v5, %v11493_v16  ;;  %vm11559_vm2 = vmpackc.low %vm1623_vm0, %vm1607_vm10  ;;  %v12844_v5 = vmov 0  ;;  %vm1414_vm0 = vcmp.eq.s32.totalorder %v12849_v0, %v11206_v58  ;;  %v12853_v0 = vld [vmem:[#allocation36_spill] sm:$0xff] }
 0x2d2   : > { %7222 = vmatpush.bf16.msk.msrb.mxu0 %vm7221_vm9, %v12445_v42  ;;  %7258 = vmatpush.bf16.msk.msrb.mxu2 %vm7257_vm8, %v12445_v42  ;;  %vm11549_vm7 = vmpackc.low %vm1367_vm11, %vm1351_vm12  ;;  %v12845_v5 = vsel %vm11559_vm2, 4294967295, %v12844_v5  ;;  %vm1014_vm11 = vcmp.eq.s32.totalorder %v12847_v18, %v11206_v58  ;;  %vm1335_vm8 = vcmp.eq.s32.totalorder %v12848_v13, %v11493_v16  ;;  %v12852_v18 = vld [vmem:[#allocation9_spill] sm:$0xff] }
 0x2d3   : > { %7234 = vmatpush.bf16.msk.msrb.mxu1 %vm11455_vm4, %v12445_v42  ;;  %7274 = vmatpush.bf16.msk.msrb.mxu3 %vm7273_vm13, %v12445_v42  ;;  %vm1430_vm4 = vcmp.eq.s32.totalorder %v12841_v37, %v11206_v58  ;;  %vm7223_vm9 = vmpackc.low %vm726_vm5, %vm710_vm14  ;;  %v12846_v37 = vld [vmem:[#allocation29_spill] sm:$0xff]  ;;  %vm694_vm13 = vcmp.eq.s32.totalorder %v12850_v57, %v11206_v58  ;;  %vm1319_vm12 = vcmp.eq.s32.totalorder %v12852_v18, %v11493_v16  ;;  %v4662_v18 = vpop.f32.mrf.mxu2 }
 0x2d4   : > { %vm998_vm3 = vcmp.eq.s32.totalorder %v12846_v37, %v11206_v58  ;;  %vm7259_vm10 = vmpackc.low %vm1174_vm15, %vm1158_vm6  ;;  %v12851_v37 = vld [vmem:[#allocation52_spill] sm:$0xff]  ;;  %vm678_vm6 = vcmp.eq.s32.totalorder %v12853_v0, %v11206_v58  ;;  %v12854_v57 = vld [vmem:[#allocation53_spill] sm:$0xff]  ;;  %v4647_v0 = vpop.f32.mrf.mxu1  ;;  %v4675_v13 = vpop.f32.mrf.mxu3 }
 0x2d5   : > { %vm7275_vm14 = vmpackc.low %vm1430_vm4, %vm1414_vm0  ;;  %vm1142_vm5 = vcmp.eq.s32.totalorder %v12851_v37, %v11206_v58  ;;  %v12857_v37 = vld [vmem:[#allocation48_spill] sm:$0xff]  ;;  %v12879_v18 = vld [vmem:[#allocation43_spill] sm:$0xff] }
 0x2d6   : > { %7224 = vmatpush.bf16.msk.msrb.mxu0 %vm7223_vm9, %v12445_v42  ;;  %7260 = vmatpush.bf16.msk.msrb.mxu2 %vm7259_vm10, %v12445_v42  ;;  %vm7237_vm15 = vmpackc.low %vm1014_vm11, %vm998_vm3  ;;  %vm1382_vm9 = vcmp.eq.s32.totalorder %v12854_v57, %v11206_v58  ;;  %vm1126_vm4 = vcmp.eq.s32.totalorder %v12857_v37, %v11206_v58  ;;  %vm1575_vm10 = vcmp.eq.s32.totalorder %v12698_v59, %v11493_v16  ;;  %v4636_v57 = vpop.f32.mrf.mxu0 }
 0x2d7   : > { %7236 = vmatpush.bf16.msk.msrb.mxu1 %vm11506_vm1, %v12445_v42  ;;  %7276 = vmatpush.bf16.msk.msrb.mxu3 %vm7275_vm14, %v12445_v42  ;;  %vm11593_vm2 = vmpackc.low %vm1335_vm8, %vm1319_vm12  ;;  %vm1398_vm14 = vcmp.eq.s32.totalorder %v12614_v8, %v11206_v58  ;;  %vm982_vm3 = vcmp.eq.s32.totalorder %v12482_v61, %v11206_v58  ;;  %vm646_vm8 = vcmp.eq.s32.totalorder %v12465_v25, %v11206_v58  ;;  %v12871_v57 = vld [vmem:[#allocation39_spill] sm:$0xff] }
 0x2d8   : > { %vm7225_vm1 = vmpackc.low %vm694_vm13, %vm678_vm6  ;;  %vm1591_vm13 = vcmp.eq.s32.totalorder %v12699_v38, %v11493_v16  ;;  %v4648_v37 = vadd.f32 %v4647_v0, %v4634_v60  ;;  %vm839_vm6 = vcmp.eq.s32.totalorder %v12505_v30, %v11493_v16 }
 0x2d9   : > { %vm7261_vm0 = vmpackc.low %vm1142_vm5, %vm1126_vm4  ;;  %vm966_vm5 = vcmp.eq.s32.totalorder %v12576_v31, %v11206_v58 }
 0x2da   : > { %7226 = vmatpush.bf16.msk.msrb.mxu0 %vm7225_vm1, %v12445_v42  ;;  %vm7277_vm11 = vmpackc.low %vm1398_vm14, %vm1382_vm9  ;;  %7262 = vmatpush.bf16.msk.msrb.mxu2 %vm7261_vm0, %v12445_v42  ;;  %vm12860_vm9 = vnez %v12845_v5  ;;  %vm662_vm1 = vcmp.eq.s32.totalorder %v12542_v28, %v11206_v58  ;;  %v4661_v0 = vadd.f32 %v4660_v63, %v4648_v37  ;;  %vm1303_vm14 = vcmp.eq.s32.totalorder %v12580_v50, %v11493_v16  ;;  %v12876_v5 = vld [vmem:[#allocation13_spill] sm:$0xff]  ;;  %v12880_v37 = vld [vmem:[#allocation11_spill] sm:$0xff] }
 0x2db   : > { %7238 = vmatpush.bf16.msk.msrb.mxu1 %vm7237_vm15, %v12445_v42  ;;  %7278 = vmatpush.bf16.msk.msrb.mxu3 %vm7277_vm11, %v12445_v42  ;;  %vm11618_vm12 = vmpackc.low %vm1591_vm13, %vm1575_vm10  ;;  %vm855_vm15 = vcmp.eq.s32.totalorder %v12506_v17, %v11493_v16  ;;  %vm1287_vm10 = vcmp.eq.s32.totalorder %v12543_v9, %v11493_v16  ;;  %vm630_vm11 = vcmp.eq.s32.totalorder %v12544_v46, %v11206_v58 }
 0x2dc   : > { %vm7239_vm4 = vmpackc.low %vm982_vm3, %vm966_vm5  ;;  %vm614_vm3 = vcmp.eq.s32.totalorder %v8136_v32, %v11206_v58  ;;  %v4674_v60 = vadd.f32 %v4673_v39, %v4661_v0  ;;  %vm950_vm13 = vcmp.eq.s32.totalorder %v12512_v22, %v11206_v58  ;;  %v4649_v13 = vpop.f32.mrf.mxu1 }
 0x2dd   : > { %vm7227_vm0 = vmpackc.low %vm662_vm1, %vm646_vm8  ;;  %vm1559_vm1 = vcmp.eq.s32.totalorder %v12549_v35, %v11493_v16  ;;  %4919 = vmatmul.bf16.vlgmr.msrb.gmra.mxu2 %v12487_v14  ;;  %v12878_v13 = vld [vmem:[#allocation44_spill] sm:$0xff] }
 0x2de   : > { %7312 = vmatpush.bf16.msk.msra.mxu2 %vm11549_vm7, %v12445_v42  ;;  %vm934_vm7 = vcmp.eq.s32.totalorder %v12452_v2, %v11206_v58  ;;  %7228 = vmatpush.bf16.msk.msrb.mxu0 %vm7227_vm0, %v12445_v42  ;;  %vm11658_vm8 = vmpackc.low %vm855_vm15, %vm839_vm6  ;;  %vm807_vm15 = vcmp.eq.s32.totalorder %v12472_v21, %v11493_v16  ;;  %v5049_v39 = vadd.f32 %v4674_v60, %v4193_v29  ;;  %v12875_v29 = vld [vmem:[#allocation10_spill] sm:$0xff]  ;;  %v12877_v60 = vld [vmem:[#allocation57_spill] sm:$0xff] }
 0x2df   : > { %7328 = vmatpush.bf16.msk.msra.mxu3 %vm12860_vm9, %v12445_v42  ;;  %7240 = vmatpush.bf16.msk.msrb.mxu1 %vm7239_vm4, %v12445_v42  ;;  %vm11664_vm5 = vmpackc.low %vm1303_vm14, %vm1287_vm10  ;;  %vm1543_vm9 = vcmp.eq.s32.totalorder %v12489_v20, %v11493_v16  ;;  %vm823_vm4 = vcmp.eq.s32.totalorder %v12516_v54, %v11493_v16  ;;  %vm1111_vm10 = vcmp.eq.s32.totalorder %v7836_v55, %v11493_v16  ;;  %v4686_v63 = vpop.f32.mrf.mxu0 }
 0x2e0   : > { %4932 = vmatmul.bf16.vlgmr.msrb.gmra.mxu3 %v12515_v52  ;;  %vm7241_vm6 = vmpackc.low %vm950_vm13, %vm934_vm7  ;;  %vm902_vm7 = vcmp.eq.s32.totalorder %v12474_v3, %v11206_v58  ;;  %vm918_vm14 = vcmp.eq.s32.totalorder %v12475_v27, %v11206_v58  ;;  %5065 = vst [vmem:[#allocation2 + $0x40] sm:$0x1f] %v5049_v39  ;;  %vm1271_vm13 = vcmp.eq.s32.totalorder %v12460_v34, %v11493_v16  ;;  %v4712_v39 = vpop.f32.mrf.mxu2 }
 0x2e1   : > { %vm7331_vm0 = vmpackc.low %vm1559_vm1, %vm1543_vm9  ;;  %vm1079_vm9 = vcmp.eq.s32.totalorder %v7894_v24, %v11493_v16 }
 0x2e2   : > { %7314 = vmatpush.bf16.msk.msra.mxu2 %vm11593_vm2, %v12445_v42  ;;  %vm7229_vm2 = vmpackc.low %vm630_vm11, %vm614_vm3  ;;  %vm1255_vm11 = vcmp.eq.s32.totalorder %v12459_v33, %v11493_v16 }
 0x2e3   : > { %7330 = vmatpush.bf16.msk.msra.mxu3 %vm11618_vm12, %v12445_v42  ;;  %vm1095_vm12 = vcmp.eq.s32.totalorder %v7838_v56, %v11493_v16  ;;  %7230 = vmatpush.bf16.msk.msrb.mxu0 %vm7229_vm2, %v12445_v42  ;;  %vm11712_vm3 = vmpackc.low %vm823_vm4, %vm807_vm15  ;;  %vm791_vm15 = vcmp.eq.s32.totalorder %v7927_v41, %v11493_v16  ;;  %vm1511_vm2 = vcmp.eq.s32.totalorder %v7897_v26, %v11493_v16 }
 0x2e4   : > { %7242 = vmatpush.bf16.msk.msrb.mxu1 %vm7241_vm6, %v12445_v42  ;;  %vm11734_vm1 = vmpackc.low %vm1111_vm10, %vm1095_vm12  ;;  %vm886_vm12 = vcmp.eq.s32.totalorder %v8189_v45, %v11206_v58 }
 0x2e5   : > { %vm7243_vm6 = vmpackc.low %vm918_vm14, %vm902_vm7  ;;  %vm775_vm7 = vcmp.eq.s32.totalorder %v7858_v4, %v11493_v16  ;;  %vm1239_vm14 = vcmp.eq.s32.totalorder %v7977_v53, %v11493_v16 }
 0x2e6   : > { %7316 = vmatpush.bf16.msk.msra.mxu2 %vm11664_vm5, %v12445_v42  ;;  %vm1063_vm5 = vcmp.eq.s32.totalorder %v7821_v49, %v11493_v16  ;;  %4893 = vmatmul.bf16.vlgmr.msrb.gmra.mxu0 %v8183_v43  ;;  %vm7317_vm4 = vmpackc.low %vm1271_vm13, %vm1255_vm11  ;;  %vm870_vm11 = vcmp.eq.s32.totalorder %v8179_v10, %v11206_v58  ;;  %v11786_v58 = vadd.s32 1920, %v7777_v19  ;;  %v12874_v19 = vld [vmem:[#allocation33_spill] sm:$0xff] }
 0x2e7   : > { %7280 = vmatpush.bf16.msk.msra.mxu0 %vm11658_vm8, %v12445_v42  ;;  %7332 = vmatpush.bf16.msk.msra.mxu3 %vm7331_vm0, %v12445_v42  ;;  %vm1527_vm8 = vcmp.eq.s32.totalorder %v12461_v11, %v11493_v16  ;;  %vm11748_vm10 = vmpackc.low %vm1079_vm9, %vm1063_vm5 }
 0x2e8   : > { %7244 = vmatpush.bf16.msk.msrb.mxu1 %vm7243_vm6, %v12445_v42  ;;  %vm7333_vm0 = vmpackc.low %vm1527_vm8, %vm1511_vm2  ;;  %vm1223_vm8 = vcmp.eq.s32.totalorder %v7939_v1, %v11493_v16  ;;  %vm1031_vm6 = vcmp.eq.s32.totalorder %v12753_v51, %v11493_v16  ;;  %vm743_vm2 = vcmp.eq.s32.totalorder %v7954_v48, %v11493_v16 }
 0x2e9   : > { %vm7283_vm13 = vmpackc.low %vm791_vm15, %vm775_vm7  ;;  %vm759_vm7 = vcmp.eq.s32.totalorder %v12713_v47, %v11493_v16 }
 0x2ea   : > { %7318 = vmatpush.bf16.msk.msra.mxu2 %vm7317_vm4, %v12445_v42  ;;  %vm7245_vm9 = vmpackc.low %vm886_vm12, %vm870_vm11  ;;  %vm1495_vm4 = vcmp.eq.s32.totalorder %v7950_v44, %v11493_v16  ;;  %vm1191_vm12 = vcmp.eq.s32.totalorder %v8004_v62, %v11493_v16 }
 0x2eb   : > { %7282 = vmatpush.bf16.msk.msra.mxu0 %vm11712_vm3, %v12445_v42  ;;  %7334 = vmatpush.bf16.msk.msra.mxu3 %vm7333_vm0, %v12445_v42  ;;  %vm1479_vm3 = vcmp.eq.s32.totalorder %v12462_v7, %v11493_v16  ;;  %vm7319_vm5 = vmpackc.low %vm1239_vm14, %vm1223_vm8  ;;  %vm1047_vm0 = vcmp.eq.s32.totalorder %v12758_v15, %v11493_v16  ;;  %vm1463_vm14 = vcmp.eq.s32.totalorder %v12871_v57, %v11493_v16  ;;  %v4725_v15 = vpop.f32.mrf.mxu3 }
 0x2ec   : > { %7246 = vmatpush.bf16.msk.msrb.mxu1 %vm7245_vm9, %v12445_v42  ;;  %vm7335_vm15 = vmpackc.low %vm1495_vm4, %vm1479_vm3  ;;  %vm1207_vm3 = vcmp.eq.s32.totalorder %v12874_v19, %v11493_v16  ;;  %vm1368_vm9 = vcmp.eq.s32.totalorder %v12834_v36, %v11786_v58  ;;  %vm1608_vm8 = vcmp.eq.s32.totalorder %v12875_v29, %v11786_v58  ;;  %vm711_vm4 = vcmp.eq.s32.totalorder %v12680_v40, %v11493_v16  ;;  %v12886_v36 = vld [vmem:[#allocation29_spill] sm:$0xff] }
 0x2ed   : > { %vm11799_vm11 = vmpackc.low %vm1047_vm0, %vm1031_vm6  ;;  %vm1175_vm0 = vcmp.eq.s32.totalorder %v12879_v18, %v11493_v16  ;;  %v12888_v29 = vld [vmem:[#allocation17_spill] sm:$0xff] }
 0x2ee   : > { %7320 = vmatpush.bf16.msk.msra.mxu2 %vm7319_vm5, %v12445_v42  ;;  %vm1624_vm5 = vcmp.eq.s32.totalorder %v12876_v5, %v11786_v58  ;;  %vm7321_vm6 = vmpackc.low %vm1207_vm3, %vm1191_vm12  ;;  %vm1159_vm12 = vcmp.eq.s32.totalorder %v12878_v13, %v11493_v16  ;;  %vm999_vm3 = vcmp.eq.s32.totalorder %v12886_v36, %v11493_v16  ;;  %v12889_v5 = vld [vmem:[#allocation42_spill] sm:$0xff]  ;;  %v12890_v18 = vld [vmem:[#allocation41_spill] sm:$0xff] }
 0x2ef   : > { %7284 = vmatpush.bf16.msk.msra.mxu0 %vm7283_vm13, %v12445_v42  ;;  %7336 = vmatpush.bf16.msk.msra.mxu3 %vm7335_vm15, %v12445_v42  ;;  %vm7285_vm13 = vmpackc.low %vm759_vm7, %vm743_vm2  ;;  %vm727_vm2 = vcmp.eq.s32.totalorder %v12797_v23, %v11493_v16  ;;  %vm1352_vm7 = vcmp.eq.s32.totalorder %v12880_v37, %v11786_v58  ;;  %v12884_v37 = vmov 0  ;;  %v12891_v36 = vld [vmem:[#allocation52_spill] sm:$0xff] }
 0x2f0   : > { %7296 = vmatpush.bf16.msk.msra.mxu1 %vm11734_vm1, %v12445_v42  ;;  %vm1447_vm1 = vcmp.eq.s32.totalorder %v8022_v6, %v11493_v16 }
 0x2f1   : > { %4906 = vmatmul.bf16.vlgmr.msrb.gmra.mxu1 %v12877_v60  ;;  %vm7337_vm15 = vmpackc.low %vm1463_vm14, %vm1447_vm1 }
 0x2f2   : > { %7322 = vmatpush.bf16.msk.msra.mxu2 %vm7321_vm6, %v12445_v42  ;;  %vm11842_vm1 = vmpackc.low %vm1368_vm9, %vm1352_vm7  ;;  %vm1336_vm6 = vcmp.eq.s32.totalorder %v12888_v29, %v11786_v58  ;;  %v12893_v29 = vld [vmem:[#allocation36_spill] sm:$0xff] }
 0x2f3   : > { %7286 = vmatpush.bf16.msk.msra.mxu0 %vm7285_vm13, %v12445_v42  ;;  %7338 = vmatpush.bf16.msk.msra.mxu3 %vm7337_vm15, %v12445_v42  ;;  %vm11852_vm14 = vmpackc.low %vm1624_vm5, %vm1608_vm8  ;;  %vm1415_vm5 = vcmp.eq.s32.totalorder %v12889_v5, %v11493_v16  ;;  %vm695_vm15 = vcmp.eq.s32.totalorder %v12890_v18, %v11493_v16  ;;  %v12894_v18 = vld [vmem:[#allocation53_spill] sm:$0xff]  ;;  %v4727_v5 = vpop.f32.mrf.mxu3 }
 0x2f4   : > { %7298 = vmatpush.bf16.msk.msra.mxu1 %vm11748_vm10, %v12445_v42  ;;  %vm1431_vm10 = vcmp.eq.s32.totalorder %v12881_v12, %v11493_v16  ;;  %v12885_v37 = vsel %vm11852_vm14, 4294967295, %v12884_v37  ;;  %vm7287_vm13 = vmpackc.low %vm727_vm2, %vm711_vm4  ;;  %v12887_v12 = vld [vmem:[#allocation30_spill] sm:$0xff]  ;;  %vm1143_vm2 = vcmp.eq.s32.totalorder %v12891_v36, %v11493_v16  ;;  %v12897_v36 = vld [vmem:[#allocation48_spill] sm:$0xff] }
 0x2f5   : > { %vm1015_vm9 = vcmp.eq.s32.totalorder %v12887_v12, %v11493_v16  ;;  %vm7323_vm8 = vmpackc.low %vm1175_vm0, %vm1159_vm12  ;;  %v12892_v12 = vld [vmem:[#allocation9_spill] sm:$0xff]  ;;  %vm679_vm12 = vcmp.eq.s32.totalorder %v12893_v29, %v11493_v16  ;;  %v4714_v29 = vpop.f32.mrf.mxu2 }
 0x2f6   : > { %vm7339_vm4 = vmpackc.low %vm1431_vm10, %vm1415_vm5  ;;  %vm1320_vm7 = vcmp.eq.s32.totalorder %v12892_v12, %v11786_v58  ;;  %7324 = vmatpush.bf16.msk.msra.mxu2 %vm7323_vm8, %v12445_v42  ;;  %vm1127_vm10 = vcmp.eq.s32.totalorder %v12897_v36, %v11493_v16  ;;  %vm1576_vm8 = vcmp.eq.s32.totalorder %v12698_v59, %v11786_v58  ;;  %v4699_v12 = vpop.f32.mrf.mxu1 }
 0x2f7   : > { %7288 = vmatpush.bf16.msk.msra.mxu0 %vm7287_vm13, %v12445_v42  ;;  %7340 = vmatpush.bf16.msk.msra.mxu3 %vm7339_vm4, %v12445_v42  ;;  %vm7301_vm0 = vmpackc.low %vm1015_vm9, %vm999_vm3  ;;  %vm1383_vm13 = vcmp.eq.s32.totalorder %v12894_v18, %v11493_v16  ;;  %vm1399_vm4 = vcmp.eq.s32.totalorder %v12614_v8, %v11493_v16  ;;  %vm983_vm3 = vcmp.eq.s32.totalorder %v12482_v61, %v11493_v16  ;;  %v4688_v18 = vpop.f32.mrf.mxu0 }
 0x2f8   : > { %7300 = vmatpush.bf16.msk.msra.mxu1 %vm11799_vm11, %v12445_v42  ;;  %vm11886_vm14 = vmpackc.low %vm1336_vm6, %vm1320_vm7  ;;  %vm647_vm6 = vcmp.eq.s32.totalorder %v12465_v25, %v11493_v16  ;;  %v4700_v36 = vadd.f32 %v4699_v12, %v4686_v63 }
 0x2f9   : > { %vm7289_vm11 = vmpackc.low %vm695_vm15, %vm679_vm12  ;;  %vm1592_vm15 = vcmp.eq.s32.totalorder %v12699_v38, %v11786_v58  ;;  %vm840_vm12 = vcmp.eq.s32.totalorder %v12505_v30, %v11786_v58  ;;  %v4194_v38 = vld [vmem:[#allocation2 + $0x48] sm:$0x1f] }
 0x2fa   : > { %vm7325_vm5 = vmpackc.low %vm1143_vm2, %vm1127_vm10  ;;  %vm967_vm2 = vcmp.eq.s32.totalorder %v12576_v31, %v11493_v16  ;;  %v4713_v59 = vadd.f32 %v4712_v39, %v4700_v36 }
 0x2fb   : > { %7290 = vmatpush.bf16.msk.msra.mxu0 %vm7289_vm11, %v12445_v42  ;;  %vm7341_vm9 = vmpackc.low %vm1399_vm4, %vm1383_vm13  ;;  %7326 = vmatpush.bf16.msk.msra.mxu2 %vm7325_vm5, %v12445_v42  ;;  %vm12900_vm13 = vnez %v12885_v37  ;;  %vm663_vm11 = vcmp.eq.s32.totalorder %v12542_v28, %v11493_v16  ;;  %vm1304_vm4 = vcmp.eq.s32.totalorder %v12580_v50, %v11786_v58 }
 0x2fc   : > { %7302 = vmatpush.bf16.msk.msra.mxu1 %vm7301_vm0, %v12445_v42  ;;  %7342 = vmatpush.bf16.msk.msra.mxu3 %vm7341_vm9, %v12445_v42  ;;  %vm11911_vm7 = vmpackc.low %vm1592_vm15, %vm1576_vm8  ;;  %vm856_vm0 = vcmp.eq.s32.totalorder %v12506_v17, %v11786_v58  ;;  %vm1288_vm8 = vcmp.eq.s32.totalorder %v12543_v9, %v11786_v58  ;;  %vm631_vm9 = vcmp.eq.s32.totalorder %v12544_v46, %v11493_v16 }
 0x2fd   : > { %vm7303_vm10 = vmpackc.low %vm983_vm3, %vm967_vm2  ;;  %vm615_vm3 = vcmp.eq.s32.totalorder %v8136_v32, %v11493_v16  ;;  %v4726_v50 = vadd.f32 %v4725_v15, %v4713_v59  ;;  %vm951_vm15 = vcmp.eq.s32.totalorder %v12512_v22, %v11493_v16 }
 0x2fe   : > { %vm7291_vm5 = vmpackc.low %vm663_vm11, %vm647_vm6  ;;  %vm824_vm11 = vcmp.eq.s32.totalorder %v12516_v54, %v11786_v58  ;;  %4971 = vmatmul.bf16.vlgmr.msra.gmra.mxu2 %v12487_v14  ;;  %v4701_v30 = vpop.f32.mrf.mxu1 }
 0x2ff   : > { %7376 = vmatpush.bf16.msk.msrb.mxu2 %vm11842_vm1, %v12445_v42  ;;  %vm935_vm1 = vcmp.eq.s32.totalorder %v12452_v2, %v11493_v16  ;;  %7292 = vmatpush.bf16.msk.msra.mxu0 %vm7291_vm5, %v12445_v42  ;;  %vm11951_vm6 = vmpackc.low %vm856_vm0, %vm840_vm12  ;;  %vm1544_vm0 = vcmp.eq.s32.totalorder %v12489_v20, %v11786_v58  ;;  %v5050_v17 = vadd.f32 %v4726_v50, %v4194_v38 }
 0x300   : > { %7392 = vmatpush.bf16.msk.msrb.mxu3 %vm12900_vm13, %v12445_v42  ;;  %7304 = vmatpush.bf16.msk.msra.mxu1 %vm7303_vm10, %v12445_v42  ;;  %vm11957_vm2 = vmpackc.low %vm1304_vm4, %vm1288_vm8  ;;  %vm808_vm13 = vcmp.eq.s32.totalorder %v12472_v21, %v11786_v58  ;;  %vm1560_vm10 = vcmp.eq.s32.totalorder %v12549_v35, %v11786_v58  ;;  %vm1112_vm8 = vcmp.eq.s32.totalorder %v7836_v55, %v11786_v58  ;;  %v4738_v55 = vpop.f32.mrf.mxu0 }
 0x301   : > { %4984 = vmatmul.bf16.vlgmr.msra.gmra.mxu3 %v12515_v52  ;;  %vm7305_vm12 = vmpackc.low %vm951_vm15, %vm935_vm1  ;;  %vm903_vm5 = vcmp.eq.s32.totalorder %v12474_v3, %v11493_v16  ;;  %vm919_vm1 = vcmp.eq.s32.totalorder %v12475_v27, %v11493_v16  ;;  %5066 = vst [vmem:[#allocation2 + $0x48] sm:$0x1f] %v5050_v17  ;;  %vm1272_vm15 = vcmp.eq.s32.totalorder %v12460_v34, %v11786_v58  ;;  %v12913_v34 = vld [vmem:[#allocation29_spill] sm:$0xff]  ;;  %v4198_v17 = vld [vmem:[#allocation2 + $0x68] sm:$0x1f] }
 0x302   : > { %vm12002_vm4 = vmpackc.low %vm824_vm11, %vm808_vm13  ;;  %vm1528_vm13 = vcmp.eq.s32.totalorder %v12461_v11, %v11786_v58  ;;  %v12911_v11 = vld [vmem:[#allocation43_spill] sm:$0xff] }
 0x303   : > { %7378 = vmatpush.bf16.msk.msrb.mxu2 %vm11886_vm14, %v12445_v42  ;;  %vm7293_vm14 = vmpackc.low %vm631_vm9, %vm615_vm3  ;;  %vm1256_vm9 = vcmp.eq.s32.totalorder %v12459_v33, %v11786_v58 }
 0x304   : > { %7394 = vmatpush.bf16.msk.msrb.mxu3 %vm11911_vm7, %v12445_v42  ;;  %vm1096_vm7 = vcmp.eq.s32.totalorder %v7838_v56, %v11786_v58  ;;  %7294 = vmatpush.bf16.msk.msra.mxu0 %vm7293_vm14, %v12445_v42  ;;  %vm7395_vm3 = vmpackc.low %vm1560_vm10, %vm1544_vm0  ;;  %vm1512_vm0 = vcmp.eq.s32.totalorder %v7897_v26, %v11786_v58  ;;  %vm887_vm10 = vcmp.eq.s32.totalorder %v8189_v45, %v11493_v16  ;;  %v4764_v56 = vpop.f32.mrf.mxu2  ;;  %v12912_v26 = vld [vmem:[#allocation46_spill] sm:$0xff] }
 0x305   : > { %7306 = vmatpush.bf16.msk.msra.mxu1 %vm7305_vm12, %v12445_v42  ;;  %vm7307_vm11 = vmpackc.low %vm919_vm1, %vm903_vm5  ;;  %vm792_vm12 = vcmp.eq.s32.totalorder %v7927_v41, %v11786_v58  ;;  %vm871_vm5 = vcmp.eq.s32.totalorder %v8179_v10, %v11493_v16  ;;  %v12914_v41 = vld [vmem:[#allocation30_spill] sm:$0xff] }
 0x306   : > { %vm7397_vm14 = vmpackc.low %vm1528_vm13, %vm1512_vm0  ;;  %vm1064_vm0 = vcmp.eq.s32.totalorder %v7821_v49, %v11786_v58  ;;  %v12909_v49 = vld [vmem:[#allocation25_spill] sm:$0xff] }
 0x307   : > { %7380 = vmatpush.bf16.msk.msrb.mxu2 %vm11957_vm2, %v12445_v42  ;;  %4945 = vmatmul.bf16.vlgmr.msra.gmra.mxu0 %v8183_v43  ;;  %vm7381_vm2 = vmpackc.low %vm1272_vm15, %vm1256_vm9  ;;  %vm1080_vm15 = vcmp.eq.s32.totalorder %v7894_v24, %v11786_v58  ;;  %v4777_v24 = vpop.f32.mrf.mxu3 }
 0x308   : > { %7344 = vmatpush.bf16.msk.msrb.mxu0 %vm11951_vm6, %v12445_v42  ;;  %7396 = vmatpush.bf16.msk.msrb.mxu3 %vm7395_vm3, %v12445_v42  ;;  %vm12025_vm6 = vmpackc.low %vm1112_vm8, %vm1096_vm7  ;;  %vm776_vm7 = vcmp.eq.s32.totalorder %v7858_v4, %v11786_v58  ;;  %vm1240_vm8 = vcmp.eq.s32.totalorder %v7977_v53, %v11786_v58  ;;  %vm1480_vm3 = vcmp.eq.s32.totalorder %v12462_v7, %v11786_v58  ;;  %v12910_v4 = vld [vmem:[#allocation20_spill] sm:$0xff]  ;;  %v4740_v21 = vpop.f32.mrf.mxu0 }
 0x309   : > { %7308 = vmatpush.bf16.msk.msra.mxu1 %vm7307_vm11, %v12445_v42  ;;  %vm7347_vm1 = vmpackc.low %vm792_vm12, %vm776_vm7  ;;  %vm1496_vm11 = vcmp.eq.s32.totalorder %v7950_v44, %v11786_v58  ;;  %v12916_v44 = vld [vmem:[#allocation41_spill] sm:$0xff]  ;;  %v12918_v53 = vld [vmem:[#allocation36_spill] sm:$0xff] }
 0x30a   : > { %vm7309_vm9 = vmpackc.low %vm887_vm10, %vm871_vm5  ;;  %vm1192_vm10 = vcmp.eq.s32.totalorder %v8004_v62, %v11786_v58  ;;  %v12919_v62 = vld [vmem:[#allocation53_spill] sm:$0xff] }
 0x30b   : > { %7382 = vmatpush.bf16.msk.msrb.mxu2 %vm7381_vm2, %v12445_v42  ;;  %vm744_vm2 = vcmp.eq.s32.totalorder %v7954_v48, %v11786_v58  ;;  %vm7399_vm12 = vmpackc.low %vm1496_vm11, %vm1480_vm3  ;;  %vm1032_vm3 = vcmp.eq.s32.totalorder %v12909_v49, %v11786_v58  ;;  %vm1048_vm11 = vcmp.eq.s32.totalorder %v12910_v4, %v11786_v58  ;;  %v12917_v48 = vld [vmem:[#allocation52_spill] sm:$0xff]  ;;  %v4751_v7 = vpop.f32.mrf.mxu1 }
 0x30c   : > { %7346 = vmatpush.bf16.msk.msrb.mxu0 %vm12002_vm4, %v12445_v42  ;;  %7398 = vmatpush.bf16.msk.msrb.mxu3 %vm7397_vm14, %v12445_v42  ;;  %vm1224_vm4 = vcmp.eq.s32.totalorder %v7939_v1, %v11786_v58  ;;  %vm760_vm14 = vcmp.eq.s32.totalorder %v12713_v47, %v11786_v58  ;;  %vm7361_vm7 = vmpackc.low %vm1080_vm15, %vm1064_vm0  ;;  %vm728_vm15 = vcmp.eq.s32.totalorder %v12797_v23, %v11786_v58  ;;  %v12915_v1 = vld [vmem:[#allocation42_spill] sm:$0xff]  ;;  %v4766_v35 = vpop.f32.mrf.mxu2 }
 0x30d   : > { %7310 = vmatpush.bf16.msk.msra.mxu1 %vm7309_vm9, %v12445_v42  ;;  %vm7383_vm13 = vmpackc.low %vm1240_vm8, %vm1224_vm4  ;;  %vm1448_vm8 = vcmp.eq.s32.totalorder %v8022_v6, %v11786_v58  ;;  %vm712_vm4 = vcmp.eq.s32.totalorder %v12680_v40, %v11786_v58  ;;  %v12920_v6 = vld [vmem:[#allocation48_spill] sm:$0xff]  ;;  %v4752_v54 = vadd.f32 %v4751_v7, %v4738_v55  ;;  %v4196_v47 = vld [vmem:[#allocation2 + $0x58] sm:$0x1f] }
 0x30e   : > { %vm7349_vm5 = vmpackc.low %vm760_vm14, %vm744_vm2  ;;  %vm1160_vm2 = vcmp.eq.s32.totalorder %v12878_v13, %v11786_v58  ;;  %v4197_v13 = vld [vmem:[#allocation2 + $0x60] sm:$0x1f] }
 0x30f   : > { %7384 = vmatpush.bf16.msk.msrb.mxu2 %vm7383_vm13, %v12445_v42  ;;  %vm7363_vm0 = vmpackc.low %vm1048_vm11, %vm1032_vm3  ;;  %v4779_v40 = vpop.f32.mrf.mxu3  ;;  %v5078_v4 = vld [vmem:[#allocation2 + $0x4] ss:$8 sm:$0xf0] }
 0x310   : > { %7348 = vmatpush.bf16.msk.msrb.mxu0 %vm7347_vm1, %v12445_v42  ;;  %7400 = vmatpush.bf16.msk.msrb.mxu3 %vm7399_vm12, %v12445_v42  ;;  %vm1208_vm1 = vcmp.eq.s32.totalorder %v12874_v19, %v11786_v58  ;;  %vm1176_vm12 = vcmp.eq.s32.totalorder %v12911_v11, %v11786_v58  ;;  %vm7351_vm14 = vmpackc.low %vm728_vm15, %vm712_vm4  ;;  %vm680_vm4 = vcmp.eq.s32.totalorder %v12918_v53, %v11786_v58  ;;  %v5077_v11 = vld [vmem:[#allocation2 + $0x4] ss:$8 sm:$0xf] }
 0x311   : > { %7360 = vmatpush.bf16.msk.msrb.mxu1 %vm12025_vm6, %v12445_v42  ;;  %vm1464_vm6 = vcmp.eq.s32.totalorder %v12871_v57, %v11786_v58  ;;  %vm7385_vm9 = vmpackc.low %vm1208_vm1, %vm1192_vm10  ;;  %vm1432_vm10 = vcmp.eq.s32.totalorder %v12912_v26, %v11786_v58  ;;  %vm696_vm1 = vcmp.eq.s32.totalorder %v12916_v44, %v11786_v58 }
 0x312   : > { %4958 = vmatmul.bf16.vlgmr.msra.gmra.mxu1 %v12877_v60  ;;  %vm7401_vm13 = vmpackc.low %vm1464_vm6, %vm1448_vm8  ;;  %vm1016_vm8 = vcmp.eq.s32.totalorder %v12914_v41, %v11786_v58 }
 0x313   : > { %7386 = vmatpush.bf16.msk.msrb.mxu2 %vm7385_vm9, %v12445_v42  ;;  %vm7387_vm6 = vmpackc.low %vm1176_vm12, %vm1160_vm2  ;;  %vm1144_vm9 = vcmp.eq.s32.totalorder %v12917_v48, %v11786_v58  ;;  %vm1128_vm2 = vcmp.eq.s32.totalorder %v12920_v6, %v11786_v58 }
 0x314   : > { %7350 = vmatpush.bf16.msk.msrb.mxu0 %vm7349_vm5, %v12445_v42  ;;  %7402 = vmatpush.bf16.msk.msrb.mxu3 %vm7401_vm13, %v12445_v42  ;;  %vm1416_vm5 = vcmp.eq.s32.totalorder %v12915_v1, %v11786_v58  ;;  %vm1384_vm13 = vcmp.eq.s32.totalorder %v12919_v62, %v11786_v58  ;;  %vm7353_vm11 = vmpackc.low %vm696_vm1, %vm680_vm4  ;;  %vm632_vm4 = vcmp.eq.s32.totalorder %v12544_v46, %v11786_v58  ;;  %v4199_v62 = vld [vmem:[#allocation2 + $0x70] sm:$0x1f] }
 0x315   : > { %7362 = vmatpush.bf16.msk.msrb.mxu1 %vm7361_vm7, %v12445_v42  ;;  %vm1000_vm7 = vcmp.eq.s32.totalorder %v12913_v34, %v11786_v58  ;;  %vm7403_vm3 = vmpackc.low %vm1432_vm10, %vm1416_vm5  ;;  %vm984_vm10 = vcmp.eq.s32.totalorder %v12482_v61, %v11786_v58  ;;  %v4765_v61 = vadd.f32 %v4764_v56, %v4752_v54 }
 0x316   : > { %vm7365_vm15 = vmpackc.low %vm1016_vm8, %vm1000_vm7  ;;  %vm648_vm7 = vcmp.eq.s32.totalorder %v12465_v25, %v11786_v58  ;;  %vm968_vm8 = vcmp.eq.s32.totalorder %v12576_v31, %v11786_v58  ;;  %v4195_v25 = vld [vmem:[#allocation2 + $0x50] sm:$0x1f] }
 0x317   : > { %7388 = vmatpush.bf16.msk.msrb.mxu2 %vm7387_vm6, %v12445_v42  ;;  %vm7389_vm12 = vmpackc.low %vm1144_vm9, %vm1128_vm2  ;;  %vm664_vm6 = vcmp.eq.s32.totalorder %v12542_v28, %v11786_v58  ;;  %vm616_vm9 = vcmp.eq.s32.totalorder %v8136_v32, %v11786_v58  ;;  %v4778_v31 = vadd.f32 %v4777_v24, %v4765_v61  ;;  %v4753_v28 = vpop.f32.mrf.mxu1  ;;  %vm904_vm2 = vcmp.eq.s32.totalorder %v12474_v3, %v11786_v58 }
 0x318   : > { %7352 = vmatpush.bf16.msk.msrb.mxu0 %vm7351_vm14, %v12445_v42  ;;  %7404 = vmatpush.bf16.msk.msrb.mxu3 %vm7403_vm3, %v12445_v42  ;;  %vm7367_vm5 = vmpackc.low %vm984_vm10, %vm968_vm8  ;;  %vm936_vm3 = vcmp.eq.s32.totalorder %v12452_v2, %v11786_v58  ;;  %vm888_vm10 = vcmp.eq.s32.totalorder %v8189_v45, %v11786_v58  ;;  %v5079_v24 = vor.u32 %v5078_v4, %v5077_v11 }
 0x319   : > { %7364 = vmatpush.bf16.msk.msrb.mxu1 %vm7363_vm0, %v12445_v42  ;;  %vm1400_vm0 = vcmp.eq.s32.totalorder %v12614_v8, %v11786_v58  ;;  %vm7355_vm1 = vmpackc.low %vm664_vm6, %vm648_vm7  ;;  %v5051_v2 = vadd.f32 %v4778_v31, %v4195_v25 }
 0x31a   : > { %vm7405_vm14 = vmpackc.low %vm1400_vm0, %vm1384_vm13  ;;  %v5084_v53 = vmax.f32 %v5079_v24, 1.0 }
 0x31b   : > { %7390 = vmatpush.bf16.msk.msrb.mxu2 %vm7389_vm12, %v12445_v42  ;;  %vm920_vm12 = vcmp.eq.s32.totalorder %v12475_v27, %v11786_v58  ;;  %5067 = vst [vmem:[#allocation2 + $0x50] sm:$0x1f] %v5051_v2 }
 0x31c   : > { %7354 = vmatpush.bf16.msk.msrb.mxu0 %vm7353_vm11, %v12445_v42  ;;  %7406 = vmatpush.bf16.msk.msrb.mxu3 %vm7405_vm14, %v12445_v42  ;;  %vm7357_vm11 = vmpackc.low %vm632_vm4, %vm616_vm9  ;;  %vm872_vm14 = vcmp.eq.s32.totalorder %v8179_v10, %v11786_v58  ;;  %7493 = vrcp.f32 %v5084_v53  ;;  %vm5091_vm6 = vweird.f32 %v5084_v53 }
 0x31d   : > { %7366 = vmatpush.bf16.msk.msrb.mxu1 %vm7365_vm15, %v12445_v42  ;;  %vm952_vm15 = vcmp.eq.s32.totalorder %v12512_v22, %v11786_v58  ;;  %vm7371_vm0 = vmpackc.low %vm920_vm12, %vm904_vm2 }
 0x31e   : > { %5023 = vmatmul.bf16.vlgmr.msrb.gmra.mxu2 %v12487_v14  ;;  %vm7369_vm13 = vmpackc.low %vm952_vm15, %vm936_vm3  ;;  %vm5204_vm3 = vcmask 1043456  }
 0x31f   : > { %5036 = vmatmul.bf16.vlgmr.msrb.gmra.mxu3 %v12515_v52  ;;  %vm7373_vm7 = vmpackc.low %vm888_vm10, %vm872_vm14  ;;  %v4816_v22 = vpop.f32.mrf.mxu2 }
 0x320   : > { %7356 = vmatpush.bf16.msk.msrb.mxu0 %vm7355_vm1, %v12445_v42 }
 0x321   : > { %7368 = vmatpush.bf16.msk.msrb.mxu1 %vm7367_vm5, %v12445_v42 }
 0x322   : > { %v4790_v14 = vpop.f32.mrf.mxu0  ;;  %v4829_v3 = vpop.f32.mrf.mxu3 }
 0x323   : > { %v7494_v54 = vpop.eup %7493 }
 0x324   : > { %7358 = vmatpush.bf16.msk.msrb.mxu0 %vm7357_vm11, %v12445_v42  ;;  %v5087_v35 = vmul.f32 %v7494_v54, %v5084_v53  ;;  %vm5092_vm8 = vweird.f32 %v7494_v54 }
 0x325   : > { %7370 = vmatpush.bf16.msk.msrb.mxu1 %vm7369_vm13, %v12445_v42  ;;  %vm5093_vm5 = vmor %vm5091_vm6, %vm5092_vm8 }
 0x326   : > { %v5088_v40 = vsub.f32 1.0, %v5087_v35 }
 0x327   : > { %4997 = vmatmul.bf16.vlgmr.msrb.gmra.mxu0 %v8183_v43  ;;  %v4818_v52 = vpop.f32.mrf.mxu2 }
 0x328   : > { %v5089_v2 = vmul.f32 %v7494_v54, %v5088_v40  ;;  %v5095_v52 = vand.u32 2147483647, %v5084_v53 }
 0x329   : > { %7372 = vmatpush.bf16.msk.msrb.mxu1 %vm7371_vm0, %v12445_v42 }
 0x32a   : > { %v4792_v27 = vpop.f32.mrf.mxu0  ;;  %v4831_v46 = vpop.f32.mrf.mxu3  ;;  %v5090_v28 = vadd.f32 %v7494_v54, %v5089_v2  ;;  %vm5096_vm1 = vcmp.eq.f32.partialorder %v5095_v52, 8.507059e+37 }
 0x32d   : > { %7374 = vmatpush.bf16.msk.msrb.mxu1 %vm7373_vm7, %v12445_v42  ;;  %v4803_v32 = vpop.f32.mrf.mxu1 }
 0x32e   : > { %v4804_v43 = vadd.f32 %v4803_v32, %v4790_v14 }
 0x330   : > { %5010 = vmatmul.bf16.vlgmr.msrb.gmra.mxu1 %v12877_v60  ;;  %v4817_v8 = vadd.f32 %v4816_v22, %v4804_v43 }
 0x332   : > { %v4830_v15 = vadd.f32 %v4829_v3, %v4817_v8  ;;  %v5097_v3 = vand.u32 2147483648, %v5084_v53  ;;  %v5094_v8 = vsel %vm5093_vm5, %v7494_v54, %v5090_v28 }
 0x334   : > { %v5052_v45 = vadd.f32 %v4830_v15, %v4196_v47  ;;  %v4200_v47 = vld [vmem:[#allocation2 + $0x78] sm:$0x1f]  ;;  %v5098_v15 = vor.u32 1.1754944e-38, %v5097_v3 }
 0x335   : > { %v4805_v23 = vpop.f32.mrf.mxu1 }
 0x336   : > { %5068 = vst [vmem:[#allocation2 + $0x58] sm:$0x1f] %v5052_v45 }
 0x33d   : > { %v5081_v11 = vld [vmem:[#allocation2 + $0x44] ss:$8 sm:$0xf]  ;;  %v5125_v3 = vld [vmem:[#allocation2 + $0x58] sm:$0xf] }
 0x340   : > { %v4868_v16 = vpop.f32.mrf.mxu2 }
 0x342   : > { %v4842_v10 = vpop.f32.mrf.mxu0 }
 0x343   : > { %v4881_v58 = vpop.f32.mrf.mxu3 }
 0x348   : > { %v4870_v60 = vpop.f32.mrf.mxu2 }
 0x34a   : > { %v4844_v57 = vpop.f32.mrf.mxu0 }
 0x34b   : > { %v4883_v63 = vpop.f32.mrf.mxu3 }
 0x34d   : > { %v4855_v42 = vpop.f32.mrf.mxu1 }
 0x34e   : > { %v4856_v19 = vadd.f32 %v4855_v42, %v4842_v10  ;;  %v5099_v10 = vsel %vm5096_vm1, %v5098_v15, %v5094_v8  ;;  %v5121_v42 = vld [vmem:[#allocation2 + $0x38] sm:$0xf] }
 0x34f   : > { %v5132_v57 = vperm.slane %v5099_v10, 0  ;;  %v5134_v60 = vperm.slane %v5099_v10, 2  ;;  %v5135_v63 = vperm.slane %v5099_v10, 3 }
 0x350   : > { %v4869_v39 = vadd.f32 %v4868_v16, %v4856_v19  ;;  %v5133_v19 = vperm.slane %v5099_v10, 1 }
 0x352   : > { %v4882_v37 = vadd.f32 %v4881_v58, %v4869_v39  ;;  %v5115_v58 = vld [vmem:[#allocation2 + $0x8] sm:$0xf]  ;;  %v5117_v39 = vld [vmem:[#allocation2 + $0x18] sm:$0xf] }
 0x354   : > { %v5053_v36 = vadd.f32 %v4882_v37, %v4197_v13  ;;  %v5136_v13 = vperm.slane %v5099_v10, 4  ;;  %v5137_v37 = vperm.slane %v5099_v10, 5 }
 0x355   : > { %v4857_v5 = vpop.f32.mrf.mxu1 }
 0x356   : > { %5069 = vst [vmem:[#allocation2 + $0x60] sm:$0x1f] %v5053_v36  ;;  %v5138_v36 = vperm.slane %v5099_v10, 6  ;;  %v5139_v5 = vperm.slane %v5099_v10, 7 }
 0x360   : > { %v4920_v0 = vpop.f32.mrf.mxu2 }
 0x363   : > { %v4894_v29 = vpop.f32.mrf.mxu0  ;;  %v4933_v12 = vpop.f32.mrf.mxu3 }
 0x368   : > { %v4922_v9 = vpop.f32.mrf.mxu2 }
 0x36b   : > { %v4896_v59 = vpop.f32.mrf.mxu0  ;;  %v4935_v50 = vpop.f32.mrf.mxu3 }
 0x36c   : > { %v5116_v59 = vld [vmem:[#allocation2 + $0x10] sm:$0xf] }
 0x36e   : > { %v4907_v18 = vpop.f32.mrf.mxu1 }
 0x36f   : > { %v4908_v38 = vadd.f32 %v4907_v18, %v4894_v29  ;;  %v5114_v29 = vld [vmem:[#allocation2] sm:$0xf]  ;;  %v5167_v18 = vmul.f32 %v5135_v63, %v5117_v39 }
 0x370   : > { %v5164_v9 = vmul.f32 %v5132_v57, %v5114_v29 }
 0x371   : > { %v4921_v51 = vadd.f32 %v4920_v0, %v4908_v38  ;;  %v5119_v0 = vld [vmem:[#allocation2 + $0x28] sm:$0xf]  ;;  %v5118_v38 = vld [vmem:[#allocation2 + $0x20] sm:$0xf] }
 0x372   : > { %v5169_v50 = vmul.f32 %v5137_v37, %v5119_v0 }
 0x373   : > { %v4934_v30 = vadd.f32 %v4933_v12, %v4921_v51  ;;  %v5165_v12 = vmul.f32 %v5133_v19, %v5115_v58  ;;  %v5171_v51 = vmul.f32 %v5139_v5, %v5121_v42  ;;  %v5126_v58 = vld [vmem:[#allocation2 + $0x60] sm:$0xf] }
 0x375   : > { %v5054_v20 = vadd.f32 %v4934_v30, %v4198_v17  ;;  %v5120_v17 = vld [vmem:[#allocation2 + $0x30] sm:$0xf]  ;;  %v5166_v30 = vmul.f32 %v5134_v60, %v5116_v59  ;;  %v5199_v4 = vrot.slane %v5171_v51, 4 }
 0x376   : > { %v4909_v33 = vpop.f32.mrf.mxu1 }
 0x377   : > { %5070 = vst [vmem:[#allocation2 + $0x68] sm:$0x1f] %v5054_v20  ;;  %v5196_v20 = vrot.slane %v5165_v12, 4  ;;  %v5197_v33 = vrot.slane %v5167_v18, 4 }
 0x381   : > { %v4972_v55 = vpop.f32.mrf.mxu2 }
 0x384   : > { %v4946_v49 = vpop.f32.mrf.mxu0  ;;  %v4985_v56 = vpop.f32.mrf.mxu3 }
 0x389   : > { %v4974_v1 = vpop.f32.mrf.mxu2 }
 0x38c   : > { %v4948_v34 = vpop.f32.mrf.mxu0  ;;  %v4987_v44 = vpop.f32.mrf.mxu3 }
 0x38d   : > { %v5206_v34 = vsel %vm5204_vm3, %v5166_v30, %v5197_v33 }
 0x38e   : > { %5222 = vst [vmem:[%s12172_s24 + $0x8] sm:$0xff] %v5206_v34 }
 0x38f   : > { %v4959_v26 = vpop.f32.mrf.mxu1 }
 0x390   : > { %v4960_v41 = vadd.f32 %v4959_v26, %v4946_v49  ;;  %v5168_v49 = vmul.f32 %v5136_v13, %v5118_v38  ;;  %v5205_v26 = vsel %vm5204_vm3, %v5164_v9, %v5196_v20 }
 0x391   : > { %5221 = vst [vmem:[%s12172_s24] sm:$0xff] %v5205_v26 }
 0x392   : > { %v4973_v48 = vadd.f32 %v4972_v55, %v4960_v41  ;;  %v5170_v55 = vmul.f32 %v5138_v36, %v5120_v17 }
 0x394   : > { %v4986_v6 = vadd.f32 %v4985_v56, %v4973_v48  ;;  %v5198_v56 = vrot.slane %v5169_v50, 4  ;;  %v5208_v44 = vsel %vm5204_vm3, %v5170_v55, %v5199_v4 }
 0x395   : > { %5224 = vst [vmem:[%s12172_s24 + $0x18] sm:$0xff] %v5208_v44 }
 0x396   : > { %v5055_v7 = vadd.f32 %v4986_v6, %v4199_v62  ;;  %v5207_v1 = vsel %vm5204_vm3, %v5168_v49, %v5198_v56 }
 0x397   : > { %v4961_v21 = vpop.f32.mrf.mxu1  ;;  %5223 = vst [vmem:[%s12172_s24 + $0x10] sm:$0xff] %v5207_v1 }
 0x398   : > { %5071 = vst [vmem:[#allocation2 + $0x70] sm:$0x1f] %v5055_v7 }
 0x39f   : > { %v5128_v42 = vld [vmem:[#allocation2 + $0x70] sm:$0xf] }
 0x3a1   : > { %v5024_v25 = vpop.f32.mrf.mxu2 }
 0x3a2   : > { %v5037_v31 = vpop.f32.mrf.mxu3 }
 0x3a4   : > { %v4998_v61 = vpop.f32.mrf.mxu0 }
 0x3a9   : > { %v5026_v27 = vpop.f32.mrf.mxu2 }
 0x3aa   : > { %v5039_v43 = vpop.f32.mrf.mxu3 }
 0x3ac   : > { %v5000_v14 = vpop.f32.mrf.mxu0 }
 0x3ad   : > { %v5011_v22 = vpop.f32.mrf.mxu1 }
 0x3ae   : > { %v5012_v32 = vadd.f32 %v5011_v22, %v4998_v61 }
 0x3b0   : > { %v5025_v46 = vadd.f32 %v5024_v25, %v5012_v32 }
 0x3b2   : > { %v5038_v45 = vadd.f32 %v5037_v31, %v5025_v46  ;;  %v5123_v31 = vld [vmem:[#allocation2 + $0x48] sm:$0xf] }
 0x3b3   : > { %v5127_v46 = vld [vmem:[#allocation2 + $0x68] sm:$0xf] }
 0x3b4   : > { %v5056_v23 = vadd.f32 %v5038_v45, %v4200_v47  ;;  %v5122_v45 = vld [vmem:[#allocation2 + $0x40] sm:$0xf] }
 0x3b5   : > { %v5013_v16 = vpop.f32.mrf.mxu1 }
 0x3b6   : > { %5072 = vst [vmem:[#allocation2 + $0x78] sm:$0x1f] %v5056_v23  ;;  %v5124_v23 = vld [vmem:[#allocation2 + $0x50] sm:$0xf] }
 0x3bd   : > { %v5082_v24 = vld [vmem:[#allocation2 + $0x44] ss:$8 sm:$0xf0]  ;;  %v5129_v8 = vld [vmem:[#allocation2 + $0x78] sm:$0xf] }
 0x3be   : > { %v5083_v41 = vor.u32 %v5082_v24, %v5081_v11 }
 0x3c0   : > { %v5085_v48 = vmax.f32 %v5083_v41, 1.0 }
 0x3c2   : > { %7495 = vrcp.f32 %v5085_v48  ;;  %v5111_v7 = vand.u32 2147483648, %v5085_v48  ;;  %v5109_v54 = vand.u32 2147483647, %v5085_v48  ;;  %vm5105_vm4 = vweird.f32 %v5085_v48 }
 0x3c4   : > { %v5112_v40 = vor.u32 1.1754944e-38, %v5111_v7  ;;  %vm5110_vm13 = vcmp.eq.f32.partialorder %v5109_v54, 8.507059e+37 }
 0x3c8   : > { %v7496_v53 = vpop.eup %7495 }
 0x3c9   : > { %v5101_v62 = vmul.f32 %v7496_v53, %v5085_v48  ;;  %vm5106_vm9 = vweird.f32 %v7496_v53 }
 0x3ca   : > { %vm5107_vm15 = vmor %vm5105_vm4, %vm5106_vm9 }
 0x3cb   : > { %v5102_v6 = vsub.f32 1.0, %v5101_v62 }
 0x3cd   : > { %v5103_v21 = vmul.f32 %v7496_v53, %v5102_v6 }
 0x3cf   : > { %v5104_v35 = vadd.f32 %v7496_v53, %v5103_v21 }
 0x3d1   : > { %v5108_v61 = vsel %vm5107_vm15, %v7496_v53, %v5104_v35 }
 0x3d2   : > { %v5113_v25 = vsel %vm5110_vm13, %v5112_v40, %v5108_v61 }
 0x3d3   : > { %v5140_v2 = vperm.slane %v5113_v25, 0  ;;  %v5141_v28 = vperm.slane %v5113_v25, 1  ;;  %v5142_v14 = vperm.slane %v5113_v25, 2  ;;  %v5143_v22 = vperm.slane %v5113_v25, 3 }
 0x3d4   : > { %v5144_v32 = vperm.slane %v5113_v25, 4  ;;  %v5145_v27 = vperm.slane %v5113_v25, 5  ;;  %v5146_v43 = vperm.slane %v5113_v25, 6  ;;  %v5147_v52 = vperm.slane %v5113_v25, 7 }
 0x3d5   : > { %v5173_v47 = vmul.f32 %v5141_v28, %v5123_v31  ;;  %v5175_v15 = vmul.f32 %v5143_v22, %v5125_v3  ;;  %v5172_v57 = vmul.f32 %v5140_v2, %v5122_v45  ;;  %v5174_v19 = vmul.f32 %v5142_v14, %v5124_v23 }
 0x3d6   : > { %v5177_v10 = vmul.f32 %v5145_v27, %v5127_v46  ;;  %v5179_v16 = vmul.f32 %v5147_v52, %v5129_v8  ;;  %v5176_v39 = vmul.f32 %v5144_v32, %v5126_v58  ;;  %v5178_v13 = vmul.f32 %v5146_v43, %v5128_v42 }
 0x3d7   : > { %v5200_v60 = vrot.slane %v5173_v47, 4  ;;  %v5201_v63 = vrot.slane %v5175_v15, 4 }
 0x3d8   : > { %v5202_v37 = vrot.slane %v5177_v10, 4  ;;  %v5203_v36 = vrot.slane %v5179_v16, 4 }
 0x3d9   : > { %v5209_v5 = vsel %vm5204_vm3, %v5172_v57, %v5200_v60  ;;  %v5210_v29 = vsel %vm5204_vm3, %v5174_v19, %v5201_v63 }
 0x3da   : > { %v5211_v0 = vsel %vm5204_vm3, %v5176_v39, %v5202_v37  ;;  %v5212_v12 = vsel %vm5204_vm3, %v5178_v13, %v5203_v36  ;;  %5225 = vst [vmem:[%s12172_s24 + $0x20] sm:$0xff] %v5209_v5 }
 0x3db   : > { %5226 = vst [vmem:[%s12172_s24 + $0x28] sm:$0xff] %v5210_v29 }
 0x3dc   : > { %5227 = vst [vmem:[%s12172_s24 + $0x30] sm:$0xff] %v5211_v0 }
 0x3dd   : > { %5228 = vst [vmem:[%s12172_s24 + $0x38] sm:$0xff] %v5212_v12 }
 0x3de   : > { %7524 = shalt.err (!%p7521_p6)
}
 0x3df   : > { %7415 = dma.vmem_to_hbm [thread:$0]  (%p7663_p3), %s5246_s3, 1024, %s5248_s4, %s5230_s5  }
 0x3e0 PF: > { %p7421_p7 = scmp.ge.s32.totalorder %s7591_s16, 2  ;;  %s5259_s18 = sand.u32 1, %s7563_s9  }
 0x3e1   : > { %s5260_s24 = scalar_lea.sflag [#allocation5], %s5259_s18 }
 0x3e2   : > { %p7418_p9 = pnand %p7421_p7, %p7672_p8 }
 0x3e4   : > { %p7419_p10 = pneg %p7418_p9 }
 0x3e6   : > { %7558 = dma.done.wait (%p7419_p10), %s5260_s24, 1024  }
 0x3e7   : > { %7560 = vsyncadd (%p7419_p10), %s5260_s24, 4294966272  ;;  %s15_s16 = sadd.s32 1, %s7591_s16   ;;  %s12921_s9 = smov %s7567_s10 }
 0x3e8   : > { %p12_p11 = scmp.ge.s32.totalorder %s15_s16, 10   ;;  %s12922_s10 = smov %s7571_s11 }
 0x3e9   : > { %s12923_s11 = smov %s7681_s27  ;;  %s12924_s12 = smov %s7583_s14 }
 0x3ea   : > { %s12925_s13 = smov %s7587_s15  ;;  %s12926_s14 = smov %s12929_s19 }
 0x3eb   : > { %s12927_s15 = smov %s12933_s20  ;;  %14 = sbr.rel (!%p12_p11) target bundleno = 5 (0x5), region = 78 }
 0x3f0   :  { %5266 = vsyncpa [#allocation5], 1 }
 0x3f1   :  { %5268 = vsyncpa [#allocation5 + $0x1], 1 }

</bundles_post_ra>
